<compile_context>
chip_gen: v6e
topology: v6e:2x2x1
jax: 0.10.0
libtpu: 0.0.40
codegen_flags: <defaults>
</compile_context>

<pallas_src>
import functools

import jax
import jax.numpy as jnp
from jax import lax
from jax.experimental import pallas as pl
from jax.experimental.pallas import tpu as pltpu


def _round_up(x, m):
    return (x + m - 1) // m * m


def _choose_t_blk(seq_len, max_blk=16):
    """Largest divisor of seq_len that is <= max_blk (keeps grid exact)."""
    for t in range(min(max_blk, seq_len), 0, -1):
        if seq_len % t == 0:
            return t
    return 1


# ----------------------------------------------------------------------------
# Tiled GEMM + bias kernel:  out = x @ wT + b     (row-tiled, "parallel")
# Used for (a) hoisted layer-0 input projection, (b) fused decoder.
# ----------------------------------------------------------------------------
def _matmul_bias_kernel(x_ref, w_ref, b_ref, o_ref):
    o_ref[...] = (jnp.dot(x_ref[...], w_ref[...],
                          preferred_element_type=jnp.float32)
                  + b_ref[...])


def linear_pallas(x, wT, b, tile_m=256):
    """x: (N, K) f32; wT: (K, V) f32; b: (V,) f32 -> (N, V) f32."""
    N, K = x.shape
    V = wT.shape[1]

    Vp = _round_up(V, 128)                  # lane-dense output columns
    tile = min(tile_m, _round_up(N, 8))     # sublane-aligned row tile
    Np = _round_up(N, tile)

    x_p = x if Np == N else jnp.pad(x, ((0, Np - N), (0, 0)))
    wT_p = wT if Vp == V else jnp.pad(wT, ((0, 0), (0, Vp - V)))
    b_p = b if Vp == V else jnp.pad(b, (0, Vp - V))
    b_p = b_p.reshape(1, Vp)

    out = pl.pallas_call(
        _matmul_bias_kernel,
        grid=(Np // tile,),
        in_specs=[
            pl.BlockSpec((tile, K), lambda i: (i, 0)),
            pl.BlockSpec((K, Vp), lambda i: (0, 0)),
            pl.BlockSpec((1, Vp), lambda i: (0, 0)),
        ],
        out_specs=pl.BlockSpec((tile, Vp), lambda i: (i, 0)),
        out_shape=jax.ShapeDtypeStruct((Np, Vp), jnp.float32),
        compiler_params=pltpu.CompilerParams(
            dimension_semantics=("parallel",)),
    )(x_p, wT_p, b_p)
    return out[:N, :V]


# ----------------------------------------------------------------------------
# LSTM kernel: grid over timestep blocks; layers + T_BLK steps unrolled inside.
# Layer-0 input gates (x @ W_ih0^T + b0) are precomputed outside the kernel.
# Running h/c state lives directly in the VMEM-resident hN/cN output blocks.
# ----------------------------------------------------------------------------
def _make_lstm_kernel(nlayers, nhid, t_blk):
    def kernel(*refs):
        # refs = [xg0, h0, c0, w_hh0_T, (w_ih_T, w_hh_T, b) for l>=1,
        #         out, hN, cN]
        xg0_ref = refs[0]
        h0_ref = refs[1]
        c0_ref = refs[2]
        idx = 3
        whh0_ref = refs[idx]
        idx += 1
        upper_refs = []
        for _ in range(nlayers - 1):
            upper_refs.append((refs[idx], refs[idx + 1], refs[idx + 2]))
            idx += 3
        out_ref, hN_ref, cN_ref = refs[idx], refs[idx + 1], refs[idx + 2]

        @pl.when(pl.program_id(0) == 0)
        def _():
            hN_ref[...] = h0_ref[...]
            cN_ref[...] = c0_ref[...]

        # Hoist weight loads out of the timestep loop (loaded once per block).
        w_hh0 = whh0_ref[...]
        upper_w = [(wi[...], wh[...], b[...]) for (wi, wh, b) in upper_refs]

        H = nhid

        def cell(gates, c_prev):
            # PyTorch gate order: i, f, g, o
            i = jax.nn.sigmoid(gates[:, 0 * H:1 * H])
            f = jax.nn.sigmoid(gates[:, 1 * H:2 * H])
            g = jnp.tanh(gates[:, 2 * H:3 * H])
            o = jax.nn.sigmoid(gates[:, 3 * H:4 * H])
            c_new = f * c_prev + i * g
            h_new = o * jnp.tanh(c_new)
            return h_new, c_new

        for tt in range(t_blk):
            # Layer 0: input contribution (incl. bias) was precomputed.
            gates0 = xg0_ref[tt] + jnp.dot(hN_ref[0], w_hh0,
                                           preferred_element_type=jnp.float32)
            h_new, c_new = cell(gates0, cN_ref[0])
            hN_ref[0] = h_new
            cN_ref[0] = c_new
            x = h_new
            for l in range(1, nlayers):
                w_ih, w_hh, b = upper_w[l - 1]
                gates = (jnp.dot(x, w_ih, preferred_element_type=jnp.float32)
                         + jnp.dot(hN_ref[l], w_hh,
                                   preferred_element_type=jnp.float32)
                         + b)
                h_new, c_new = cell(gates, cN_ref[l])
                hN_ref[l] = h_new
                cN_ref[l] = c_new
                x = h_new
            out_ref[tt] = x  # inter-layer dropout is identity in eval mode

    return kernel


def lstm_forward_pallas(xg0, h0, c0, layer_params, t_blk):
    """xg0: (S, B, 4H) precomputed layer-0 input gates (bias folded in);
    h0/c0: (L, B, H); layer_params[l] = (w_ih_T (D_l,4H), w_hh_T (H,4H),
    b (1,4H)) with pre-transposed weights."""
    S, B, G = xg0.shape
    L, _, H = h0.shape
    assert S % t_blk == 0

    in_specs = [
        pl.BlockSpec((t_blk, B, G), lambda t: (t, 0, 0)),
        pl.BlockSpec((L, B, H), lambda t: (0, 0, 0)),
        pl.BlockSpec((L, B, H), lambda t: (0, 0, 0)),
    ]
    args = [xg0, h0, c0]

    w_hh0 = layer_params[0][1]
    in_specs.append(pl.BlockSpec(w_hh0.shape, lambda t: (0, 0)))
    args.append(w_hh0)
    for (w_ih, w_hh, b) in layer_params[1:]:
        in_specs += [pl.BlockSpec(w_ih.shape, lambda t: (0, 0)),
                     pl.BlockSpec(w_hh.shape, lambda t: (0, 0)),
                     pl.BlockSpec(b.shape, lambda t: (0, 0))]
        args += [w_ih, w_hh, b]

    out_shapes = (
        jax.ShapeDtypeStruct((S, B, H), jnp.float32),
        jax.ShapeDtypeStruct((L, B, H), jnp.float32),
        jax.ShapeDtypeStruct((L, B, H), jnp.float32),
    )
    out_specs = (
        pl.BlockSpec((t_blk, B, H), lambda t: (t, 0, 0)),
        pl.BlockSpec((L, B, H), lambda t: (0, 0, 0)),
        pl.BlockSpec((L, B, H), lambda t: (0, 0, 0)),
    )

    out, hN, cN = pl.pallas_call(
        _make_lstm_kernel(L, H, t_blk),
        grid=(S // t_blk,),
        in_specs=in_specs,
        out_specs=out_specs,
        out_shape=out_shapes,
        compiler_params=pltpu.CompilerParams(
            dimension_semantics=("arbitrary",),   # recurrence -> sequential
            vmem_limit_bytes=64 * 1024 * 1024),
    )(*args)
    return out, (hN, cN)


# ----------------------------------------------------------------------------
# Parameters (kernel-friendly layouts: everything pre-transposed at init)
# ----------------------------------------------------------------------------
def init_params(key, ntoken_word, ntoken_phone, ninp, nhid, nlayers, qu_steps):
    initrange = 0.1
    ninp_rnn = 2 * ninp + 2 * qu_steps
    ks = iter(jax.random.split(key, 8 + 4 * nlayers))

    def unif(k, shape, r):
        return jax.random.uniform(k, shape, jnp.float32, -r, r)

    params = {
        "enc_phone": unif(next(ks), (ntoken_phone, ninp), initrange),
        "enc_word": unif(next(ks), (ntoken_word, ninp), initrange),
        "enc_dursw": unif(next(ks), (qu_steps, qu_steps), initrange),
        "enc_dursp": unif(next(ks), (qu_steps, qu_steps), initrange),
        # Decoder weights stored pre-transposed as (H, V).
        "dec_phone_wT": unif(next(ks), (nhid, ntoken_phone), initrange),
        "dec_phone_b": jnp.zeros((ntoken_phone,), jnp.float32),
        "dec_word_wT": unif(next(ks), (nhid, ntoken_word), initrange),
        "dec_word_b": jnp.zeros((ntoken_word,), jnp.float32),
    }
    # LSTM weights, PyTorch-style uniform(-1/sqrt(H), 1/sqrt(H)),
    # stored pre-transposed: w_ih_T (D_l, 4H), w_hh_T (H, 4H), b (1, 4H).
    r = 1.0 / (nhid ** 0.5)
    layers = []
    for l in range(nlayers):
        d_in = ninp_rnn if l == 0 else nhid
        w_ih_T = unif(next(ks), (d_in, 4 * nhid), r)
        w_hh_T = unif(next(ks), (nhid, 4 * nhid), r)
        b_ih = unif(next(ks), (4 * nhid,), r)
        b_hh = unif(next(ks), (4 * nhid,), r)
        layers.append((w_ih_T, w_hh_T, (b_ih + b_hh).reshape(1, 4 * nhid)))
    params["lstm"] = layers
    return params


# ----------------------------------------------------------------------------
# Full model forward (JAX glue around the Pallas kernels)
# ----------------------------------------------------------------------------
def tedlium_combined_forward(params, phone_ids, word_ids, dur_ids, hidden):
    """phone_ids, word_ids: (S, B) int32; dur_ids: (S, B, 2) int32;
    hidden = (h0, c0) each (L, B, H). Returns ((dec_phone, dec_word), hidden)."""
    # Embedding gathers (glue, plain JAX). Dropout = identity (eval mode).
    emb_phone = jnp.take(params["enc_phone"], phone_ids, axis=0)
    emb_word = jnp.take(params["enc_word"], word_ids, axis=0)
    emb_durw = jnp.take(params["enc_dursw"], dur_ids[:, :, 0], axis=0)
    emb_durp = jnp.take(params["enc_dursp"], dur_ids[:, :, 1], axis=0)
    emb = jnp.concatenate([emb_phone, emb_word, emb_durw, emb_durp], axis=2)

    h0, c0 = hidden
    S, B, D = emb.shape
    L, _, H = h0.shape

    # Pad batch toward 8 sublanes (padded rows are independent -> safe).
    B_pad = _round_up(max(B, 8), 8)
    if B_pad != B:
        emb = jnp.pad(emb, ((0, 0), (0, B_pad - B), (0, 0)))
        h0p = jnp.pad(h0, ((0, 0), (0, B_pad - B), (0, 0)))
        c0p = jnp.pad(c0, ((0, 0), (0, B_pad - B), (0, 0)))
    else:
        h0p, c0p = h0, c0

    # Hoist layer-0 input projection out of the recurrence: one big GEMM.
    w_ih0_T, _, b0 = params["lstm"][0]
    xg0 = linear_pallas(emb.reshape(S * B_pad, D), w_ih0_T,
                        b0.reshape(-1)).reshape(S, B_pad, 4 * H)

    t_blk = _choose_t_blk(S)
    out, (hN, cN) = lstm_forward_pallas(xg0, h0p, c0p, params["lstm"], t_blk)

    out = out[:, :B, :]
    hN = hN[:, :B, :]
    cN = cN[:, :B, :]

    # Fused decoder: one GEMM over concatenated (phone | word) output columns.
    V_ph = params["dec_phone_wT"].shape[1]
    wT_cat = jnp.concatenate([params["dec_phone_wT"],
                              params["dec_word_wT"]], axis=1)
    b_cat = jnp.concatenate([params["dec_phone_b"], params["dec_word_b"]])
    out2d = out.reshape(S * B, H)
    logits = linear_pallas(out2d, wT_cat, b_cat)
    dec_phone = logits[:, :V_ph].reshape(S, B, V_ph)
    dec_word = logits[:, V_ph:].reshape(S, B, -1)
    return (dec_phone, dec_word), (hN, cN)


# ----------------------------------------------------------------------------
# Pure-JAX reference (for correctness check)
# ----------------------------------------------------------------------------
def lstm_ref(emb, h0, c0, layer_params):
    def step(carry, x_t):
        h, c = carry
        new_h, new_c = [], []
        inp = x_t
        for l, (w_ih_T, w_hh_T, b) in enumerate(layer_params):
            gates = inp @ w_ih_T + h[l] @ w_hh_T + b[0]
            i, f, g, o = jnp.split(gates, 4, axis=-1)
            cn = jax.nn.sigmoid(f) * c[l] + jax.nn.sigmoid(i) * jnp.tanh(g)
            hn = jax.nn.sigmoid(o) * jnp.tanh(cn)
            new_h.append(hn)
            new_c.append(cn)
            inp = hn
        return (jnp.stack(new_h), jnp.stack(new_c)), inp

    (hN, cN), out = lax.scan(step, (h0, c0), emb)
    return out, hN, cN


def reference_forward(params, phone_ids, word_ids, dur_ids, hidden):
    emb_phone = jnp.take(params["enc_phone"], phone_ids, axis=0)
    emb_word = jnp.take(params["enc_word"], word_ids, axis=0)
    emb_durw = jnp.take(params["enc_dursw"], dur_ids[:, :, 0], axis=0)
    emb_durp = jnp.take(params["enc_dursp"], dur_ids[:, :, 1], axis=0)
    emb = jnp.concatenate([emb_phone, emb_word, emb_durw, emb_durp], axis=2)
    h0, c0 = hidden
    out, hN, cN = lstm_ref(emb, h0, c0, params["lstm"])
    S, B, H = out.shape
    out2d = out.reshape(S * B, H)
    dp = (out2d @ params["dec_phone_wT"] + params["dec_phone_b"]).reshape(S, B, -1)
    dw = (out2d @ params["dec_word_wT"] + params["dec_word_b"]).reshape(S, B, -1)
    return (dp, dw), (hN, cN)


# ----------------------------------------------------------------------------
if __name__ == "__main__":
    # Small, module-consistent shapes.
    ntoken_word = 50
    ntoken_phone = 40
    ninp = 32
    nhid = 32
    nlayers = 2
    qu_steps = 20
    seq = 8
    bsz = 2

    key = jax.random.PRNGKey(0)
    kp, kw, kd, kinit = jax.random.split(key, 4)

    params = init_params(kinit, ntoken_word, ntoken_phone, ninp, nhid,
                         nlayers, qu_steps)

    phone_ids = jax.random.randint(kp, (seq, bsz), 0, ntoken_phone, jnp.int32)
    word_ids = jax.random.randint(kw, (seq, bsz), 0, ntoken_word, jnp.int32)
    dur_ids = jax.random.randint(kd, (seq, bsz, 2), 0, qu_steps, jnp.int32)

    # init_hidden(bsz) for LSTM
    h0 = jnp.zeros((nlayers, bsz, nhid), jnp.float32)
    c0 = jnp.zeros((nlayers, bsz, nhid), jnp.float32)

    fwd = jax.jit(functools.partial(tedlium_combined_forward, params))
    (dec_phone, dec_word), (hN, cN) = fwd(phone_ids, word_ids, dur_ids, (h0, c0))
    jax.block_until_ready((dec_phone, dec_word, hN, cN))

    # Sanity check against pure-JAX reference.
    (rp, rw), (rh, rc) = reference_forward(params, phone_ids, word_ids,
                                           dur_ids, (h0, c0))
    assert dec_phone.shape == (seq, bsz, ntoken_phone)
    assert dec_word.shape == (seq, bsz, ntoken_word)
    assert jnp.allclose(dec_phone, rp, atol=2e-2, rtol=2e-2)
    assert jnp.allclose(dec_word, rw, atol=2e-2, rtol=2e-2)
    assert jnp.allclose(hN, rh, atol=2e-2, rtol=2e-2)
    assert jnp.allclose(cN, rc, atol=2e-2, rtol=2e-2)

    print("KERNEL_OK")
</pallas_src>

<mosaic_0001>
module attributes {stable_mosaic.version = 11 : i64} {
  func.func @_matmul_bias_kernel(%arg0: i32, %arg1: memref<64x104xf32, #tpu.memory_space<vmem>>, %arg2: memref<104x128xf32, #tpu.memory_space<vmem>>, %arg3: memref<1x128xf32, #tpu.memory_space<vmem>>, %arg4: memref<64x128xf32, #tpu.memory_space<vmem>>) attributes {dimension_semantics = [#tpu.dimension_semantics<parallel>], iteration_bounds = array<i64: 1>, scalar_prefetch = 0 : i64, scratch_operands = 0 : i64, tpu.core_type = #tpu.core_type<tc>, window_params = [{transform_indices = @transform_0, window_bounds = array<i64: 64, 104>}, {pipeline_mode = #tpu.pipeline_mode<synchronous>, transform_indices = @transform_1, window_bounds = array<i64: 104, 128>}, {pipeline_mode = #tpu.pipeline_mode<synchronous>, transform_indices = @transform_2, window_bounds = array<i64: 1, 128>}, {transform_indices = @transform_3, window_bounds = array<i64: 64, 128>}]} {
    %c0 = arith.constant 0 : index
    %c0_0 = arith.constant 0 : index
    %0 = vector.load %arg1[%c0, %c0_0] : memref<64x104xf32, #tpu.memory_space<vmem>>, vector<64x104xf32>
    %c0_1 = arith.constant 0 : index
    %c0_2 = arith.constant 0 : index
    %1 = vector.load %arg2[%c0_1, %c0_2] : memref<104x128xf32, #tpu.memory_space<vmem>>, vector<104x128xf32>
    %cst = arith.constant dense<0.000000e+00> : vector<64x128xf32>
    %2 = tpu.matmul %0, %1, %cst {dimension_numbers = #tpu.dot_dimension_numbers<[1], [0], [0], [1], [0, 0, 1, 1], [], []>} : vector<64x104xf32>, vector<104x128xf32>, vector<64x128xf32> -> vector<64x128xf32>
    %c0_3 = arith.constant 0 : index
    %c0_4 = arith.constant 0 : index
    %3 = vector.load %arg3[%c0_3, %c0_4] : memref<1x128xf32, #tpu.memory_space<vmem>>, vector<1x128xf32>
    %4 = vector.broadcast %3 : vector<1x128xf32> to vector<64x128xf32>
    %5 = arith.addf %2, %4 : vector<64x128xf32>
    %c0_5 = arith.constant 0 : index
    %c0_6 = arith.constant 0 : index
    %6 = vector.load %arg4[%c0_5, %c0_6] : memref<64x128xf32, #tpu.memory_space<vmem>>, vector<64x128xf32>
    tpu.vector_store %arg4[%c0_5, %c0_6], %5 {strides = array<i32>} : memref<64x128xf32, #tpu.memory_space<vmem>>, vector<64x128xf32>,
    return
  }
  func.func @transform_0(%arg0: i32) -> (i32, i32) {
    %c0_i32 = arith.constant 0 : i32
    %c0_i32_0 = arith.constant 0 : i32
    return %arg0, %c0_i32 : i32, i32
  }
  func.func @transform_1(%arg0: i32) -> (i32, i32) {
    %c0_i32 = arith.constant 0 : i32
    %c0_i32_0 = arith.constant 0 : i32
    %c0_i32_1 = arith.constant 0 : i32
    return %c0_i32, %c0_i32_0 : i32, i32
  }
  func.func @transform_2(%arg0: i32) -> (i32, i32) {
    %c0_i32 = arith.constant 0 : i32
    %c0_i32_0 = arith.constant 0 : i32
    %c0_i32_1 = arith.constant 0 : i32
    return %c0_i32, %c0_i32_0 : i32, i32
  }
  func.func @transform_3(%arg0: i32) -> (i32, i32) {
    %c0_i32 = arith.constant 0 : i32
    %c0_i32_0 = arith.constant 0 : i32
    return %arg0, %c0_i32 : i32, i32
  }
}

module attributes {stable_mosaic.version = 11 : i64} {
  func.func @kernel(%arg0: i32, %arg1: memref<8x8x128xf32, #tpu.memory_space<vmem>>, %arg2: memref<2x8x32xf32, #tpu.memory_space<vmem>>, %arg3: memref<2x8x32xf32, #tpu.memory_space<vmem>>, %arg4: memref<32x128xf32, #tpu.memory_space<vmem>>, %arg5: memref<32x128xf32, #tpu.memory_space<vmem>>, %arg6: memref<32x128xf32, #tpu.memory_space<vmem>>, %arg7: memref<1x128xf32, #tpu.memory_space<vmem>>, %arg8: memref<8x8x32xf32, #tpu.memory_space<vmem>>, %arg9: memref<2x8x32xf32, #tpu.memory_space<vmem>>, %arg10: memref<2x8x32xf32, #tpu.memory_space<vmem>>) attributes {dimension_semantics = [#tpu.dimension_semantics<arbitrary>], iteration_bounds = array<i64: 1>, scalar_prefetch = 0 : i64, scratch_operands = 0 : i64, tpu.core_type = #tpu.core_type<tc>, window_params = [{transform_indices = @transform_0, window_bounds = array<i64: 8, 8, 128>}, {pipeline_mode = #tpu.pipeline_mode<synchronous>, transform_indices = @transform_1, window_bounds = array<i64: 2, 8, 32>}, {pipeline_mode = #tpu.pipeline_mode<synchronous>, transform_indices = @transform_2, window_bounds = array<i64: 2, 8, 32>}, {pipeline_mode = #tpu.pipeline_mode<synchronous>, transform_indices = @transform_3, window_bounds = array<i64: 32, 128>}, {pipeline_mode = #tpu.pipeline_mode<synchronous>, transform_indices = @transform_4, window_bounds = array<i64: 32, 128>}, {pipeline_mode = #tpu.pipeline_mode<synchronous>, transform_indices = @transform_5, window_bounds = array<i64: 32, 128>}, {pipeline_mode = #tpu.pipeline_mode<synchronous>, transform_indices = @transform_6, window_bounds = array<i64: 1, 128>}, {transform_indices = @transform_7, window_bounds = array<i64: 8, 8, 32>}, {pipeline_mode = #tpu.pipeline_mode<synchronous>, transform_indices = @transform_8, window_bounds = array<i64: 2, 8, 32>}, {pipeline_mode = #tpu.pipeline_mode<synchronous>, transform_indices = @transform_9, window_bounds = array<i64: 2, 8, 32>}]} {
    %c0_i32 = arith.constant 0 : i32
    %0 = arith.cmpi eq, %arg0, %c0_i32 : i32
    %1 = arith.extui %0 : i1 to i32
    %c0_i32_0 = arith.constant 0 : i32
    %2 = arith.cmpi ne, %1, %c0_i32_0 : i32
    scf.if %2 {
      %c0_312 = arith.constant 0 : index
      %c0_313 = arith.constant 0 : index
      %c0_314 = arith.constant 0 : index
      %663 = vector.load %arg2[%c0_312, %c0_313, %c0_314] : memref<2x8x32xf32, #tpu.memory_space<vmem>>, vector<2x8x32xf32>
      %c0_315 = arith.constant 0 : index
      %c0_316 = arith.constant 0 : index
      %c0_317 = arith.constant 0 : index
      %664 = vector.load %arg9[%c0_315, %c0_316, %c0_317] : memref<2x8x32xf32, #tpu.memory_space<vmem>>, vector<2x8x32xf32>
      tpu.vector_store %arg9[%c0_315, %c0_316, %c0_317], %663 {strides = array<i32>} : memref<2x8x32xf32, #tpu.memory_space<vmem>>, vector<2x8x32xf32>,
      %c0_318 = arith.constant 0 : index
      %c0_319 = arith.constant 0 : index
      %c0_320 = arith.constant 0 : index
      %665 = vector.load %arg3[%c0_318, %c0_319, %c0_320] : memref<2x8x32xf32, #tpu.memory_space<vmem>>, vector<2x8x32xf32>
      %c0_321 = arith.constant 0 : index
      %c0_322 = arith.constant 0 : index
      %c0_323 = arith.constant 0 : index
      %666 = vector.load %arg10[%c0_321, %c0_322, %c0_323] : memref<2x8x32xf32, #tpu.memory_space<vmem>>, vector<2x8x32xf32>
      tpu.vector_store %arg10[%c0_321, %c0_322, %c0_323], %665 {strides = array<i32>} : memref<2x8x32xf32, #tpu.memory_space<vmem>>, vector<2x8x32xf32>,
    } else {
    }
    %c0 = arith.constant 0 : index
    %c0_1 = arith.constant 0 : index
    %3 = vector.load %arg4[%c0, %c0_1] : memref<32x128xf32, #tpu.memory_space<vmem>>, vector<32x128xf32>
    %c0_2 = arith.constant 0 : index
    %c0_3 = arith.constant 0 : index
    %4 = vector.load %arg5[%c0_2, %c0_3] : memref<32x128xf32, #tpu.memory_space<vmem>>, vector<32x128xf32>
    %c0_4 = arith.constant 0 : index
    %c0_5 = arith.constant 0 : index
    %5 = vector.load %arg6[%c0_4, %c0_5] : memref<32x128xf32, #tpu.memory_space<vmem>>, vector<32x128xf32>
    %c0_6 = arith.constant 0 : index
    %c0_7 = arith.constant 0 : index
    %6 = vector.load %arg7[%c0_6, %c0_7] : memref<1x128xf32, #tpu.memory_space<vmem>>, vector<1x128xf32>
    %c0_8 = arith.constant 0 : index
    %c0_9 = arith.constant 0 : index
    %c0_10 = arith.constant 0 : index
    %7 = vector.load %arg1[%c0_8, %c0_9, %c0_10] : memref<8x8x128xf32, #tpu.memory_space<vmem>>, vector<1x8x128xf32>
    %8 = vector.shape_cast %7 : vector<1x8x128xf32> to vector<8x128xf32>
    %c0_11 = arith.constant 0 : index
    %c0_12 = arith.constant 0 : index
    %c0_13 = arith.constant 0 : index
    %9 = vector.load %arg9[%c0_11, %c0_12, %c0_13] : memref<2x8x32xf32, #tpu.memory_space<vmem>>, vector<1x8x32xf32>
    %10 = vector.shape_cast %9 : vector<1x8x32xf32> to vector<8x32xf32>
    %cst = arith.constant dense<0.000000e+00> : vector<8x128xf32>
    %11 = tpu.matmul %10, %3, %cst {dimension_numbers = #tpu.dot_dimension_numbers<[1], [0], [0], [1], [0, 0, 1, 1], [], []>} : vector<8x32xf32>, vector<32x128xf32>, vector<8x128xf32> -> vector<8x128xf32>
    %12 = arith.addf %8, %11 : vector<8x128xf32>
    %c0_14 = arith.constant 0 : index
    %c0_15 = arith.constant 0 : index
    %c0_16 = arith.constant 0 : index
    %13 = vector.load %arg10[%c0_14, %c0_15, %c0_16] : memref<2x8x32xf32, #tpu.memory_space<vmem>>, vector<1x8x32xf32>
    %14 = vector.shape_cast %13 : vector<1x8x32xf32> to vector<8x32xf32>
    %15 = vector.extract_strided_slice %12 {offsets = [0, 0], sizes = [8, 32], strides = [1, 1]} : vector<8x128xf32> to vector<8x32xf32>
    %16 = arith.negf %15 : vector<8x32xf32>
    %17 = math.exp %16 : vector<8x32xf32>
    %cst_17 = arith.constant 1.000000e+00 : f32
    %18 = vector.broadcast %cst_17 : f32 to vector<8x32xf32>
    %19 = arith.addf %18, %17 : vector<8x32xf32>
    %20 = arith.divf %18, %19 : vector<8x32xf32>
    %21 = vector.extract_strided_slice %12 {offsets = [0, 32], sizes = [8, 32], strides = [1, 1]} : vector<8x128xf32> to vector<8x32xf32>
    %22 = arith.negf %21 : vector<8x32xf32>
    %23 = math.exp %22 : vector<8x32xf32>
    %cst_18 = arith.constant 1.000000e+00 : f32
    %24 = vector.broadcast %cst_18 : f32 to vector<8x32xf32>
    %25 = arith.addf %24, %23 : vector<8x32xf32>
    %26 = arith.divf %24, %25 : vector<8x32xf32>
    %27 = vector.extract_strided_slice %12 {offsets = [0, 64], sizes = [8, 32], strides = [1, 1]} : vector<8x128xf32> to vector<8x32xf32>
    %28 = math.tanh %27 : vector<8x32xf32>
    %29 = vector.extract_strided_slice %12 {offsets = [0, 96], sizes = [8, 32], strides = [1, 1]} : vector<8x128xf32> to vector<8x32xf32>
    %30 = arith.negf %29 : vector<8x32xf32>
    %31 = math.exp %30 : vector<8x32xf32>
    %cst_19 = arith.constant 1.000000e+00 : f32
    %32 = vector.broadcast %cst_19 : f32 to vector<8x32xf32>
    %33 = arith.addf %32, %31 : vector<8x32xf32>
    %34 = arith.divf %32, %33 : vector<8x32xf32>
    %35 = arith.mulf %26, %14 : vector<8x32xf32>
    %36 = arith.mulf %20, %28 : vector<8x32xf32>
    %37 = arith.addf %35, %36 : vector<8x32xf32>
    %38 = math.tanh %37 : vector<8x32xf32>
    %39 = arith.mulf %34, %38 : vector<8x32xf32>
    %c0_20 = arith.constant 0 : index
    %c0_21 = arith.constant 0 : index
    %c0_22 = arith.constant 0 : index
    %40 = vector.load %arg9[%c0_20, %c0_21, %c0_22] : memref<2x8x32xf32, #tpu.memory_space<vmem>>, vector<1x8x32xf32>
    %41 = vector.shape_cast %40 : vector<1x8x32xf32> to vector<8x32xf32>
    %42 = vector.shape_cast %39 : vector<8x32xf32> to vector<1x8x32xf32>
    tpu.vector_store %arg9[%c0_20, %c0_21, %c0_22], %42 {strides = array<i32>} : memref<2x8x32xf32, #tpu.memory_space<vmem>>, vector<1x8x32xf32>,
    %c0_23 = arith.constant 0 : index
    %c0_24 = arith.constant 0 : index
    %c0_25 = arith.constant 0 : index
    %43 = vector.load %arg10[%c0_23, %c0_24, %c0_25] : memref<2x8x32xf32, #tpu.memory_space<vmem>>, vector<1x8x32xf32>
    %44 = vector.shape_cast %43 : vector<1x8x32xf32> to vector<8x32xf32>
    %45 = vector.shape_cast %37 : vector<8x32xf32> to vector<1x8x32xf32>
    tpu.vector_store %arg10[%c0_23, %c0_24, %c0_25], %45 {strides = array<i32>} : memref<2x8x32xf32, #tpu.memory_space<vmem>>, vector<1x8x32xf32>,
    %cst_26 = arith.constant dense<0.000000e+00> : vector<8x128xf32>
    %46 = tpu.matmul %39, %4, %cst_26 {dimension_numbers = #tpu.dot_dimension_numbers<[1], [0], [0], [1], [0, 0, 1, 1], [], []>} : vector<8x32xf32>, vector<32x128xf32>, vector<8x128xf32> -> vector<8x128xf32>
    %c1 = arith.constant 1 : index
    %c0_27 = arith.constant 0 : index
    %c0_28 = arith.constant 0 : index
    %47 = vector.load %arg9[%c1, %c0_27, %c0_28] : memref<2x8x32xf32, #tpu.memory_space<vmem>>, vector<1x8x32xf32>
    %48 = vector.shape_cast %47 : vector<1x8x32xf32> to vector<8x32xf32>
    %cst_29 = arith.constant dense<0.000000e+00> : vector<8x128xf32>
    %49 = tpu.matmul %48, %5, %cst_29 {dimension_numbers = #tpu.dot_dimension_numbers<[1], [0], [0], [1], [0, 0, 1, 1], [], []>} : vector<8x32xf32>, vector<32x128xf32>, vector<8x128xf32> -> vector<8x128xf32>
    %50 = arith.addf %46, %49 : vector<8x128xf32>
    %51 = vector.broadcast %6 : vector<1x128xf32> to vector<8x128xf32>
    %52 = arith.addf %50, %51 : vector<8x128xf32>
    %c1_30 = arith.constant 1 : index
    %c0_31 = arith.constant 0 : index
    %c0_32 = arith.constant 0 : index
    %53 = vector.load %arg10[%c1_30, %c0_31, %c0_32] : memref<2x8x32xf32, #tpu.memory_space<vmem>>, vector<1x8x32xf32>
    %54 = vector.shape_cast %53 : vector<1x8x32xf32> to vector<8x32xf32>
    %55 = vector.extract_strided_slice %52 {offsets = [0, 0], sizes = [8, 32], strides = [1, 1]} : vector<8x128xf32> to vector<8x32xf32>
    %56 = arith.negf %55 : vector<8x32xf32>
    %57 = math.exp %56 : vector<8x32xf32>
    %cst_33 = arith.constant 1.000000e+00 : f32
    %58 = vector.broadcast %cst_33 : f32 to vector<8x32xf32>
    %59 = arith.addf %58, %57 : vector<8x32xf32>
    %60 = arith.divf %58, %59 : vector<8x32xf32>
    %61 = vector.extract_strided_slice %52 {offsets = [0, 32], sizes = [8, 32], strides = [1, 1]} : vector<8x128xf32> to vector<8x32xf32>
    %62 = arith.negf %61 : vector<8x32xf32>
    %63 = math.exp %62 : vector<8x32xf32>
    %cst_34 = arith.constant 1.000000e+00 : f32
    %64 = vector.broadcast %cst_34 : f32 to vector<8x32xf32>
    %65 = arith.addf %64, %63 : vector<8x32xf32>
    %66 = arith.divf %64, %65 : vector<8x32xf32>
    %67 = vector.extract_strided_slice %52 {offsets = [0, 64], sizes = [8, 32], strides = [1, 1]} : vector<8x128xf32> to vector<8x32xf32>
    %68 = math.tanh %67 : vector<8x32xf32>
    %69 = vector.extract_strided_slice %52 {offsets = [0, 96], sizes = [8, 32], strides = [1, 1]} : vector<8x128xf32> to vector<8x32xf32>
    %70 = arith.negf %69 : vector<8x32xf32>
    %71 = math.exp %70 : vector<8x32xf32>
    %cst_35 = arith.constant 1.000000e+00 : f32
    %72 = vector.broadcast %cst_35 : f32 to vector<8x32xf32>
    %73 = arith.addf %72, %71 : vector<8x32xf32>
    %74 = arith.divf %72, %73 : vector<8x32xf32>
    %75 = arith.mulf %66, %54 : vector<8x32xf32>
    %76 = arith.mulf %60, %68 : vector<8x32xf32>
    %77 = arith.addf %75, %76 : vector<8x32xf32>
    %78 = math.tanh %77 : vector<8x32xf32>
    %79 = arith.mulf %74, %78 : vector<8x32xf32>
    %c1_36 = arith.constant 1 : index
    %c0_37 = arith.constant 0 : index
    %c0_38 = arith.constant 0 : index
    %80 = vector.load %arg9[%c1_36, %c0_37, %c0_38] : memref<2x8x32xf32, #tpu.memory_space<vmem>>, vector<1x8x32xf32>
    %81 = vector.shape_cast %80 : vector<1x8x32xf32> to vector<8x32xf32>
    %82 = vector.shape_cast %79 : vector<8x32xf32> to vector<1x8x32xf32>
    tpu.vector_store %arg9[%c1_36, %c0_37, %c0_38], %82 {strides = array<i32>} : memref<2x8x32xf32, #tpu.memory_space<vmem>>, vector<1x8x32xf32>,
    %c1_39 = arith.constant 1 : index
    %c0_40 = arith.constant 0 : index
    %c0_41 = arith.constant 0 : index
    %83 = vector.load %arg10[%c1_39, %c0_40, %c0_41] : memref<2x8x32xf32, #tpu.memory_space<vmem>>, vector<1x8x32xf32>
    %84 = vector.shape_cast %83 : vector<1x8x32xf32> to vector<8x32xf32>
    %85 = vector.shape_cast %77 : vector<8x32xf32> to vector<1x8x32xf32>
    tpu.vector_store %arg10[%c1_39, %c0_40, %c0_41], %85 {strides = array<i32>} : memref<2x8x32xf32, #tpu.memory_space<vmem>>, vector<1x8x32xf32>,
    %c0_42 = arith.constant 0 : index
    %c0_43 = arith.constant 0 : index
    %c0_44 = arith.constant 0 : index
    %86 = vector.load %arg8[%c0_42, %c0_43, %c0_44] : memref<8x8x32xf32, #tpu.memory_space<vmem>>, vector<1x8x32xf32>
    %87 = vector.shape_cast %86 : vector<1x8x32xf32> to vector<8x32xf32>
    %88 = vector.shape_cast %79 : vector<8x32xf32> to vector<1x8x32xf32>
    tpu.vector_store %arg8[%c0_42, %c0_43, %c0_44], %88 {strides = array<i32>} : memref<8x8x32xf32, #tpu.memory_space<vmem>>, vector<1x8x32xf32>,
    %c1_45 = arith.constant 1 : index
    %c0_46 = arith.constant 0 : index
    %c0_47 = arith.constant 0 : index
    %89 = vector.load %arg1[%c1_45, %c0_46, %c0_47] : memref<8x8x128xf32, #tpu.memory_space<vmem>>, vector<1x8x128xf32>
    %90 = vector.shape_cast %89 : vector<1x8x128xf32> to vector<8x128xf32>
    %c0_48 = arith.constant 0 : index
    %c0_49 = arith.constant 0 : index
    %c0_50 = arith.constant 0 : index
    %91 = vector.load %arg9[%c0_48, %c0_49, %c0_50] : memref<2x8x32xf32, #tpu.memory_space<vmem>>, vector<1x8x32xf32>
    %92 = vector.shape_cast %91 : vector<1x8x32xf32> to vector<8x32xf32>
    %cst_51 = arith.constant dense<0.000000e+00> : vector<8x128xf32>
    %93 = tpu.matmul %92, %3, %cst_51 {dimension_numbers = #tpu.dot_dimension_numbers<[1], [0], [0], [1], [0, 0, 1, 1], [], []>} : vector<8x32xf32>, vector<32x128xf32>, vector<8x128xf32> -> vector<8x128xf32>
    %94 = arith.addf %90, %93 : vector<8x128xf32>
    %c0_52 = arith.constant 0 : index
    %c0_53 = arith.constant 0 : index
    %c0_54 = arith.constant 0 : index
    %95 = vector.load %arg10[%c0_52, %c0_53, %c0_54] : memref<2x8x32xf32, #tpu.memory_space<vmem>>, vector<1x8x32xf32>
    %96 = vector.shape_cast %95 : vector<1x8x32xf32> to vector<8x32xf32>
    %97 = vector.extract_strided_slice %94 {offsets = [0, 0], sizes = [8, 32], strides = [1, 1]} : vector<8x128xf32> to vector<8x32xf32>
    %98 = arith.negf %97 : vector<8x32xf32>
    %99 = math.exp %98 : vector<8x32xf32>
    %cst_55 = arith.constant 1.000000e+00 : f32
    %100 = vector.broadcast %cst_55 : f32 to vector<8x32xf32>
    %101 = arith.addf %100, %99 : vector<8x32xf32>
    %102 = arith.divf %100, %101 : vector<8x32xf32>
    %103 = vector.extract_strided_slice %94 {offsets = [0, 32], sizes = [8, 32], strides = [1, 1]} : vector<8x128xf32> to vector<8x32xf32>
    %104 = arith.negf %103 : vector<8x32xf32>
    %105 = math.exp %104 : vector<8x32xf32>
    %cst_56 = arith.constant 1.000000e+00 : f32
    %106 = vector.broadcast %cst_56 : f32 to vector<8x32xf32>
    %107 = arith.addf %106, %105 : vector<8x32xf32>
    %108 = arith.divf %106, %107 : vector<8x32xf32>
    %109 = vector.extract_strided_slice %94 {offsets = [0, 64], sizes = [8, 32], strides = [1, 1]} : vector<8x128xf32> to vector<8x32xf32>
    %110 = math.tanh %109 : vector<8x32xf32>
    %111 = vector.extract_strided_slice %94 {offsets = [0, 96], sizes = [8, 32], strides = [1, 1]} : vector<8x128xf32> to vector<8x32xf32>
    %112 = arith.negf %111 : vector<8x32xf32>
    %113 = math.exp %112 : vector<8x32xf32>
    %cst_57 = arith.constant 1.000000e+00 : f32
    %114 = vector.broadcast %cst_57 : f32 to vector<8x32xf32>
    %115 = arith.addf %114, %113 : vector<8x32xf32>
    %116 = arith.divf %114, %115 : vector<8x32xf32>
    %117 = arith.mulf %108, %96 : vector<8x32xf32>
    %118 = arith.mulf %102, %110 : vector<8x32xf32>
    %119 = arith.addf %117, %118 : vector<8x32xf32>
    %120 = math.tanh %119 : vector<8x32xf32>
    %121 = arith.mulf %116, %120 : vector<8x32xf32>
    %c0_58 = arith.constant 0 : index
    %c0_59 = arith.constant 0 : index
    %c0_60 = arith.constant 0 : index
    %122 = vector.load %arg9[%c0_58, %c0_59, %c0_60] : memref<2x8x32xf32, #tpu.memory_space<vmem>>, vector<1x8x32xf32>
    %123 = vector.shape_cast %122 : vector<1x8x32xf32> to vector<8x32xf32>
    %124 = vector.shape_cast %121 : vector<8x32xf32> to vector<1x8x32xf32>
    tpu.vector_store %arg9[%c0_58, %c0_59, %c0_60], %124 {strides = array<i32>} : memref<2x8x32xf32, #tpu.memory_space<vmem>>, vector<1x8x32xf32>,
    %c0_61 = arith.constant 0 : index
    %c0_62 = arith.constant 0 : index
    %c0_63 = arith.constant 0 : index
    %125 = vector.load %arg10[%c0_61, %c0_62, %c0_63] : memref<2x8x32xf32, #tpu.memory_space<vmem>>, vector<1x8x32xf32>
    %126 = vector.shape_cast %125 : vector<1x8x32xf32> to vector<8x32xf32>
    %127 = vector.shape_cast %119 : vector<8x32xf32> to vector<1x8x32xf32>
    tpu.vector_store %arg10[%c0_61, %c0_62, %c0_63], %127 {strides = array<i32>} : memref<2x8x32xf32, #tpu.memory_space<vmem>>, vector<1x8x32xf32>,
    %cst_64 = arith.constant dense<0.000000e+00> : vector<8x128xf32>
    %128 = tpu.matmul %121, %4, %cst_64 {dimension_numbers = #tpu.dot_dimension_numbers<[1], [0], [0], [1], [0, 0, 1, 1], [], []>} : vector<8x32xf32>, vector<32x128xf32>, vector<8x128xf32> -> vector<8x128xf32>
    %c1_65 = arith.constant 1 : index
    %c0_66 = arith.constant 0 : index
    %c0_67 = arith.constant 0 : index
    %129 = vector.load %arg9[%c1_65, %c0_66, %c0_67] : memref<2x8x32xf32, #tpu.memory_space<vmem>>, vector<1x8x32xf32>
    %130 = vector.shape_cast %129 : vector<1x8x32xf32> to vector<8x32xf32>
    %cst_68 = arith.constant dense<0.000000e+00> : vector<8x128xf32>
    %131 = tpu.matmul %130, %5, %cst_68 {dimension_numbers = #tpu.dot_dimension_numbers<[1], [0], [0], [1], [0, 0, 1, 1], [], []>} : vector<8x32xf32>, vector<32x128xf32>, vector<8x128xf32> -> vector<8x128xf32>
    %132 = arith.addf %128, %131 : vector<8x128xf32>
    %133 = vector.broadcast %6 : vector<1x128xf32> to vector<8x128xf32>
    %134 = arith.addf %132, %133 : vector<8x128xf32>
    %c1_69 = arith.constant 1 : index
    %c0_70 = arith.constant 0 : index
    %c0_71 = arith.constant 0 : index
    %135 = vector.load %arg10[%c1_69, %c0_70, %c0_71] : memref<2x8x32xf32, #tpu.memory_space<vmem>>, vector<1x8x32xf32>
    %136 = vector.shape_cast %135 : vector<1x8x32xf32> to vector<8x32xf32>
    %137 = vector.extract_strided_slice %134 {offsets = [0, 0], sizes = [8, 32], strides = [1, 1]} : vector<8x128xf32> to vector<8x32xf32>
    %138 = arith.negf %137 : vector<8x32xf32>
    %139 = math.exp %138 : vector<8x32xf32>
    %cst_72 = arith.constant 1.000000e+00 : f32
    %140 = vector.broadcast %cst_72 : f32 to vector<8x32xf32>
    %141 = arith.addf %140, %139 : vector<8x32xf32>
    %142 = arith.divf %140, %141 : vector<8x32xf32>
    %143 = vector.extract_strided_slice %134 {offsets = [0, 32], sizes = [8, 32], strides = [1, 1]} : vector<8x128xf32> to vector<8x32xf32>
    %144 = arith.negf %143 : vector<8x32xf32>
    %145 = math.exp %144 : vector<8x32xf32>
    %cst_73 = arith.constant 1.000000e+00 : f32
    %146 = vector.broadcast %cst_73 : f32 to vector<8x32xf32>
    %147 = arith.addf %146, %145 : vector<8x32xf32>
    %148 = arith.divf %146, %147 : vector<8x32xf32>
    %149 = vector.extract_strided_slice %134 {offsets = [0, 64], sizes = [8, 32], strides = [1, 1]} : vector<8x128xf32> to vector<8x32xf32>
    %150 = math.tanh %149 : vector<8x32xf32>
    %151 = vector.extract_strided_slice %134 {offsets = [0, 96], sizes = [8, 32], strides = [1, 1]} : vector<8x128xf32> to vector<8x32xf32>
    %152 = arith.negf %151 : vector<8x32xf32>
    %153 = math.exp %152 : vector<8x32xf32>
    %cst_74 = arith.constant 1.000000e+00 : f32
    %154 = vector.broadcast %cst_74 : f32 to vector<8x32xf32>
    %155 = arith.addf %154, %153 : vector<8x32xf32>
    %156 = arith.divf %154, %155 : vector<8x32xf32>
    %157 = arith.mulf %148, %136 : vector<8x32xf32>
    %158 = arith.mulf %142, %150 : vector<8x32xf32>
    %159 = arith.addf %157, %158 : vector<8x32xf32>
    %160 = math.tanh %159 : vector<8x32xf32>
    %161 = arith.mulf %156, %160 : vector<8x32xf32>
    %c1_75 = arith.constant 1 : index
    %c0_76 = arith.constant 0 : index
    %c0_77 = arith.constant 0 : index
    %162 = vector.load %arg9[%c1_75, %c0_76, %c0_77] : memref<2x8x32xf32, #tpu.memory_space<vmem>>, vector<1x8x32xf32>
    %163 = vector.shape_cast %162 : vector<1x8x32xf32> to vector<8x32xf32>
    %164 = vector.shape_cast %161 : vector<8x32xf32> to vector<1x8x32xf32>
    tpu.vector_store %arg9[%c1_75, %c0_76, %c0_77], %164 {strides = array<i32>} : memref<2x8x32xf32, #tpu.memory_space<vmem>>, vector<1x8x32xf32>,
    %c1_78 = arith.constant 1 : index
    %c0_79 = arith.constant 0 : index
    %c0_80 = arith.constant 0 : index
    %165 = vector.load %arg10[%c1_78, %c0_79, %c0_80] : memref<2x8x32xf32, #tpu.memory_space<vmem>>, vector<1x8x32xf32>
    %166 = vector.shape_cast %165 : vector<1x8x32xf32> to vector<8x32xf32>
    %167 = vector.shape_cast %159 : vector<8x32xf32> to vector<1x8x32xf32>
    tpu.vector_store %arg10[%c1_78, %c0_79, %c0_80], %167 {strides = array<i32>} : memref<2x8x32xf32, #tpu.memory_space<vmem>>, vector<1x8x32xf32>,
    %c1_81 = arith.constant 1 : index
    %c0_82 = arith.constant 0 : index
    %c0_83 = arith.constant 0 : index
    %168 = vector.load %arg8[%c1_81, %c0_82, %c0_83] : memref<8x8x32xf32, #tpu.memory_space<vmem>>, vector<1x8x32xf32>
    %169 = vector.shape_cast %168 : vector<1x8x32xf32> to vector<8x32xf32>
    %170 = vector.shape_cast %161 : vector<8x32xf32> to vector<1x8x32xf32>
    tpu.vector_store %arg8[%c1_81, %c0_82, %c0_83], %170 {strides = array<i32>} : memref<8x8x32xf32, #tpu.memory_space<vmem>>, vector<1x8x32xf32>,
    %c2 = arith.constant 2 : index
    %c0_84 = arith.constant 0 : index
    %c0_85 = arith.constant 0 : index
    %171 = vector.load %arg1[%c2, %c0_84, %c0_85] : memref<8x8x128xf32, #tpu.memory_space<vmem>>, vector<1x8x128xf32>
    %172 = vector.shape_cast %171 : vector<1x8x128xf32> to vector<8x128xf32>
    %c0_86 = arith.constant 0 : index
    %c0_87 = arith.constant 0 : index
    %c0_88 = arith.constant 0 : index
    %173 = vector.load %arg9[%c0_86, %c0_87, %c0_88] : memref<2x8x32xf32, #tpu.memory_space<vmem>>, vector<1x8x32xf32>
    %174 = vector.shape_cast %173 : vector<1x8x32xf32> to vector<8x32xf32>
    %cst_89 = arith.constant dense<0.000000e+00> : vector<8x128xf32>
    %175 = tpu.matmul %174, %3, %cst_89 {dimension_numbers = #tpu.dot_dimension_numbers<[1], [0], [0], [1], [0, 0, 1, 1], [], []>} : vector<8x32xf32>, vector<32x128xf32>, vector<8x128xf32> -> vector<8x128xf32>
    %176 = arith.addf %172, %175 : vector<8x128xf32>
    %c0_90 = arith.constant 0 : index
    %c0_91 = arith.constant 0 : index
    %c0_92 = arith.constant 0 : index
    %177 = vector.load %arg10[%c0_90, %c0_91, %c0_92] : memref<2x8x32xf32, #tpu.memory_space<vmem>>, vector<1x8x32xf32>
    %178 = vector.shape_cast %177 : vector<1x8x32xf32> to vector<8x32xf32>
    %179 = vector.extract_strided_slice %176 {offsets = [0, 0], sizes = [8, 32], strides = [1, 1]} : vector<8x128xf32> to vector<8x32xf32>
    %180 = arith.negf %179 : vector<8x32xf32>
    %181 = math.exp %180 : vector<8x32xf32>
    %cst_93 = arith.constant 1.000000e+00 : f32
    %182 = vector.broadcast %cst_93 : f32 to vector<8x32xf32>
    %183 = arith.addf %182, %181 : vector<8x32xf32>
    %184 = arith.divf %182, %183 : vector<8x32xf32>
    %185 = vector.extract_strided_slice %176 {offsets = [0, 32], sizes = [8, 32], strides = [1, 1]} : vector<8x128xf32> to vector<8x32xf32>
    %186 = arith.negf %185 : vector<8x32xf32>
    %187 = math.exp %186 : vector<8x32xf32>
    %cst_94 = arith.constant 1.000000e+00 : f32
    %188 = vector.broadcast %cst_94 : f32 to vector<8x32xf32>
    %189 = arith.addf %188, %187 : vector<8x32xf32>
    %190 = arith.divf %188, %189 : vector<8x32xf32>
    %191 = vector.extract_strided_slice %176 {offsets = [0, 64], sizes = [8, 32], strides = [1, 1]} : vector<8x128xf32> to vector<8x32xf32>
    %192 = math.tanh %191 : vector<8x32xf32>
    %193 = vector.extract_strided_slice %176 {offsets = [0, 96], sizes = [8, 32], strides = [1, 1]} : vector<8x128xf32> to vector<8x32xf32>
    %194 = arith.negf %193 : vector<8x32xf32>
    %195 = math.exp %194 : vector<8x32xf32>
    %cst_95 = arith.constant 1.000000e+00 : f32
    %196 = vector.broadcast %cst_95 : f32 to vector<8x32xf32>
    %197 = arith.addf %196, %195 : vector<8x32xf32>
    %198 = arith.divf %196, %197 : vector<8x32xf32>
    %199 = arith.mulf %190, %178 : vector<8x32xf32>
    %200 = arith.mulf %184, %192 : vector<8x32xf32>
    %201 = arith.addf %199, %200 : vector<8x32xf32>
    %202 = math.tanh %201 : vector<8x32xf32>
    %203 = arith.mulf %198, %202 : vector<8x32xf32>
    %c0_96 = arith.constant 0 : index
    %c0_97 = arith.constant 0 : index
    %c0_98 = arith.constant 0 : index
    %204 = vector.load %arg9[%c0_96, %c0_97, %c0_98] : memref<2x8x32xf32, #tpu.memory_space<vmem>>, vector<1x8x32xf32>
    %205 = vector.shape_cast %204 : vector<1x8x32xf32> to vector<8x32xf32>
    %206 = vector.shape_cast %203 : vector<8x32xf32> to vector<1x8x32xf32>
    tpu.vector_store %arg9[%c0_96, %c0_97, %c0_98], %206 {strides = array<i32>} : memref<2x8x32xf32, #tpu.memory_space<vmem>>, vector<1x8x32xf32>,
    %c0_99 = arith.constant 0 : index
    %c0_100 = arith.constant 0 : index
    %c0_101 = arith.constant 0 : index
    %207 = vector.load %arg10[%c0_99, %c0_100, %c0_101] : memref<2x8x32xf32, #tpu.memory_space<vmem>>, vector<1x8x32xf32>
    %208 = vector.shape_cast %207 : vector<1x8x32xf32> to vector<8x32xf32>
    %209 = vector.shape_cast %201 : vector<8x32xf32> to vector<1x8x32xf32>
    tpu.vector_store %arg10[%c0_99, %c0_100, %c0_101], %209 {strides = array<i32>} : memref<2x8x32xf32, #tpu.memory_space<vmem>>, vector<1x8x32xf32>,
    %cst_102 = arith.constant dense<0.000000e+00> : vector<8x128xf32>
    %210 = tpu.matmul %203, %4, %cst_102 {dimension_numbers = #tpu.dot_dimension_numbers<[1], [0], [0], [1], [0, 0, 1, 1], [], []>} : vector<8x32xf32>, vector<32x128xf32>, vector<8x128xf32> -> vector<8x128xf32>
    %c1_103 = arith.constant 1 : index
    %c0_104 = arith.constant 0 : index
    %c0_105 = arith.constant 0 : index
    %211 = vector.load %arg9[%c1_103, %c0_104, %c0_105] : memref<2x8x32xf32, #tpu.memory_space<vmem>>, vector<1x8x32xf32>
    %212 = vector.shape_cast %211 : vector<1x8x32xf32> to vector<8x32xf32>
    %cst_106 = arith.constant dense<0.000000e+00> : vector<8x128xf32>
    %213 = tpu.matmul %212, %5, %cst_106 {dimension_numbers = #tpu.dot_dimension_numbers<[1], [0], [0], [1], [0, 0, 1, 1], [], []>} : vector<8x32xf32>, vector<32x128xf32>, vector<8x128xf32> -> vector<8x128xf32>
    %214 = arith.addf %210, %213 : vector<8x128xf32>
    %215 = vector.broadcast %6 : vector<1x128xf32> to vector<8x128xf32>
    %216 = arith.addf %214, %215 : vector<8x128xf32>
    %c1_107 = arith.constant 1 : index
    %c0_108 = arith.constant 0 : index
    %c0_109 = arith.constant 0 : index
    %217 = vector.load %arg10[%c1_107, %c0_108, %c0_109] : memref<2x8x32xf32, #tpu.memory_space<vmem>>, vector<1x8x32xf32>
    %218 = vector.shape_cast %217 : vector<1x8x32xf32> to vector<8x32xf32>
    %219 = vector.extract_strided_slice %216 {offsets = [0, 0], sizes = [8, 32], strides = [1, 1]} : vector<8x128xf32> to vector<8x32xf32>
    %220 = arith.negf %219 : vector<8x32xf32>
    %221 = math.exp %220 : vector<8x32xf32>
    %cst_110 = arith.constant 1.000000e+00 : f32
    %222 = vector.broadcast %cst_110 : f32 to vector<8x32xf32>
    %223 = arith.addf %222, %221 : vector<8x32xf32>
    %224 = arith.divf %222, %223 : vector<8x32xf32>
    %225 = vector.extract_strided_slice %216 {offsets = [0, 32], sizes = [8, 32], strides = [1, 1]} : vector<8x128xf32> to vector<8x32xf32>
    %226 = arith.negf %225 : vector<8x32xf32>
    %227 = math.exp %226 : vector<8x32xf32>
    %cst_111 = arith.constant 1.000000e+00 : f32
    %228 = vector.broadcast %cst_111 : f32 to vector<8x32xf32>
    %229 = arith.addf %228, %227 : vector<8x32xf32>
    %230 = arith.divf %228, %229 : vector<8x32xf32>
    %231 = vector.extract_strided_slice %216 {offsets = [0, 64], sizes = [8, 32], strides = [1, 1]} : vector<8x128xf32> to vector<8x32xf32>
    %232 = math.tanh %231 : vector<8x32xf32>
    %233 = vector.extract_strided_slice %216 {offsets = [0, 96], sizes = [8, 32], strides = [1, 1]} : vector<8x128xf32> to vector<8x32xf32>
    %234 = arith.negf %233 : vector<8x32xf32>
    %235 = math.exp %234 : vector<8x32xf32>
    %cst_112 = arith.constant 1.000000e+00 : f32
    %236 = vector.broadcast %cst_112 : f32 to vector<8x32xf32>
    %237 = arith.addf %236, %235 : vector<8x32xf32>
    %238 = arith.divf %236, %237 : vector<8x32xf32>
    %239 = arith.mulf %230, %218 : vector<8x32xf32>
    %240 = arith.mulf %224, %232 : vector<8x32xf32>
    %241 = arith.addf %239, %240 : vector<8x32xf32>
    %242 = math.tanh %241 : vector<8x32xf32>
    %243 = arith.mulf %238, %242 : vector<8x32xf32>
    %c1_113 = arith.constant 1 : index
    %c0_114 = arith.constant 0 : index
    %c0_115 = arith.constant 0 : index
    %244 = vector.load %arg9[%c1_113, %c0_114, %c0_115] : memref<2x8x32xf32, #tpu.memory_space<vmem>>, vector<1x8x32xf32>
    %245 = vector.shape_cast %244 : vector<1x8x32xf32> to vector<8x32xf32>
    %246 = vector.shape_cast %243 : vector<8x32xf32> to vector<1x8x32xf32>
    tpu.vector_store %arg9[%c1_113, %c0_114, %c0_115], %246 {strides = array<i32>} : memref<2x8x32xf32, #tpu.memory_space<vmem>>, vector<1x8x32xf32>,
    %c1_116 = arith.constant 1 : index
    %c0_117 = arith.constant 0 : index
    %c0_118 = arith.constant 0 : index
    %247 = vector.load %arg10[%c1_116, %c0_117, %c0_118] : memref<2x8x32xf32, #tpu.memory_space<vmem>>, vector<1x8x32xf32>
    %248 = vector.shape_cast %247 : vector<1x8x32xf32> to vector<8x32xf32>
    %249 = vector.shape_cast %241 : vector<8x32xf32> to vector<1x8x32xf32>
    tpu.vector_store %arg10[%c1_116, %c0_117, %c0_118], %249 {strides = array<i32>} : memref<2x8x32xf32, #tpu.memory_space<vmem>>, vector<1x8x32xf32>,
    %c2_119 = arith.constant 2 : index
    %c0_120 = arith.constant 0 : index
    %c0_121 = arith.constant 0 : index
    %250 = vector.load %arg8[%c2_119, %c0_120, %c0_121] : memref<8x8x32xf32, #tpu.memory_space<vmem>>, vector<1x8x32xf32>
    %251 = vector.shape_cast %250 : vector<1x8x32xf32> to vector<8x32xf32>
    %252 = vector.shape_cast %243 : vector<8x32xf32> to vector<1x8x32xf32>
    tpu.vector_store %arg8[%c2_119, %c0_120, %c0_121], %252 {strides = array<i32>} : memref<8x8x32xf32, #tpu.memory_space<vmem>>, vector<1x8x32xf32>,
    %c3 = arith.constant 3 : index
    %c0_122 = arith.constant 0 : index
    %c0_123 = arith.constant 0 : index
    %253 = vector.load %arg1[%c3, %c0_122, %c0_123] : memref<8x8x128xf32, #tpu.memory_space<vmem>>, vector<1x8x128xf32>
    %254 = vector.shape_cast %253 : vector<1x8x128xf32> to vector<8x128xf32>
    %c0_124 = arith.constant 0 : index
    %c0_125 = arith.constant 0 : index
    %c0_126 = arith.constant 0 : index
    %255 = vector.load %arg9[%c0_124, %c0_125, %c0_126] : memref<2x8x32xf32, #tpu.memory_space<vmem>>, vector<1x8x32xf32>
    %256 = vector.shape_cast %255 : vector<1x8x32xf32> to vector<8x32xf32>
    %cst_127 = arith.constant dense<0.000000e+00> : vector<8x128xf32>
    %257 = tpu.matmul %256, %3, %cst_127 {dimension_numbers = #tpu.dot_dimension_numbers<[1], [0], [0], [1], [0, 0, 1, 1], [], []>} : vector<8x32xf32>, vector<32x128xf32>, vector<8x128xf32> -> vector<8x128xf32>
    %258 = arith.addf %254, %257 : vector<8x128xf32>
    %c0_128 = arith.constant 0 : index
    %c0_129 = arith.constant 0 : index
    %c0_130 = arith.constant 0 : index
    %259 = vector.load %arg10[%c0_128, %c0_129, %c0_130] : memref<2x8x32xf32, #tpu.memory_space<vmem>>, vector<1x8x32xf32>
    %260 = vector.shape_cast %259 : vector<1x8x32xf32> to vector<8x32xf32>
    %261 = vector.extract_strided_slice %258 {offsets = [0, 0], sizes = [8, 32], strides = [1, 1]} : vector<8x128xf32> to vector<8x32xf32>
    %262 = arith.negf %261 : vector<8x32xf32>
    %263 = math.exp %262 : vector<8x32xf32>
    %cst_131 = arith.constant 1.000000e+00 : f32
    %264 = vector.broadcast %cst_131 : f32 to vector<8x32xf32>
    %265 = arith.addf %264, %263 : vector<8x32xf32>
    %266 = arith.divf %264, %265 : vector<8x32xf32>
    %267 = vector.extract_strided_slice %258 {offsets = [0, 32], sizes = [8, 32], strides = [1, 1]} : vector<8x128xf32> to vector<8x32xf32>
    %268 = arith.negf %267 : vector<8x32xf32>
    %269 = math.exp %268 : vector<8x32xf32>
    %cst_132 = arith.constant 1.000000e+00 : f32
    %270 = vector.broadcast %cst_132 : f32 to vector<8x32xf32>
    %271 = arith.addf %270, %269 : vector<8x32xf32>
    %272 = arith.divf %270, %271 : vector<8x32xf32>
    %273 = vector.extract_strided_slice %258 {offsets = [0, 64], sizes = [8, 32], strides = [1, 1]} : vector<8x128xf32> to vector<8x32xf32>
    %274 = math.tanh %273 : vector<8x32xf32>
    %275 = vector.extract_strided_slice %258 {offsets = [0, 96], sizes = [8, 32], strides = [1, 1]} : vector<8x128xf32> to vector<8x32xf32>
    %276 = arith.negf %275 : vector<8x32xf32>
    %277 = math.exp %276 : vector<8x32xf32>
    %cst_133 = arith.constant 1.000000e+00 : f32
    %278 = vector.broadcast %cst_133 : f32 to vector<8x32xf32>
    %279 = arith.addf %278, %277 : vector<8x32xf32>
    %280 = arith.divf %278, %279 : vector<8x32xf32>
    %281 = arith.mulf %272, %260 : vector<8x32xf32>
    %282 = arith.mulf %266, %274 : vector<8x32xf32>
    %283 = arith.addf %281, %282 : vector<8x32xf32>
    %284 = math.tanh %283 : vector<8x32xf32>
    %285 = arith.mulf %280, %284 : vector<8x32xf32>
    %c0_134 = arith.constant 0 : index
    %c0_135 = arith.constant 0 : index
    %c0_136 = arith.constant 0 : index
    %286 = vector.load %arg9[%c0_134, %c0_135, %c0_136] : memref<2x8x32xf32, #tpu.memory_space<vmem>>, vector<1x8x32xf32>
    %287 = vector.shape_cast %286 : vector<1x8x32xf32> to vector<8x32xf32>
    %288 = vector.shape_cast %285 : vector<8x32xf32> to vector<1x8x32xf32>
    tpu.vector_store %arg9[%c0_134, %c0_135, %c0_136], %288 {strides = array<i32>} : memref<2x8x32xf32, #tpu.memory_space<vmem>>, vector<1x8x32xf32>,
    %c0_137 = arith.constant 0 : index
    %c0_138 = arith.constant 0 : index
    %c0_139 = arith.constant 0 : index
    %289 = vector.load %arg10[%c0_137, %c0_138, %c0_139] : memref<2x8x32xf32, #tpu.memory_space<vmem>>, vector<1x8x32xf32>
    %290 = vector.shape_cast %289 : vector<1x8x32xf32> to vector<8x32xf32>
    %291 = vector.shape_cast %283 : vector<8x32xf32> to vector<1x8x32xf32>
    tpu.vector_store %arg10[%c0_137, %c0_138, %c0_139], %291 {strides = array<i32>} : memref<2x8x32xf32, #tpu.memory_space<vmem>>, vector<1x8x32xf32>,
    %cst_140 = arith.constant dense<0.000000e+00> : vector<8x128xf32>
    %292 = tpu.matmul %285, %4, %cst_140 {dimension_numbers = #tpu.dot_dimension_numbers<[1], [0], [0], [1], [0, 0, 1, 1], [], []>} : vector<8x32xf32>, vector<32x128xf32>, vector<8x128xf32> -> vector<8x128xf32>
    %c1_141 = arith.constant 1 : index
    %c0_142 = arith.constant 0 : index
    %c0_143 = arith.constant 0 : index
    %293 = vector.load %arg9[%c1_141, %c0_142, %c0_143] : memref<2x8x32xf32, #tpu.memory_space<vmem>>, vector<1x8x32xf32>
    %294 = vector.shape_cast %293 : vector<1x8x32xf32> to vector<8x32xf32>
    %cst_144 = arith.constant dense<0.000000e+00> : vector<8x128xf32>
    %295 = tpu.matmul %294, %5, %cst_144 {dimension_numbers = #tpu.dot_dimension_numbers<[1], [0], [0], [1], [0, 0, 1, 1], [], []>} : vector<8x32xf32>, vector<32x128xf32>, vector<8x128xf32> -> vector<8x128xf32>
    %296 = arith.addf %292, %295 : vector<8x128xf32>
    %297 = vector.broadcast %6 : vector<1x128xf32> to vector<8x128xf32>
    %298 = arith.addf %296, %297 : vector<8x128xf32>
    %c1_145 = arith.constant 1 : index
    %c0_146 = arith.constant 0 : index
    %c0_147 = arith.constant 0 : index
    %299 = vector.load %arg10[%c1_145, %c0_146, %c0_147] : memref<2x8x32xf32, #tpu.memory_space<vmem>>, vector<1x8x32xf32>
    %300 = vector.shape_cast %299 : vector<1x8x32xf32> to vector<8x32xf32>
    %301 = vector.extract_strided_slice %298 {offsets = [0, 0], sizes = [8, 32], strides = [1, 1]} : vector<8x128xf32> to vector<8x32xf32>
    %302 = arith.negf %301 : vector<8x32xf32>
    %303 = math.exp %302 : vector<8x32xf32>
    %cst_148 = arith.constant 1.000000e+00 : f32
    %304 = vector.broadcast %cst_148 : f32 to vector<8x32xf32>
    %305 = arith.addf %304, %303 : vector<8x32xf32>
    %306 = arith.divf %304, %305 : vector<8x32xf32>
    %307 = vector.extract_strided_slice %298 {offsets = [0, 32], sizes = [8, 32], strides = [1, 1]} : vector<8x128xf32> to vector<8x32xf32>
    %308 = arith.negf %307 : vector<8x32xf32>
    %309 = math.exp %308 : vector<8x32xf32>
    %cst_149 = arith.constant 1.000000e+00 : f32
    %310 = vector.broadcast %cst_149 : f32 to vector<8x32xf32>
    %311 = arith.addf %310, %309 : vector<8x32xf32>
    %312 = arith.divf %310, %311 : vector<8x32xf32>
    %313 = vector.extract_strided_slice %298 {offsets = [0, 64], sizes = [8, 32], strides = [1, 1]} : vector<8x128xf32> to vector<8x32xf32>
    %314 = math.tanh %313 : vector<8x32xf32>
    %315 = vector.extract_strided_slice %298 {offsets = [0, 96], sizes = [8, 32], strides = [1, 1]} : vector<8x128xf32> to vector<8x32xf32>
    %316 = arith.negf %315 : vector<8x32xf32>
    %317 = math.exp %316 : vector<8x32xf32>
    %cst_150 = arith.constant 1.000000e+00 : f32
    %318 = vector.broadcast %cst_150 : f32 to vector<8x32xf32>
    %319 = arith.addf %318, %317 : vector<8x32xf32>
    %320 = arith.divf %318, %319 : vector<8x32xf32>
    %321 = arith.mulf %312, %300 : vector<8x32xf32>
    %322 = arith.mulf %306, %314 : vector<8x32xf32>
    %323 = arith.addf %321, %322 : vector<8x32xf32>
    %324 = math.tanh %323 : vector<8x32xf32>
    %325 = arith.mulf %320, %324 : vector<8x32xf32>
    %c1_151 = arith.constant 1 : index
    %c0_152 = arith.constant 0 : index
    %c0_153 = arith.constant 0 : index
    %326 = vector.load %arg9[%c1_151, %c0_152, %c0_153] : memref<2x8x32xf32, #tpu.memory_space<vmem>>, vector<1x8x32xf32>
    %327 = vector.shape_cast %326 : vector<1x8x32xf32> to vector<8x32xf32>
    %328 = vector.shape_cast %325 : vector<8x32xf32> to vector<1x8x32xf32>
    tpu.vector_store %arg9[%c1_151, %c0_152, %c0_153], %328 {strides = array<i32>} : memref<2x8x32xf32, #tpu.memory_space<vmem>>, vector<1x8x32xf32>,
    %c1_154 = arith.constant 1 : index
    %c0_155 = arith.constant 0 : index
    %c0_156 = arith.constant 0 : index
    %329 = vector.load %arg10[%c1_154, %c0_155, %c0_156] : memref<2x8x32xf32, #tpu.memory_space<vmem>>, vector<1x8x32xf32>
    %330 = vector.shape_cast %329 : vector<1x8x32xf32> to vector<8x32xf32>
    %331 = vector.shape_cast %323 : vector<8x32xf32> to vector<1x8x32xf32>
    tpu.vector_store %arg10[%c1_154, %c0_155, %c0_156], %331 {strides = array<i32>} : memref<2x8x32xf32, #tpu.memory_space<vmem>>, vector<1x8x32xf32>,
    %c3_157 = arith.constant 3 : index
    %c0_158 = arith.constant 0 : index
    %c0_159 = arith.constant 0 : index
    %332 = vector.load %arg8[%c3_157, %c0_158, %c0_159] : memref<8x8x32xf32, #tpu.memory_space<vmem>>, vector<1x8x32xf32>
    %333 = vector.shape_cast %332 : vector<1x8x32xf32> to vector<8x32xf32>
    %334 = vector.shape_cast %325 : vector<8x32xf32> to vector<1x8x32xf32>
    tpu.vector_store %arg8[%c3_157, %c0_158, %c0_159], %334 {strides = array<i32>} : memref<8x8x32xf32, #tpu.memory_space<vmem>>, vector<1x8x32xf32>,
    %c4 = arith.constant 4 : index
    %c0_160 = arith.constant 0 : index
    %c0_161 = arith.constant 0 : index
    %335 = vector.load %arg1[%c4, %c0_160, %c0_161] : memref<8x8x128xf32, #tpu.memory_space<vmem>>, vector<1x8x128xf32>
    %336 = vector.shape_cast %335 : vector<1x8x128xf32> to vector<8x128xf32>
    %c0_162 = arith.constant 0 : index
    %c0_163 = arith.constant 0 : index
    %c0_164 = arith.constant 0 : index
    %337 = vector.load %arg9[%c0_162, %c0_163, %c0_164] : memref<2x8x32xf32, #tpu.memory_space<vmem>>, vector<1x8x32xf32>
    %338 = vector.shape_cast %337 : vector<1x8x32xf32> to vector<8x32xf32>
    %cst_165 = arith.constant dense<0.000000e+00> : vector<8x128xf32>
    %339 = tpu.matmul %338, %3, %cst_165 {dimension_numbers = #tpu.dot_dimension_numbers<[1], [0], [0], [1], [0, 0, 1, 1], [], []>} : vector<8x32xf32>, vector<32x128xf32>, vector<8x128xf32> -> vector<8x128xf32>
    %340 = arith.addf %336, %339 : vector<8x128xf32>
    %c0_166 = arith.constant 0 : index
    %c0_167 = arith.constant 0 : index
    %c0_168 = arith.constant 0 : index
    %341 = vector.load %arg10[%c0_166, %c0_167, %c0_168] : memref<2x8x32xf32, #tpu.memory_space<vmem>>, vector<1x8x32xf32>
    %342 = vector.shape_cast %341 : vector<1x8x32xf32> to vector<8x32xf32>
    %343 = vector.extract_strided_slice %340 {offsets = [0, 0], sizes = [8, 32], strides = [1, 1]} : vector<8x128xf32> to vector<8x32xf32>
    %344 = arith.negf %343 : vector<8x32xf32>
    %345 = math.exp %344 : vector<8x32xf32>
    %cst_169 = arith.constant 1.000000e+00 : f32
    %346 = vector.broadcast %cst_169 : f32 to vector<8x32xf32>
    %347 = arith.addf %346, %345 : vector<8x32xf32>
    %348 = arith.divf %346, %347 : vector<8x32xf32>
    %349 = vector.extract_strided_slice %340 {offsets = [0, 32], sizes = [8, 32], strides = [1, 1]} : vector<8x128xf32> to vector<8x32xf32>
    %350 = arith.negf %349 : vector<8x32xf32>
    %351 = math.exp %350 : vector<8x32xf32>
    %cst_170 = arith.constant 1.000000e+00 : f32
    %352 = vector.broadcast %cst_170 : f32 to vector<8x32xf32>
    %353 = arith.addf %352, %351 : vector<8x32xf32>
    %354 = arith.divf %352, %353 : vector<8x32xf32>
    %355 = vector.extract_strided_slice %340 {offsets = [0, 64], sizes = [8, 32], strides = [1, 1]} : vector<8x128xf32> to vector<8x32xf32>
    %356 = math.tanh %355 : vector<8x32xf32>
    %357 = vector.extract_strided_slice %340 {offsets = [0, 96], sizes = [8, 32], strides = [1, 1]} : vector<8x128xf32> to vector<8x32xf32>
    %358 = arith.negf %357 : vector<8x32xf32>
    %359 = math.exp %358 : vector<8x32xf32>
    %cst_171 = arith.constant 1.000000e+00 : f32
    %360 = vector.broadcast %cst_171 : f32 to vector<8x32xf32>
    %361 = arith.addf %360, %359 : vector<8x32xf32>
    %362 = arith.divf %360, %361 : vector<8x32xf32>
    %363 = arith.mulf %354, %342 : vector<8x32xf32>
    %364 = arith.mulf %348, %356 : vector<8x32xf32>
    %365 = arith.addf %363, %364 : vector<8x32xf32>
    %366 = math.tanh %365 : vector<8x32xf32>
    %367 = arith.mulf %362, %366 : vector<8x32xf32>
    %c0_172 = arith.constant 0 : index
    %c0_173 = arith.constant 0 : index
    %c0_174 = arith.constant 0 : index
    %368 = vector.load %arg9[%c0_172, %c0_173, %c0_174] : memref<2x8x32xf32, #tpu.memory_space<vmem>>, vector<1x8x32xf32>
    %369 = vector.shape_cast %368 : vector<1x8x32xf32> to vector<8x32xf32>
    %370 = vector.shape_cast %367 : vector<8x32xf32> to vector<1x8x32xf32>
    tpu.vector_store %arg9[%c0_172, %c0_173, %c0_174], %370 {strides = array<i32>} : memref<2x8x32xf32, #tpu.memory_space<vmem>>, vector<1x8x32xf32>,
    %c0_175 = arith.constant 0 : index
    %c0_176 = arith.constant 0 : index
    %c0_177 = arith.constant 0 : index
    %371 = vector.load %arg10[%c0_175, %c0_176, %c0_177] : memref<2x8x32xf32, #tpu.memory_space<vmem>>, vector<1x8x32xf32>
    %372 = vector.shape_cast %371 : vector<1x8x32xf32> to vector<8x32xf32>
    %373 = vector.shape_cast %365 : vector<8x32xf32> to vector<1x8x32xf32>
    tpu.vector_store %arg10[%c0_175, %c0_176, %c0_177], %373 {strides = array<i32>} : memref<2x8x32xf32, #tpu.memory_space<vmem>>, vector<1x8x32xf32>,
    %cst_178 = arith.constant dense<0.000000e+00> : vector<8x128xf32>
    %374 = tpu.matmul %367, %4, %cst_178 {dimension_numbers = #tpu.dot_dimension_numbers<[1], [0], [0], [1], [0, 0, 1, 1], [], []>} : vector<8x32xf32>, vector<32x128xf32>, vector<8x128xf32> -> vector<8x128xf32>
    %c1_179 = arith.constant 1 : index
    %c0_180 = arith.constant 0 : index
    %c0_181 = arith.constant 0 : index
    %375 = vector.load %arg9[%c1_179, %c0_180, %c0_181] : memref<2x8x32xf32, #tpu.memory_space<vmem>>, vector<1x8x32xf32>
    %376 = vector.shape_cast %375 : vector<1x8x32xf32> to vector<8x32xf32>
    %cst_182 = arith.constant dense<0.000000e+00> : vector<8x128xf32>
    %377 = tpu.matmul %376, %5, %cst_182 {dimension_numbers = #tpu.dot_dimension_numbers<[1], [0], [0], [1], [0, 0, 1, 1], [], []>} : vector<8x32xf32>, vector<32x128xf32>, vector<8x128xf32> -> vector<8x128xf32>
    %378 = arith.addf %374, %377 : vector<8x128xf32>
    %379 = vector.broadcast %6 : vector<1x128xf32> to vector<8x128xf32>
    %380 = arith.addf %378, %379 : vector<8x128xf32>
    %c1_183 = arith.constant 1 : index
    %c0_184 = arith.constant 0 : index
    %c0_185 = arith.constant 0 : index
    %381 = vector.load %arg10[%c1_183, %c0_184, %c0_185] : memref<2x8x32xf32, #tpu.memory_space<vmem>>, vector<1x8x32xf32>
    %382 = vector.shape_cast %381 : vector<1x8x32xf32> to vector<8x32xf32>
    %383 = vector.extract_strided_slice %380 {offsets = [0, 0], sizes = [8, 32], strides = [1, 1]} : vector<8x128xf32> to vector<8x32xf32>
    %384 = arith.negf %383 : vector<8x32xf32>
    %385 = math.exp %384 : vector<8x32xf32>
    %cst_186 = arith.constant 1.000000e+00 : f32
    %386 = vector.broadcast %cst_186 : f32 to vector<8x32xf32>
    %387 = arith.addf %386, %385 : vector<8x32xf32>
    %388 = arith.divf %386, %387 : vector<8x32xf32>
    %389 = vector.extract_strided_slice %380 {offsets = [0, 32], sizes = [8, 32], strides = [1, 1]} : vector<8x128xf32> to vector<8x32xf32>
    %390 = arith.negf %389 : vector<8x32xf32>
    %391 = math.exp %390 : vector<8x32xf32>
    %cst_187 = arith.constant 1.000000e+00 : f32
    %392 = vector.broadcast %cst_187 : f32 to vector<8x32xf32>
    %393 = arith.addf %392, %391 : vector<8x32xf32>
    %394 = arith.divf %392, %393 : vector<8x32xf32>
    %395 = vector.extract_strided_slice %380 {offsets = [0, 64], sizes = [8, 32], strides = [1, 1]} : vector<8x128xf32> to vector<8x32xf32>
    %396 = math.tanh %395 : vector<8x32xf32>
    %397 = vector.extract_strided_slice %380 {offsets = [0, 96], sizes = [8, 32], strides = [1, 1]} : vector<8x128xf32> to vector<8x32xf32>
    %398 = arith.negf %397 : vector<8x32xf32>
    %399 = math.exp %398 : vector<8x32xf32>
    %cst_188 = arith.constant 1.000000e+00 : f32
    %400 = vector.broadcast %cst_188 : f32 to vector<8x32xf32>
    %401 = arith.addf %400, %399 : vector<8x32xf32>
    %402 = arith.divf %400, %401 : vector<8x32xf32>
    %403 = arith.mulf %394, %382 : vector<8x32xf32>
    %404 = arith.mulf %388, %396 : vector<8x32xf32>
    %405 = arith.addf %403, %404 : vector<8x32xf32>
    %406 = math.tanh %405 : vector<8x32xf32>
    %407 = arith.mulf %402, %406 : vector<8x32xf32>
    %c1_189 = arith.constant 1 : index
    %c0_190 = arith.constant 0 : index
    %c0_191 = arith.constant 0 : index
    %408 = vector.load %arg9[%c1_189, %c0_190, %c0_191] : memref<2x8x32xf32, #tpu.memory_space<vmem>>, vector<1x8x32xf32>
    %409 = vector.shape_cast %408 : vector<1x8x32xf32> to vector<8x32xf32>
    %410 = vector.shape_cast %407 : vector<8x32xf32> to vector<1x8x32xf32>
    tpu.vector_store %arg9[%c1_189, %c0_190, %c0_191], %410 {strides = array<i32>} : memref<2x8x32xf32, #tpu.memory_space<vmem>>, vector<1x8x32xf32>,
    %c1_192 = arith.constant 1 : index
    %c0_193 = arith.constant 0 : index
    %c0_194 = arith.constant 0 : index
    %411 = vector.load %arg10[%c1_192, %c0_193, %c0_194] : memref<2x8x32xf32, #tpu.memory_space<vmem>>, vector<1x8x32xf32>
    %412 = vector.shape_cast %411 : vector<1x8x32xf32> to vector<8x32xf32>
    %413 = vector.shape_cast %405 : vector<8x32xf32> to vector<1x8x32xf32>
    tpu.vector_store %arg10[%c1_192, %c0_193, %c0_194], %413 {strides = array<i32>} : memref<2x8x32xf32, #tpu.memory_space<vmem>>, vector<1x8x32xf32>,
    %c4_195 = arith.constant 4 : index
    %c0_196 = arith.constant 0 : index
    %c0_197 = arith.constant 0 : index
    %414 = vector.load %arg8[%c4_195, %c0_196, %c0_197] : memref<8x8x32xf32, #tpu.memory_space<vmem>>, vector<1x8x32xf32>
    %415 = vector.shape_cast %414 : vector<1x8x32xf32> to vector<8x32xf32>
    %416 = vector.shape_cast %407 : vector<8x32xf32> to vector<1x8x32xf32>
    tpu.vector_store %arg8[%c4_195, %c0_196, %c0_197], %416 {strides = array<i32>} : memref<8x8x32xf32, #tpu.memory_space<vmem>>, vector<1x8x32xf32>,
    %c5 = arith.constant 5 : index
    %c0_198 = arith.constant 0 : index
    %c0_199 = arith.constant 0 : index
    %417 = vector.load %arg1[%c5, %c0_198, %c0_199] : memref<8x8x128xf32, #tpu.memory_space<vmem>>, vector<1x8x128xf32>
    %418 = vector.shape_cast %417 : vector<1x8x128xf32> to vector<8x128xf32>
    %c0_200 = arith.constant 0 : index
    %c0_201 = arith.constant 0 : index
    %c0_202 = arith.constant 0 : index
    %419 = vector.load %arg9[%c0_200, %c0_201, %c0_202] : memref<2x8x32xf32, #tpu.memory_space<vmem>>, vector<1x8x32xf32>
    %420 = vector.shape_cast %419 : vector<1x8x32xf32> to vector<8x32xf32>
    %cst_203 = arith.constant dense<0.000000e+00> : vector<8x128xf32>
    %421 = tpu.matmul %420, %3, %cst_203 {dimension_numbers = #tpu.dot_dimension_numbers<[1], [0], [0], [1], [0, 0, 1, 1], [], []>} : vector<8x32xf32>, vector<32x128xf32>, vector<8x128xf32> -> vector<8x128xf32>
    %422 = arith.addf %418, %421 : vector<8x128xf32>
    %c0_204 = arith.constant 0 : index
    %c0_205 = arith.constant 0 : index
    %c0_206 = arith.constant 0 : index
    %423 = vector.load %arg10[%c0_204, %c0_205, %c0_206] : memref<2x8x32xf32, #tpu.memory_space<vmem>>, vector<1x8x32xf32>
    %424 = vector.shape_cast %423 : vector<1x8x32xf32> to vector<8x32xf32>
    %425 = vector.extract_strided_slice %422 {offsets = [0, 0], sizes = [8, 32], strides = [1, 1]} : vector<8x128xf32> to vector<8x32xf32>
    %426 = arith.negf %425 : vector<8x32xf32>
    %427 = math.exp %426 : vector<8x32xf32>
    %cst_207 = arith.constant 1.000000e+00 : f32
    %428 = vector.broadcast %cst_207 : f32 to vector<8x32xf32>
    %429 = arith.addf %428, %427 : vector<8x32xf32>
    %430 = arith.divf %428, %429 : vector<8x32xf32>
    %431 = vector.extract_strided_slice %422 {offsets = [0, 32], sizes = [8, 32], strides = [1, 1]} : vector<8x128xf32> to vector<8x32xf32>
    %432 = arith.negf %431 : vector<8x32xf32>
    %433 = math.exp %432 : vector<8x32xf32>
    %cst_208 = arith.constant 1.000000e+00 : f32
    %434 = vector.broadcast %cst_208 : f32 to vector<8x32xf32>
    %435 = arith.addf %434, %433 : vector<8x32xf32>
    %436 = arith.divf %434, %435 : vector<8x32xf32>
    %437 = vector.extract_strided_slice %422 {offsets = [0, 64], sizes = [8, 32], strides = [1, 1]} : vector<8x128xf32> to vector<8x32xf32>
    %438 = math.tanh %437 : vector<8x32xf32>
    %439 = vector.extract_strided_slice %422 {offsets = [0, 96], sizes = [8, 32], strides = [1, 1]} : vector<8x128xf32> to vector<8x32xf32>
    %440 = arith.negf %439 : vector<8x32xf32>
    %441 = math.exp %440 : vector<8x32xf32>
    %cst_209 = arith.constant 1.000000e+00 : f32
    %442 = vector.broadcast %cst_209 : f32 to vector<8x32xf32>
    %443 = arith.addf %442, %441 : vector<8x32xf32>
    %444 = arith.divf %442, %443 : vector<8x32xf32>
    %445 = arith.mulf %436, %424 : vector<8x32xf32>
    %446 = arith.mulf %430, %438 : vector<8x32xf32>
    %447 = arith.addf %445, %446 : vector<8x32xf32>
    %448 = math.tanh %447 : vector<8x32xf32>
    %449 = arith.mulf %444, %448 : vector<8x32xf32>
    %c0_210 = arith.constant 0 : index
    %c0_211 = arith.constant 0 : index
    %c0_212 = arith.constant 0 : index
    %450 = vector.load %arg9[%c0_210, %c0_211, %c0_212] : memref<2x8x32xf32, #tpu.memory_space<vmem>>, vector<1x8x32xf32>
    %451 = vector.shape_cast %450 : vector<1x8x32xf32> to vector<8x32xf32>
    %452 = vector.shape_cast %449 : vector<8x32xf32> to vector<1x8x32xf32>
    tpu.vector_store %arg9[%c0_210, %c0_211, %c0_212], %452 {strides = array<i32>} : memref<2x8x32xf32, #tpu.memory_space<vmem>>, vector<1x8x32xf32>,
    %c0_213 = arith.constant 0 : index
    %c0_214 = arith.constant 0 : index
    %c0_215 = arith.constant 0 : index
    %453 = vector.load %arg10[%c0_213, %c0_214, %c0_215] : memref<2x8x32xf32, #tpu.memory_space<vmem>>, vector<1x8x32xf32>
    %454 = vector.shape_cast %453 : vector<1x8x32xf32> to vector<8x32xf32>
    %455 = vector.shape_cast %447 : vector<8x32xf32> to vector<1x8x32xf32>
    tpu.vector_store %arg10[%c0_213, %c0_214, %c0_215], %455 {strides = array<i32>} : memref<2x8x32xf32, #tpu.memory_space<vmem>>, vector<1x8x32xf32>,
    %cst_216 = arith.constant dense<0.000000e+00> : vector<8x128xf32>
    %456 = tpu.matmul %449, %4, %cst_216 {dimension_numbers = #tpu.dot_dimension_numbers<[1], [0], [0], [1], [0, 0, 1, 1], [], []>} : vector<8x32xf32>, vector<32x128xf32>, vector<8x128xf32> -> vector<8x128xf32>
    %c1_217 = arith.constant 1 : index
    %c0_218 = arith.constant 0 : index
    %c0_219 = arith.constant 0 : index
    %457 = vector.load %arg9[%c1_217, %c0_218, %c0_219] : memref<2x8x32xf32, #tpu.memory_space<vmem>>, vector<1x8x32xf32>
    %458 = vector.shape_cast %457 : vector<1x8x32xf32> to vector<8x32xf32>
    %cst_220 = arith.constant dense<0.000000e+00> : vector<8x128xf32>
    %459 = tpu.matmul %458, %5, %cst_220 {dimension_numbers = #tpu.dot_dimension_numbers<[1], [0], [0], [1], [0, 0, 1, 1], [], []>} : vector<8x32xf32>, vector<32x128xf32>, vector<8x128xf32> -> vector<8x128xf32>
    %460 = arith.addf %456, %459 : vector<8x128xf32>
    %461 = vector.broadcast %6 : vector<1x128xf32> to vector<8x128xf32>
    %462 = arith.addf %460, %461 : vector<8x128xf32>
    %c1_221 = arith.constant 1 : index
    %c0_222 = arith.constant 0 : index
    %c0_223 = arith.constant 0 : index
    %463 = vector.load %arg10[%c1_221, %c0_222, %c0_223] : memref<2x8x32xf32, #tpu.memory_space<vmem>>, vector<1x8x32xf32>
    %464 = vector.shape_cast %463 : vector<1x8x32xf32> to vector<8x32xf32>
    %465 = vector.extract_strided_slice %462 {offsets = [0, 0], sizes = [8, 32], strides = [1, 1]} : vector<8x128xf32> to vector<8x32xf32>
    %466 = arith.negf %465 : vector<8x32xf32>
    %467 = math.exp %466 : vector<8x32xf32>
    %cst_224 = arith.constant 1.000000e+00 : f32
    %468 = vector.broadcast %cst_224 : f32 to vector<8x32xf32>
    %469 = arith.addf %468, %467 : vector<8x32xf32>
    %470 = arith.divf %468, %469 : vector<8x32xf32>
    %471 = vector.extract_strided_slice %462 {offsets = [0, 32], sizes = [8, 32], strides = [1, 1]} : vector<8x128xf32> to vector<8x32xf32>
    %472 = arith.negf %471 : vector<8x32xf32>
    %473 = math.exp %472 : vector<8x32xf32>
    %cst_225 = arith.constant 1.000000e+00 : f32
    %474 = vector.broadcast %cst_225 : f32 to vector<8x32xf32>
    %475 = arith.addf %474, %473 : vector<8x32xf32>
    %476 = arith.divf %474, %475 : vector<8x32xf32>
    %477 = vector.extract_strided_slice %462 {offsets = [0, 64], sizes = [8, 32], strides = [1, 1]} : vector<8x128xf32> to vector<8x32xf32>
    %478 = math.tanh %477 : vector<8x32xf32>
    %479 = vector.extract_strided_slice %462 {offsets = [0, 96], sizes = [8, 32], strides = [1, 1]} : vector<8x128xf32> to vector<8x32xf32>
    %480 = arith.negf %479 : vector<8x32xf32>
    %481 = math.exp %480 : vector<8x32xf32>
    %cst_226 = arith.constant 1.000000e+00 : f32
    %482 = vector.broadcast %cst_226 : f32 to vector<8x32xf32>
    %483 = arith.addf %482, %481 : vector<8x32xf32>
    %484 = arith.divf %482, %483 : vector<8x32xf32>
    %485 = arith.mulf %476, %464 : vector<8x32xf32>
    %486 = arith.mulf %470, %478 : vector<8x32xf32>
    %487 = arith.addf %485, %486 : vector<8x32xf32>
    %488 = math.tanh %487 : vector<8x32xf32>
    %489 = arith.mulf %484, %488 : vector<8x32xf32>
    %c1_227 = arith.constant 1 : index
    %c0_228 = arith.constant 0 : index
    %c0_229 = arith.constant 0 : index
    %490 = vector.load %arg9[%c1_227, %c0_228, %c0_229] : memref<2x8x32xf32, #tpu.memory_space<vmem>>, vector<1x8x32xf32>
    %491 = vector.shape_cast %490 : vector<1x8x32xf32> to vector<8x32xf32>
    %492 = vector.shape_cast %489 : vector<8x32xf32> to vector<1x8x32xf32>
    tpu.vector_store %arg9[%c1_227, %c0_228, %c0_229], %492 {strides = array<i32>} : memref<2x8x32xf32, #tpu.memory_space<vmem>>, vector<1x8x32xf32>,
    %c1_230 = arith.constant 1 : index
    %c0_231 = arith.constant 0 : index
    %c0_232 = arith.constant 0 : index
    %493 = vector.load %arg10[%c1_230, %c0_231, %c0_232] : memref<2x8x32xf32, #tpu.memory_space<vmem>>, vector<1x8x32xf32>
    %494 = vector.shape_cast %493 : vector<1x8x32xf32> to vector<8x32xf32>
    %495 = vector.shape_cast %487 : vector<8x32xf32> to vector<1x8x32xf32>
    tpu.vector_store %arg10[%c1_230, %c0_231, %c0_232], %495 {strides = array<i32>} : memref<2x8x32xf32, #tpu.memory_space<vmem>>, vector<1x8x32xf32>,
    %c5_233 = arith.constant 5 : index
    %c0_234 = arith.constant 0 : index
    %c0_235 = arith.constant 0 : index
    %496 = vector.load %arg8[%c5_233, %c0_234, %c0_235] : memref<8x8x32xf32, #tpu.memory_space<vmem>>, vector<1x8x32xf32>
    %497 = vector.shape_cast %496 : vector<1x8x32xf32> to vector<8x32xf32>
    %498 = vector.shape_cast %489 : vector<8x32xf32> to vector<1x8x32xf32>
    tpu.vector_store %arg8[%c5_233, %c0_234, %c0_235], %498 {strides = array<i32>} : memref<8x8x32xf32, #tpu.memory_space<vmem>>, vector<1x8x32xf32>,
    %c6 = arith.constant 6 : index
    %c0_236 = arith.constant 0 : index
    %c0_237 = arith.constant 0 : index
    %499 = vector.load %arg1[%c6, %c0_236, %c0_237] : memref<8x8x128xf32, #tpu.memory_space<vmem>>, vector<1x8x128xf32>
    %500 = vector.shape_cast %499 : vector<1x8x128xf32> to vector<8x128xf32>
    %c0_238 = arith.constant 0 : index
    %c0_239 = arith.constant 0 : index
    %c0_240 = arith.constant 0 : index
    %501 = vector.load %arg9[%c0_238, %c0_239, %c0_240] : memref<2x8x32xf32, #tpu.memory_space<vmem>>, vector<1x8x32xf32>
    %502 = vector.shape_cast %501 : vector<1x8x32xf32> to vector<8x32xf32>
    %cst_241 = arith.constant dense<0.000000e+00> : vector<8x128xf32>
    %503 = tpu.matmul %502, %3, %cst_241 {dimension_numbers = #tpu.dot_dimension_numbers<[1], [0], [0], [1], [0, 0, 1, 1], [], []>} : vector<8x32xf32>, vector<32x128xf32>, vector<8x128xf32> -> vector<8x128xf32>
    %504 = arith.addf %500, %503 : vector<8x128xf32>
    %c0_242 = arith.constant 0 : index
    %c0_243 = arith.constant 0 : index
    %c0_244 = arith.constant 0 : index
    %505 = vector.load %arg10[%c0_242, %c0_243, %c0_244] : memref<2x8x32xf32, #tpu.memory_space<vmem>>, vector<1x8x32xf32>
    %506 = vector.shape_cast %505 : vector<1x8x32xf32> to vector<8x32xf32>
    %507 = vector.extract_strided_slice %504 {offsets = [0, 0], sizes = [8, 32], strides = [1, 1]} : vector<8x128xf32> to vector<8x32xf32>
    %508 = arith.negf %507 : vector<8x32xf32>
    %509 = math.exp %508 : vector<8x32xf32>
    %cst_245 = arith.constant 1.000000e+00 : f32
    %510 = vector.broadcast %cst_245 : f32 to vector<8x32xf32>
    %511 = arith.addf %510, %509 : vector<8x32xf32>
    %512 = arith.divf %510, %511 : vector<8x32xf32>
    %513 = vector.extract_strided_slice %504 {offsets = [0, 32], sizes = [8, 32], strides = [1, 1]} : vector<8x128xf32> to vector<8x32xf32>
    %514 = arith.negf %513 : vector<8x32xf32>
    %515 = math.exp %514 : vector<8x32xf32>
    %cst_246 = arith.constant 1.000000e+00 : f32
    %516 = vector.broadcast %cst_246 : f32 to vector<8x32xf32>
    %517 = arith.addf %516, %515 : vector<8x32xf32>
    %518 = arith.divf %516, %517 : vector<8x32xf32>
    %519 = vector.extract_strided_slice %504 {offsets = [0, 64], sizes = [8, 32], strides = [1, 1]} : vector<8x128xf32> to vector<8x32xf32>
    %520 = math.tanh %519 : vector<8x32xf32>
    %521 = vector.extract_strided_slice %504 {offsets = [0, 96], sizes = [8, 32], strides = [1, 1]} : vector<8x128xf32> to vector<8x32xf32>
    %522 = arith.negf %521 : vector<8x32xf32>
    %523 = math.exp %522 : vector<8x32xf32>
    %cst_247 = arith.constant 1.000000e+00 : f32
    %524 = vector.broadcast %cst_247 : f32 to vector<8x32xf32>
    %525 = arith.addf %524, %523 : vector<8x32xf32>
    %526 = arith.divf %524, %525 : vector<8x32xf32>
    %527 = arith.mulf %518, %506 : vector<8x32xf32>
    %528 = arith.mulf %512, %520 : vector<8x32xf32>
    %529 = arith.addf %527, %528 : vector<8x32xf32>
    %530 = math.tanh %529 : vector<8x32xf32>
    %531 = arith.mulf %526, %530 : vector<8x32xf32>
    %c0_248 = arith.constant 0 : index
    %c0_249 = arith.constant 0 : index
    %c0_250 = arith.constant 0 : index
    %532 = vector.load %arg9[%c0_248, %c0_249, %c0_250] : memref<2x8x32xf32, #tpu.memory_space<vmem>>, vector<1x8x32xf32>
    %533 = vector.shape_cast %532 : vector<1x8x32xf32> to vector<8x32xf32>
    %534 = vector.shape_cast %531 : vector<8x32xf32> to vector<1x8x32xf32>
    tpu.vector_store %arg9[%c0_248, %c0_249, %c0_250], %534 {strides = array<i32>} : memref<2x8x32xf32, #tpu.memory_space<vmem>>, vector<1x8x32xf32>,
    %c0_251 = arith.constant 0 : index
    %c0_252 = arith.constant 0 : index
    %c0_253 = arith.constant 0 : index
    %535 = vector.load %arg10[%c0_251, %c0_252, %c0_253] : memref<2x8x32xf32, #tpu.memory_space<vmem>>, vector<1x8x32xf32>
    %536 = vector.shape_cast %535 : vector<1x8x32xf32> to vector<8x32xf32>
    %537 = vector.shape_cast %529 : vector<8x32xf32> to vector<1x8x32xf32>
    tpu.vector_store %arg10[%c0_251, %c0_252, %c0_253], %537 {strides = array<i32>} : memref<2x8x32xf32, #tpu.memory_space<vmem>>, vector<1x8x32xf32>,
    %cst_254 = arith.constant dense<0.000000e+00> : vector<8x128xf32>
    %538 = tpu.matmul %531, %4, %cst_254 {dimension_numbers = #tpu.dot_dimension_numbers<[1], [0], [0], [1], [0, 0, 1, 1], [], []>} : vector<8x32xf32>, vector<32x128xf32>, vector<8x128xf32> -> vector<8x128xf32>
    %c1_255 = arith.constant 1 : index
    %c0_256 = arith.constant 0 : index
    %c0_257 = arith.constant 0 : index
    %539 = vector.load %arg9[%c1_255, %c0_256, %c0_257] : memref<2x8x32xf32, #tpu.memory_space<vmem>>, vector<1x8x32xf32>
    %540 = vector.shape_cast %539 : vector<1x8x32xf32> to vector<8x32xf32>
    %cst_258 = arith.constant dense<0.000000e+00> : vector<8x128xf32>
    %541 = tpu.matmul %540, %5, %cst_258 {dimension_numbers = #tpu.dot_dimension_numbers<[1], [0], [0], [1], [0, 0, 1, 1], [], []>} : vector<8x32xf32>, vector<32x128xf32>, vector<8x128xf32> -> vector<8x128xf32>
    %542 = arith.addf %538, %541 : vector<8x128xf32>
    %543 = vector.broadcast %6 : vector<1x128xf32> to vector<8x128xf32>
    %544 = arith.addf %542, %543 : vector<8x128xf32>
    %c1_259 = arith.constant 1 : index
    %c0_260 = arith.constant 0 : index
    %c0_261 = arith.constant 0 : index
    %545 = vector.load %arg10[%c1_259, %c0_260, %c0_261] : memref<2x8x32xf32, #tpu.memory_space<vmem>>, vector<1x8x32xf32>
    %546 = vector.shape_cast %545 : vector<1x8x32xf32> to vector<8x32xf32>
    %547 = vector.extract_strided_slice %544 {offsets = [0, 0], sizes = [8, 32], strides = [1, 1]} : vector<8x128xf32> to vector<8x32xf32>
    %548 = arith.negf %547 : vector<8x32xf32>
    %549 = math.exp %548 : vector<8x32xf32>
    %cst_262 = arith.constant 1.000000e+00 : f32
    %550 = vector.broadcast %cst_262 : f32 to vector<8x32xf32>
    %551 = arith.addf %550, %549 : vector<8x32xf32>
    %552 = arith.divf %550, %551 : vector<8x32xf32>
    %553 = vector.extract_strided_slice %544 {offsets = [0, 32], sizes = [8, 32], strides = [1, 1]} : vector<8x128xf32> to vector<8x32xf32>
    %554 = arith.negf %553 : vector<8x32xf32>
    %555 = math.exp %554 : vector<8x32xf32>
    %cst_263 = arith.constant 1.000000e+00 : f32
    %556 = vector.broadcast %cst_263 : f32 to vector<8x32xf32>
    %557 = arith.addf %556, %555 : vector<8x32xf32>
    %558 = arith.divf %556, %557 : vector<8x32xf32>
    %559 = vector.extract_strided_slice %544 {offsets = [0, 64], sizes = [8, 32], strides = [1, 1]} : vector<8x128xf32> to vector<8x32xf32>
    %560 = math.tanh %559 : vector<8x32xf32>
    %561 = vector.extract_strided_slice %544 {offsets = [0, 96], sizes = [8, 32], strides = [1, 1]} : vector<8x128xf32> to vector<8x32xf32>
    %562 = arith.negf %561 : vector<8x32xf32>
    %563 = math.exp %562 : vector<8x32xf32>
    %cst_264 = arith.constant 1.000000e+00 : f32
    %564 = vector.broadcast %cst_264 : f32 to vector<8x32xf32>
    %565 = arith.addf %564, %563 : vector<8x32xf32>
    %566 = arith.divf %564, %565 : vector<8x32xf32>
    %567 = arith.mulf %558, %546 : vector<8x32xf32>
    %568 = arith.mulf %552, %560 : vector<8x32xf32>
    %569 = arith.addf %567, %568 : vector<8x32xf32>
    %570 = math.tanh %569 : vector<8x32xf32>
    %571 = arith.mulf %566, %570 : vector<8x32xf32>
    %c1_265 = arith.constant 1 : index
    %c0_266 = arith.constant 0 : index
    %c0_267 = arith.constant 0 : index
    %572 = vector.load %arg9[%c1_265, %c0_266, %c0_267] : memref<2x8x32xf32, #tpu.memory_space<vmem>>, vector<1x8x32xf32>
    %573 = vector.shape_cast %572 : vector<1x8x32xf32> to vector<8x32xf32>
    %574 = vector.shape_cast %571 : vector<8x32xf32> to vector<1x8x32xf32>
    tpu.vector_store %arg9[%c1_265, %c0_266, %c0_267], %574 {strides = array<i32>} : memref<2x8x32xf32, #tpu.memory_space<vmem>>, vector<1x8x32xf32>,
    %c1_268 = arith.constant 1 : index
    %c0_269 = arith.constant 0 : index
    %c0_270 = arith.constant 0 : index
    %575 = vector.load %arg10[%c1_268, %c0_269, %c0_270] : memref<2x8x32xf32, #tpu.memory_space<vmem>>, vector<1x8x32xf32>
    %576 = vector.shape_cast %575 : vector<1x8x32xf32> to vector<8x32xf32>
    %577 = vector.shape_cast %569 : vector<8x32xf32> to vector<1x8x32xf32>
    tpu.vector_store %arg10[%c1_268, %c0_269, %c0_270], %577 {strides = array<i32>} : memref<2x8x32xf32, #tpu.memory_space<vmem>>, vector<1x8x32xf32>,
    %c6_271 = arith.constant 6 : index
    %c0_272 = arith.constant 0 : index
    %c0_273 = arith.constant 0 : index
    %578 = vector.load %arg8[%c6_271, %c0_272, %c0_273] : memref<8x8x32xf32, #tpu.memory_space<vmem>>, vector<1x8x32xf32>
    %579 = vector.shape_cast %578 : vector<1x8x32xf32> to vector<8x32xf32>
    %580 = vector.shape_cast %571 : vector<8x32xf32> to vector<1x8x32xf32>
    tpu.vector_store %arg8[%c6_271, %c0_272, %c0_273], %580 {strides = array<i32>} : memref<8x8x32xf32, #tpu.memory_space<vmem>>, vector<1x8x32xf32>,
    %c7 = arith.constant 7 : index
    %c0_274 = arith.constant 0 : index
    %c0_275 = arith.constant 0 : index
    %581 = vector.load %arg1[%c7, %c0_274, %c0_275] : memref<8x8x128xf32, #tpu.memory_space<vmem>>, vector<1x8x128xf32>
    %582 = vector.shape_cast %581 : vector<1x8x128xf32> to vector<8x128xf32>
    %c0_276 = arith.constant 0 : index
    %c0_277 = arith.constant 0 : index
    %c0_278 = arith.constant 0 : index
    %583 = vector.load %arg9[%c0_276, %c0_277, %c0_278] : memref<2x8x32xf32, #tpu.memory_space<vmem>>, vector<1x8x32xf32>
    %584 = vector.shape_cast %583 : vector<1x8x32xf32> to vector<8x32xf32>
    %cst_279 = arith.constant dense<0.000000e+00> : vector<8x128xf32>
    %585 = tpu.matmul %584, %3, %cst_279 {dimension_numbers = #tpu.dot_dimension_numbers<[1], [0], [0], [1], [0, 0, 1, 1], [], []>} : vector<8x32xf32>, vector<32x128xf32>, vector<8x128xf32> -> vector<8x128xf32>
    %586 = arith.addf %582, %585 : vector<8x128xf32>
    %c0_280 = arith.constant 0 : index
    %c0_281 = arith.constant 0 : index
    %c0_282 = arith.constant 0 : index
    %587 = vector.load %arg10[%c0_280, %c0_281, %c0_282] : memref<2x8x32xf32, #tpu.memory_space<vmem>>, vector<1x8x32xf32>
    %588 = vector.shape_cast %587 : vector<1x8x32xf32> to vector<8x32xf32>
    %589 = vector.extract_strided_slice %586 {offsets = [0, 0], sizes = [8, 32], strides = [1, 1]} : vector<8x128xf32> to vector<8x32xf32>
    %590 = arith.negf %589 : vector<8x32xf32>
    %591 = math.exp %590 : vector<8x32xf32>
    %cst_283 = arith.constant 1.000000e+00 : f32
    %592 = vector.broadcast %cst_283 : f32 to vector<8x32xf32>
    %593 = arith.addf %592, %591 : vector<8x32xf32>
    %594 = arith.divf %592, %593 : vector<8x32xf32>
    %595 = vector.extract_strided_slice %586 {offsets = [0, 32], sizes = [8, 32], strides = [1, 1]} : vector<8x128xf32> to vector<8x32xf32>
    %596 = arith.negf %595 : vector<8x32xf32>
    %597 = math.exp %596 : vector<8x32xf32>
    %cst_284 = arith.constant 1.000000e+00 : f32
    %598 = vector.broadcast %cst_284 : f32 to vector<8x32xf32>
    %599 = arith.addf %598, %597 : vector<8x32xf32>
    %600 = arith.divf %598, %599 : vector<8x32xf32>
    %601 = vector.extract_strided_slice %586 {offsets = [0, 64], sizes = [8, 32], strides = [1, 1]} : vector<8x128xf32> to vector<8x32xf32>
    %602 = math.tanh %601 : vector<8x32xf32>
    %603 = vector.extract_strided_slice %586 {offsets = [0, 96], sizes = [8, 32], strides = [1, 1]} : vector<8x128xf32> to vector<8x32xf32>
    %604 = arith.negf %603 : vector<8x32xf32>
    %605 = math.exp %604 : vector<8x32xf32>
    %cst_285 = arith.constant 1.000000e+00 : f32
    %606 = vector.broadcast %cst_285 : f32 to vector<8x32xf32>
    %607 = arith.addf %606, %605 : vector<8x32xf32>
    %608 = arith.divf %606, %607 : vector<8x32xf32>
    %609 = arith.mulf %600, %588 : vector<8x32xf32>
    %610 = arith.mulf %594, %602 : vector<8x32xf32>
    %611 = arith.addf %609, %610 : vector<8x32xf32>
    %612 = math.tanh %611 : vector<8x32xf32>
    %613 = arith.mulf %608, %612 : vector<8x32xf32>
    %c0_286 = arith.constant 0 : index
    %c0_287 = arith.constant 0 : index
    %c0_288 = arith.constant 0 : index
    %614 = vector.load %arg9[%c0_286, %c0_287, %c0_288] : memref<2x8x32xf32, #tpu.memory_space<vmem>>, vector<1x8x32xf32>
    %615 = vector.shape_cast %614 : vector<1x8x32xf32> to vector<8x32xf32>
    %616 = vector.shape_cast %613 : vector<8x32xf32> to vector<1x8x32xf32>
    tpu.vector_store %arg9[%c0_286, %c0_287, %c0_288], %616 {strides = array<i32>} : memref<2x8x32xf32, #tpu.memory_space<vmem>>, vector<1x8x32xf32>,
    %c0_289 = arith.constant 0 : index
    %c0_290 = arith.constant 0 : index
    %c0_291 = arith.constant 0 : index
    %617 = vector.load %arg10[%c0_289, %c0_290, %c0_291] : memref<2x8x32xf32, #tpu.memory_space<vmem>>, vector<1x8x32xf32>
    %618 = vector.shape_cast %617 : vector<1x8x32xf32> to vector<8x32xf32>
    %619 = vector.shape_cast %611 : vector<8x32xf32> to vector<1x8x32xf32>
    tpu.vector_store %arg10[%c0_289, %c0_290, %c0_291], %619 {strides = array<i32>} : memref<2x8x32xf32, #tpu.memory_space<vmem>>, vector<1x8x32xf32>,
    %cst_292 = arith.constant dense<0.000000e+00> : vector<8x128xf32>
    %620 = tpu.matmul %613, %4, %cst_292 {dimension_numbers = #tpu.dot_dimension_numbers<[1], [0], [0], [1], [0, 0, 1, 1], [], []>} : vector<8x32xf32>, vector<32x128xf32>, vector<8x128xf32> -> vector<8x128xf32>
    %c1_293 = arith.constant 1 : index
    %c0_294 = arith.constant 0 : index
    %c0_295 = arith.constant 0 : index
    %621 = vector.load %arg9[%c1_293, %c0_294, %c0_295] : memref<2x8x32xf32, #tpu.memory_space<vmem>>, vector<1x8x32xf32>
    %622 = vector.shape_cast %621 : vector<1x8x32xf32> to vector<8x32xf32>
    %cst_296 = arith.constant dense<0.000000e+00> : vector<8x128xf32>
    %623 = tpu.matmul %622, %5, %cst_296 {dimension_numbers = #tpu.dot_dimension_numbers<[1], [0], [0], [1], [0, 0, 1, 1], [], []>} : vector<8x32xf32>, vector<32x128xf32>, vector<8x128xf32> -> vector<8x128xf32>
    %624 = arith.addf %620, %623 : vector<8x128xf32>
    %625 = vector.broadcast %6 : vector<1x128xf32> to vector<8x128xf32>
    %626 = arith.addf %624, %625 : vector<8x128xf32>
    %c1_297 = arith.constant 1 : index
    %c0_298 = arith.constant 0 : index
    %c0_299 = arith.constant 0 : index
    %627 = vector.load %arg10[%c1_297, %c0_298, %c0_299] : memref<2x8x32xf32, #tpu.memory_space<vmem>>, vector<1x8x32xf32>
    %628 = vector.shape_cast %627 : vector<1x8x32xf32> to vector<8x32xf32>
    %629 = vector.extract_strided_slice %626 {offsets = [0, 0], sizes = [8, 32], strides = [1, 1]} : vector<8x128xf32> to vector<8x32xf32>
    %630 = arith.negf %629 : vector<8x32xf32>
    %631 = math.exp %630 : vector<8x32xf32>
    %cst_300 = arith.constant 1.000000e+00 : f32
    %632 = vector.broadcast %cst_300 : f32 to vector<8x32xf32>
    %633 = arith.addf %632, %631 : vector<8x32xf32>
    %634 = arith.divf %632, %633 : vector<8x32xf32>
    %635 = vector.extract_strided_slice %626 {offsets = [0, 32], sizes = [8, 32], strides = [1, 1]} : vector<8x128xf32> to vector<8x32xf32>
    %636 = arith.negf %635 : vector<8x32xf32>
    %637 = math.exp %636 : vector<8x32xf32>
    %cst_301 = arith.constant 1.000000e+00 : f32
    %638 = vector.broadcast %cst_301 : f32 to vector<8x32xf32>
    %639 = arith.addf %638, %637 : vector<8x32xf32>
    %640 = arith.divf %638, %639 : vector<8x32xf32>
    %641 = vector.extract_strided_slice %626 {offsets = [0, 64], sizes = [8, 32], strides = [1, 1]} : vector<8x128xf32> to vector<8x32xf32>
    %642 = math.tanh %641 : vector<8x32xf32>
    %643 = vector.extract_strided_slice %626 {offsets = [0, 96], sizes = [8, 32], strides = [1, 1]} : vector<8x128xf32> to vector<8x32xf32>
    %644 = arith.negf %643 : vector<8x32xf32>
    %645 = math.exp %644 : vector<8x32xf32>
    %cst_302 = arith.constant 1.000000e+00 : f32
    %646 = vector.broadcast %cst_302 : f32 to vector<8x32xf32>
    %647 = arith.addf %646, %645 : vector<8x32xf32>
    %648 = arith.divf %646, %647 : vector<8x32xf32>
    %649 = arith.mulf %640, %628 : vector<8x32xf32>
    %650 = arith.mulf %634, %642 : vector<8x32xf32>
    %651 = arith.addf %649, %650 : vector<8x32xf32>
    %652 = math.tanh %651 : vector<8x32xf32>
    %653 = arith.mulf %648, %652 : vector<8x32xf32>
    %c1_303 = arith.constant 1 : index
    %c0_304 = arith.constant 0 : index
    %c0_305 = arith.constant 0 : index
    %654 = vector.load %arg9[%c1_303, %c0_304, %c0_305] : memref<2x8x32xf32, #tpu.memory_space<vmem>>, vector<1x8x32xf32>
    %655 = vector.shape_cast %654 : vector<1x8x32xf32> to vector<8x32xf32>
    %656 = vector.shape_cast %653 : vector<8x32xf32> to vector<1x8x32xf32>
    tpu.vector_store %arg9[%c1_303, %c0_304, %c0_305], %656 {strides = array<i32>} : memref<2x8x32xf32, #tpu.memory_space<vmem>>, vector<1x8x32xf32>,
    %c1_306 = arith.constant 1 : index
    %c0_307 = arith.constant 0 : index
    %c0_308 = arith.constant 0 : index
    %657 = vector.load %arg10[%c1_306, %c0_307, %c0_308] : memref<2x8x32xf32, #tpu.memory_space<vmem>>, vector<1x8x32xf32>
    %658 = vector.shape_cast %657 : vector<1x8x32xf32> to vector<8x32xf32>
    %659 = vector.shape_cast %651 : vector<8x32xf32> to vector<1x8x32xf32>
    tpu.vector_store %arg10[%c1_306, %c0_307, %c0_308], %659 {strides = array<i32>} : memref<2x8x32xf32, #tpu.memory_space<vmem>>, vector<1x8x32xf32>,
    %c7_309 = arith.constant 7 : index
    %c0_310 = arith.constant 0 : index
    %c0_311 = arith.constant 0 : index
    %660 = vector.load %arg8[%c7_309, %c0_310, %c0_311] : memref<8x8x32xf32, #tpu.memory_space<vmem>>, vector<1x8x32xf32>
    %661 = vector.shape_cast %660 : vector<1x8x32xf32> to vector<8x32xf32>
    %662 = vector.shape_cast %653 : vector<8x32xf32> to vector<1x8x32xf32>
    tpu.vector_store %arg8[%c7_309, %c0_310, %c0_311], %662 {strides = array<i32>} : memref<8x8x32xf32, #tpu.memory_space<vmem>>, vector<1x8x32xf32>,
    return
  }
  func.func @transform_0(%arg0: i32) -> (i32, i32, i32) {
    %c0_i32 = arith.constant 0 : i32
    %c0_i32_0 = arith.constant 0 : i32
    %c0_i32_1 = arith.constant 0 : i32
    return %arg0, %c0_i32, %c0_i32_0 : i32, i32, i32
  }
  func.func @transform_1(%arg0: i32) -> (i32, i32, i32) {
    %c0_i32 = arith.constant 0 : i32
    %c0_i32_0 = arith.constant 0 : i32
    %c0_i32_1 = arith.constant 0 : i32
    %c0_i32_2 = arith.constant 0 : i32
    return %c0_i32, %c0_i32_0, %c0_i32_1 : i32, i32, i32
  }
  func.func @transform_2(%arg0: i32) -> (i32, i32, i32) {
    %c0_i32 = arith.constant 0 : i32
    %c0_i32_0 = arith.constant 0 : i32
    %c0_i32_1 = arith.constant 0 : i32
    %c0_i32_2 = arith.constant 0 : i32
    return %c0_i32, %c0_i32_0, %c0_i32_1 : i32, i32, i32
  }
  func.func @transform_3(%arg0: i32) -> (i32, i32) {
    %c0_i32 = arith.constant 0 : i32
    %c0_i32_0 = arith.constant 0 : i32
    %c0_i32_1 = arith.constant 0 : i32
    return %c0_i32, %c0_i32_0 : i32, i32
  }
  func.func @transform_4(%arg0: i32) -> (i32, i32) {
    %c0_i32 = arith.constant 0 : i32
    %c0_i32_0 = arith.constant 0 : i32
    %c0_i32_1 = arith.constant 0 : i32
    return %c0_i32, %c0_i32_0 : i32, i32
  }
  func.func @transform_5(%arg0: i32) -> (i32, i32) {
    %c0_i32 = arith.constant 0 : i32
    %c0_i32_0 = arith.constant 0 : i32
    %c0_i32_1 = arith.constant 0 : i32
    return %c0_i32, %c0_i32_0 : i32, i32
  }
  func.func @transform_6(%arg0: i32) -> (i32, i32) {
    %c0_i32 = arith.constant 0 : i32
    %c0_i32_0 = arith.constant 0 : i32
    %c0_i32_1 = arith.constant 0 : i32
    return %c0_i32, %c0_i32_0 : i32, i32
  }
  func.func @transform_7(%arg0: i32) -> (i32, i32, i32) {
    %c0_i32 = arith.constant 0 : i32
    %c0_i32_0 = arith.constant 0 : i32
    %c0_i32_1 = arith.constant 0 : i32
    return %arg0, %c0_i32, %c0_i32_0 : i32, i32, i32
  }
  func.func @transform_8(%arg0: i32) -> (i32, i32, i32) {
    %c0_i32 = arith.constant 0 : i32
    %c0_i32_0 = arith.constant 0 : i32
    %c0_i32_1 = arith.constant 0 : i32
    %c0_i32_2 = arith.constant 0 : i32
    return %c0_i32, %c0_i32_0, %c0_i32_1 : i32, i32, i32
  }
  func.func @transform_9(%arg0: i32) -> (i32, i32, i32) {
    %c0_i32 = arith.constant 0 : i32
    %c0_i32_0 = arith.constant 0 : i32
    %c0_i32_1 = arith.constant 0 : i32
    %c0_i32_2 = arith.constant 0 : i32
    return %c0_i32, %c0_i32_0, %c0_i32_1 : i32, i32, i32
  }
}

module attributes {stable_mosaic.version = 11 : i64} {
  func.func @_matmul_bias_kernel(%arg0: i32, %arg1: memref<16x32xf32, #tpu.memory_space<vmem>>, %arg2: memref<32x128xf32, #tpu.memory_space<vmem>>, %arg3: memref<1x128xf32, #tpu.memory_space<vmem>>, %arg4: memref<16x128xf32, #tpu.memory_space<vmem>>) attributes {dimension_semantics = [#tpu.dimension_semantics<parallel>], iteration_bounds = array<i64: 1>, scalar_prefetch = 0 : i64, scratch_operands = 0 : i64, tpu.core_type = #tpu.core_type<tc>, window_params = [{transform_indices = @transform_0, window_bounds = array<i64: 16, 32>}, {pipeline_mode = #tpu.pipeline_mode<synchronous>, transform_indices = @transform_1, window_bounds = array<i64: 32, 128>}, {pipeline_mode = #tpu.pipeline_mode<synchronous>, transform_indices = @transform_2, window_bounds = array<i64: 1, 128>}, {transform_indices = @transform_3, window_bounds = array<i64: 16, 128>}]} {
    %c0 = arith.constant 0 : index
    %c0_0 = arith.constant 0 : index
    %0 = vector.load %arg1[%c0, %c0_0] : memref<16x32xf32, #tpu.memory_space<vmem>>, vector<16x32xf32>
    %c0_1 = arith.constant 0 : index
    %c0_2 = arith.constant 0 : index
    %1 = vector.load %arg2[%c0_1, %c0_2] : memref<32x128xf32, #tpu.memory_space<vmem>>, vector<32x128xf32>
    %cst = arith.constant dense<0.000000e+00> : vector<16x128xf32>
    %2 = tpu.matmul %0, %1, %cst {dimension_numbers = #tpu.dot_dimension_numbers<[1], [0], [0], [1], [0, 0, 1, 1], [], []>} : vector<16x32xf32>, vector<32x128xf32>, vector<16x128xf32> -> vector<16x128xf32>
    %c0_3 = arith.constant 0 : index
    %c0_4 = arith.constant 0 : index
    %3 = vector.load %arg3[%c0_3, %c0_4] : memref<1x128xf32, #tpu.memory_space<vmem>>, vector<1x128xf32>
    %4 = vector.broadcast %3 : vector<1x128xf32> to vector<16x128xf32>
    %5 = arith.addf %2, %4 : vector<16x128xf32>
    %c0_5 = arith.constant 0 : index
    %c0_6 = arith.constant 0 : index
    %6 = vector.load %arg4[%c0_5, %c0_6] : memref<16x128xf32, #tpu.memory_space<vmem>>, vector<16x128xf32>
    tpu.vector_store %arg4[%c0_5, %c0_6], %5 {strides = array<i32>} : memref<16x128xf32, #tpu.memory_space<vmem>>, vector<16x128xf32>,
    return
  }
  func.func @transform_0(%arg0: i32) -> (i32, i32) {
    %c0_i32 = arith.constant 0 : i32
    %c0_i32_0 = arith.constant 0 : i32
    return %arg0, %c0_i32 : i32, i32
  }
  func.func @transform_1(%arg0: i32) -> (i32, i32) {
    %c0_i32 = arith.constant 0 : i32
    %c0_i32_0 = arith.constant 0 : i32
    %c0_i32_1 = arith.constant 0 : i32
    return %c0_i32, %c0_i32_0 : i32, i32
  }
  func.func @transform_2(%arg0: i32) -> (i32, i32) {
    %c0_i32 = arith.constant 0 : i32
    %c0_i32_0 = arith.constant 0 : i32
    %c0_i32_1 = arith.constant 0 : i32
    return %c0_i32, %c0_i32_0 : i32, i32
  }
  func.func @transform_3(%arg0: i32) -> (i32, i32) {
    %c0_i32 = arith.constant 0 : i32
    %c0_i32_0 = arith.constant 0 : i32
    return %arg0, %c0_i32 : i32, i32
  }
}

</mosaic_0001>

<bundles_post_ra>
// kernel: tedlium_combined_forward.3
= control target key start
LH: loop header
LB: loop body
LE: loop exit
PB: predicated region body
PF: predicated region fallthrough
CT: control target
= control target key end

     0   :  { %vm42_vm0 = vcmask 850944   ;;  %s396_s1 = inlined_call_operand.vmem [shape: f32[104,128], index: 1, kind: input, shape index: {}]   ;;  %s397_s0 = inlined_call_operand.vmem [shape: f32[64,104], index: 0, kind: input, shape index: {}]   ;;  %s398_s2 = inlined_call_operand.vmem [shape: f32[1,128], index: 2, kind: input, shape index: {}]   ;;  %s399_s3 = inlined_call_operand.vmem [shape: f32[64,128], index: 3, kind: output, shape index: {}]  }
   0x1   :  { %v34_v0 = vld [vmem:[%s396_s1 + $0x60] sm:$0xff]  ;;  %v33_v1 = vld [vmem:[%s396_s1 + $0x58] sm:$0xff]  ;;  %v32_v2 = vld [vmem:[%s396_s1 + $0x50] sm:$0xff] }
   0x2   :  { %214 = vmatprep.subr.mxu0 %v34_v0  ;;  %252 = vmatprep.subr.mxu1 %v34_v0  ;;  %v31_v3 = vld [vmem:[%s396_s1 + $0x48] sm:$0xff]  ;;  %v30_v4 = vld [vmem:[%s396_s1 + $0x40] sm:$0xff]  ;;  %v29_v5 = vld [vmem:[%s396_s1 + $0x38] sm:$0xff] }
   0x3   :  { %215 = vmatpush3.msra.mxu0 %v34_v0  ;;  %265 = vmatpush3.msra.mxu1 %v34_v0  ;;  %v28_v6 = vld [vmem:[%s396_s1 + $0x30] sm:$0xff]  ;;  %v27_v7 = vld [vmem:[%s396_s1 + $0x28] sm:$0xff]  ;;  %v26_v8 = vld [vmem:[%s396_s1 + $0x20] sm:$0xff] }
   0x4   :  { %216 = vmatprep.subr.mxu0 %v33_v1  ;;  %253 = vmatprep.subr.mxu1 %v33_v1  ;;  %v25_v9 = vld [vmem:[%s396_s1 + $0x18] sm:$0xff]  ;;  %v24_v10 = vld [vmem:[%s396_s1 + $0x10] sm:$0xff]  ;;  %v23_v11 = vld [vmem:[%s396_s1 + $0x8] sm:$0xff] }
   0x5   :  { %217 = vmatpush3.msra.mxu0 %v33_v1  ;;  %266 = vmatpush3.msra.mxu1 %v33_v1  ;;  %v22_v12 = vld [vmem:[%s396_s1] sm:$0xff]  ;;  %v15_v15 = vld [vmem:[%s397_s0 + $0x8] sm:$0xff]  ;;  %v16_v17 = vld [vmem:[%s397_s0 + $0x10] sm:$0xff] }
   0x6   :  { %218 = vmatprep.subr.mxu0 %v32_v2  ;;  %254 = vmatprep.subr.mxu1 %v32_v2  ;;  %v14_v13 = vld [vmem:[%s397_s0] sm:$0xff]  ;;  %v19_v16 = vld [vmem:[%s397_s0 + $0x28] sm:$0xff]  ;;  %v20_v18 = vld [vmem:[%s397_s0 + $0x30] sm:$0xff] }
   0x7   :  { %219 = vmatpush3.msra.mxu0 %v32_v2  ;;  %267 = vmatpush3.msra.mxu1 %v32_v2  ;;  %v18_v14 = vld [vmem:[%s397_s0 + $0x20] sm:$0xff]  ;;  %v17_v19 = vld [vmem:[%s397_s0 + $0x18] sm:$0xff] }
   0x8   :  { %220 = vmatprep.subr.mxu0 %v31_v3  ;;  %255 = vmatprep.subr.mxu1 %v31_v3  ;;  %v21_v20 = vld [vmem:[%s397_s0 + $0x38] sm:$0xff]  ;;  %v184_v21 = vld [vmem:[%s398_s2] ss:$0 sm:$0xff] }
   0x9   :  { %221 = vmatpush3.msra.mxu0 %v31_v3  ;;  %268 = vmatpush3.msra.mxu1 %v31_v3 }
   0xa   :  { %222 = vmatprep.subr.mxu0 %v30_v4  ;;  %256 = vmatprep.subr.mxu1 %v30_v4 }
   0xb   :  { %223 = vmatpush3.msra.mxu0 %v30_v4  ;;  %269 = vmatpush3.msra.mxu1 %v30_v4 }
   0xc   :  { %224 = vmatprep.subr.mxu0 %v29_v5  ;;  %257 = vmatprep.subr.mxu1 %v29_v5 }
   0xd   :  { %225 = vmatpush3.msra.mxu0 %v29_v5  ;;  %270 = vmatpush3.msra.mxu1 %v29_v5 }
   0xe   :  { %226 = vmatprep.subr.mxu0 %v28_v6  ;;  %258 = vmatprep.subr.mxu1 %v28_v6 }
   0xf   :  { %227 = vmatpush3.msra.mxu0 %v28_v6  ;;  %271 = vmatpush3.msra.mxu1 %v28_v6 }
  0x10   :  { %228 = vmatprep.subr.mxu0 %v27_v7  ;;  %259 = vmatprep.subr.mxu1 %v27_v7 }
  0x11   :  { %229 = vmatpush3.msra.mxu0 %v27_v7  ;;  %272 = vmatpush3.msra.mxu1 %v27_v7 }
  0x12   :  { %230 = vmatprep.subr.mxu0 %v26_v8  ;;  %260 = vmatprep.subr.mxu1 %v26_v8 }
  0x13   :  { %231 = vmatpush3.msra.mxu0 %v26_v8  ;;  %273 = vmatpush3.msra.mxu1 %v26_v8 }
  0x14   :  { %232 = vmatprep.subr.mxu0 %v25_v9  ;;  %261 = vmatprep.subr.mxu1 %v25_v9 }
  0x15   :  { %233 = vmatpush3.msra.mxu0 %v25_v9  ;;  %274 = vmatpush3.msra.mxu1 %v25_v9 }
  0x16   :  { %234 = vmatprep.subr.mxu0 %v24_v10  ;;  %262 = vmatprep.subr.mxu1 %v24_v10 }
  0x17   :  { %235 = vmatpush3.msra.mxu0 %v24_v10  ;;  %275 = vmatpush3.msra.mxu1 %v24_v10 }
  0x18   :  { %236 = vmatprep.subr.mxu0 %v23_v11  ;;  %263 = vmatprep.subr.mxu1 %v23_v11 }
  0x19   :  { %237 = vmatpush3.msra.mxu0 %v23_v11  ;;  %276 = vmatpush3.msra.mxu1 %v23_v11 }
  0x1a   :  { %238 = vmatprep.subr.mxu0 %v22_v12  ;;  %264 = vmatprep.subr.mxu1 %v22_v12 }
  0x1b   :  { %239 = vmatpush3.msra.mxu0 %v22_v12  ;;  %277 = vmatpush3.msra.mxu1 %v22_v12 }
  0x1c   :  { %240 = vmatprep.mubr.msk.f32.mxu0 %vm42_vm0, %v14_v13  ;;  %246 = vmatprep.mubr.msk.f32.mxu1 %vm42_vm0, %v18_v14 }
  0x1d   :  { %241 = vmatmul.mubr.msk.f32.vlgmr.msra.gmra.mxu0 %vm42_vm0, %v15_v15  ;;  %247 = vmatmul.mubr.msk.f32.vlgmr.msra.gmra.mxu1 %vm42_vm0, %v19_v16 }
  0x1e   :  { %243 = vmatprep.mubr.msk.f32.mxu0 %vm42_vm0, %v16_v17  ;;  %249 = vmatprep.mubr.msk.f32.mxu1 %vm42_vm0, %v20_v18 }
  0x21   :  { %244 = vmatmul.mubr.msk.f32.gmra.mxu0 %vm42_vm0, %v17_v19  ;;  %250 = vmatmul.mubr.msk.f32.gmra.mxu1 %vm42_vm0, %v21_v20 }
  0xdd   :  { %v242_v22 = vpop.f32.mrf.mxu0  ;;  %v248_v23 = vpop.f32.mrf.mxu1 }
  0xde   :  { %v139_v24 = vadd.f32 %v242_v22, %v184_v21  ;;  %v159_v25 = vadd.f32 %v248_v23, %v184_v21 }
  0xdf   :  { %v133_v26 = vpop.f32.mrf.mxu0  ;;  %v153_v27 = vpop.f32.mrf.mxu1 }
  0xe0   :  { %173 = vst [vmem:[%s399_s3 + $0x8] sm:$0xff] %v139_v24  ;;  %177 = vst [vmem:[%s399_s3 + $0x28] sm:$0xff] %v159_v25  ;;  %v134_v28 = vadd.f32 %v184_v21, %v133_v26  ;;  %v154_v29 = vadd.f32 %v184_v21, %v153_v27 }
  0xe1   :  { %v245_v30 = vpop.f32.mrf.mxu0  ;;  %v251_v31 = vpop.f32.mrf.mxu1 }
  0xe2   :  { %172 = vst [vmem:[%s399_s3] sm:$0xff] %v134_v28  ;;  %176 = vst [vmem:[%s399_s3 + $0x20] sm:$0xff] %v154_v29  ;;  %v149_v32 = vadd.f32 %v245_v30, %v184_v21  ;;  %v169_v33 = vadd.f32 %v251_v31, %v184_v21 }
  0xe3   :  { %v143_v34 = vpop.f32.mrf.mxu0  ;;  %v163_v35 = vpop.f32.mrf.mxu1 }
  0xe4   :  { %175 = vst [vmem:[%s399_s3 + $0x18] sm:$0xff] %v149_v32  ;;  %179 = vst [vmem:[%s399_s3 + $0x38] sm:$0xff] %v169_v33  ;;  %v144_v36 = vadd.f32 %v184_v21, %v143_v34  ;;  %v164_v37 = vadd.f32 %v184_v21, %v163_v35 }
  0xe6   :  { %174 = vst [vmem:[%s399_s3 + $0x10] sm:$0xff] %v144_v36  ;;  %178 = vst [vmem:[%s399_s3 + $0x30] sm:$0xff] %v164_v37 }

// kernel: tedlium_combined_forward.5
= control target key start
LH: loop header
LB: loop body
LE: loop exit
PB: predicated region body
PF: predicated region fallthrough
CT: control target
= control target key end

     0   :  { %vm27_vm0 = vcmask 261120   ;;  %s184_s1 = inlined_call_operand.vmem [shape: f32[32,128], index: 1, kind: input, shape index: {}]   ;;  %s185_s0 = inlined_call_operand.vmem [shape: f32[16,32], index: 0, kind: input, shape index: {}]   ;;  %s186_s2 = inlined_call_operand.vmem [shape: f32[1,128], index: 2, kind: input, shape index: {}]   ;;  %s187_s3 = inlined_call_operand.vmem [shape: f32[16,128], index: 3, kind: output, shape index: {}]  }
   0x1   :  { %v19_v0 = vld [vmem:[%s184_s1 + $0x18] sm:$0xff]  ;;  %v18_v1 = vld [vmem:[%s184_s1 + $0x10] sm:$0xff]  ;;  %v14_v2 = vld [vmem:[%s185_s0] sm:$0xff] }
   0x2   :  { %124 = vmatprep.subr.mxu0 %v19_v0  ;;  %v17_v3 = vld [vmem:[%s184_s1 + $0x8] sm:$0xff]  ;;  %132 = vmatprep.mubr.msk.f32.mxu0 %vm27_vm0, %v14_v2  ;;  %v16_v4 = vld [vmem:[%s184_s1] sm:$0xff] }
   0x3   :  { %125 = vmatpush3.msra.mxu0 %v19_v0  ;;  %v15_v5 = vld [vmem:[%s185_s0 + $0x8] sm:$0xff]  ;;  %v115_v6 = vld [vmem:[%s186_s2] ss:$0 sm:$0xff] }
   0x4   :  { %126 = vmatprep.subr.mxu0 %v18_v1 }
   0x5   :  { %127 = vmatpush3.msra.mxu0 %v18_v1 }
   0x6   :  { %128 = vmatprep.subr.mxu0 %v17_v3 }
   0x7   :  { %129 = vmatpush3.msra.mxu0 %v17_v3 }
   0x8   :  { %130 = vmatprep.subr.mxu0 %v16_v4 }
   0x9   :  { %131 = vmatpush3.msra.mxu0 %v16_v4 }
   0xa   :  { %133 = vmatmul.mubr.msk.f32.vlgmr.msra.gmra.mxu0 %vm27_vm0, %v15_v5 }
  0xca   :  { %v134_v7 = vpop.f32.mrf.mxu0 }
  0xcb   :  { %v106_v8 = vadd.f32 %v134_v7, %v115_v6 }
  0xcc   :  { %v100_v9 = vpop.f32.mrf.mxu0 }
  0xcd   :  { %110 = vst [vmem:[%s187_s3 + $0x8] sm:$0xff] %v106_v8  ;;  %v101_v10 = vadd.f32 %v115_v6, %v100_v9 }
  0xcf   :  { %109 = vst [vmem:[%s187_s3] sm:$0xff] %v101_v10 }

// kernel: tedlium_combined_forward.4
= control target key start
LH: loop header
LB: loop body
LE: loop exit
PB: predicated region body
PF: predicated region fallthrough
CT: control target
= control target key end

     0   :  { %vm35_vm0 = vcmask 261120   ;;  %v3123_v0 = vmov 0.0   ;;  %vm3124_vm1 = vmmov 0   ;;  %s3125_s29 = smov 64   ;;  %s3126_s11 = smov 32   ;;  %s3984_s3 = inlined_call_operand.vmem [shape: f32[32,128], index: 3, kind: input, shape index: {}]   ;;  %s3985_s1 = inlined_call_operand.vmem [shape: f32[2,8,32], index: 1, kind: input, shape index: {}]   ;;  %s3986_s8 = inlined_call_operand.vmem [shape: f32[2,8,32], index: 8, kind: output, shape index: {1}]   ;;  %s3987_s2 = inlined_call_operand.vmem [shape: f32[2,8,32], index: 2, kind: input, shape index: {}]   ;;  %s3988_s9 = inlined_call_operand.vmem [shape: f32[2,8,32], index: 9, kind: output, shape index: {2}]   ;;  %s3989_s0 = inlined_call_operand.vmem [shape: f32[8,8,128], index: 0, kind: input, shape index: {}]   ;;  %s3990_s5 = inlined_call_operand.vmem [shape: f32[32,128], index: 5, kind: input, shape index: {}]   ;;  %s3991_s4 = inlined_call_operand.vmem [shape: f32[32,128], index: 4, kind: input, shape index: {}]   ;;  %s3992_s6 = inlined_call_operand.vmem [shape: f32[1,128], index: 6, kind: input, shape index: {}]   ;;  %s3993_s7 = inlined_call_operand.vmem [shape: f32[8,8,32], index: 7, kind: output, shape index: {0}]  }
   0x1   :  { %2713 = vmatprep.subr.mxu0 %v3123_v0  ;;  %v3182_v1 = vld [vmem:[%s3984_s3 + $0x18] sm:$0xff]  ;;  %v3187_v2 = vld [vmem:[%s3984_s3 + $0x10] sm:$0xff]  ;;  %2721 = vmatprep.mubr.msk.f32.mxu0 %vm3124_vm1, %v3123_v0  ;;  %v33_v3 = vld [vmem:[%s3985_s1] sm:$0xff]  ;;  %s3127_s14 = smov 96  }
   0x2   :  { %2714 = vmatpush3.msra.mxu0 %v3182_v1  ;;  %2724 = vmatprep.subr.mxu1 %v3123_v0  ;;  %v3200_v4 = vld [vmem:[%s3984_s3 + $0x8] sm:$0xff]  ;;  %36 = vst.msk [vmem:[%s3986_s8] sm:$0xff] %vm35_vm0, %v33_v3  ;;  %v3213_v5 = vld [vmem:[%s3984_s3] sm:$0xff]  ;;  %v3247_v25 = vld [vmem:[%s3990_s5 + $0x18] sm:$0xff] }
   0x3   :  { %2715 = vmatprep.subr.mxu0 %v3123_v0  ;;  %2732 = vmatprep.mubr.msk.f32.mxu1 %vm3124_vm1, %v3123_v0  ;;  %v38_v7 = vld [vmem:[%s3987_s2] sm:$0xff]  ;;  %v34_v24 = vld [vmem:[%s3985_s1 + $0x8] sm:$0xff]  ;;  %v3252_v26 = vld [vmem:[%s3990_s5 + $0x10] sm:$0xff] }
   0x4   :  { %2716 = vmatpush3.msra.mxu0 %v3187_v2  ;;  %40 = vst.msk [vmem:[%s3988_s9] sm:$0xff] %vm35_vm0, %v38_v7  ;;  %v55_v8 = vld [vmem:[%s3989_s0] sm:$0xff]  ;;  %v3257_v27 = vld [vmem:[%s3991_s4 + $0x18] sm:$0xff]  ;;  %37 = vst.msk [vmem:[%s3986_s8 + $0x8] sm:$0xff] %vm35_vm0, %v34_v24  ;;  %2725 = vmatpush3.msra.mxu1 %v3247_v25 }
   0x5   :  { %2717 = vmatprep.subr.mxu0 %v3123_v0  ;;  %v3268_v28 = vld [vmem:[%s3991_s4 + $0x10] sm:$0xff]  ;;  %2726 = vmatprep.subr.mxu1 %v3123_v0  ;;  %v3275_v29 = vld [vmem:[%s3990_s5 + $0x8] sm:$0xff]  ;;  %v3289_v31 = vld [vmem:[%s3990_s5] sm:$0xff] }
   0x6   :  { %2718 = vmatpush3.msra.mxu0 %v3200_v4  ;;  %v3280_v30 = vld [vmem:[%s3991_s4 + $0x8] sm:$0xff]  ;;  %2727 = vmatpush3.msra.mxu1 %v3252_v26  ;;  %v3294_v32 = vld [vmem:[%s3991_s4] sm:$0xff] }
   0x7   :  { %2719 = vmatprep.subr.mxu0 %v3123_v0  ;;  %2728 = vmatprep.subr.mxu1 %v3123_v0  ;;  %v39_v42 = vld [vmem:[%s3987_s2 + $0x8] sm:$0xff]  ;;  %v3364_v43 = vld [vmem:[%s3992_s6] ss:$0 sm:$0xff] }
   0x8   :  { %2720 = vmatpush3.msra.mxu0 %v3213_v5  ;;  %2729 = vmatpush3.msra.mxu1 %v3275_v29  ;;  %41 = vst.msk [vmem:[%s3988_s9 + $0x8] sm:$0xff] %vm35_vm0, %v39_v42  ;;  %v2516_v48 = vld [vmem:[%s3989_s0 + $0x8] sm:$0xff] }
   0x9   :  { %2735 = vmatprep.subr.mxu0 %v3123_v0  ;;  %v56_v6 = vld [vmem:[%s3986_s8] sm:$0xff]  ;;  %2730 = vmatprep.subr.mxu1 %v3123_v0 }
   0xa   :  { %2722 = vmatmul.mubr.msk.f32.vlgmr.msra.gmra.mxu0 %vm35_vm0, %v56_v6  ;;  %2731 = vmatpush3.msra.mxu1 %v3289_v31 }
   0xb   :  { %2743 = vmatprep.mubr.msk.f32.mxu0 %vm3124_vm1, %v3123_v0  ;;  %v132_v13 = vld [vmem:[%s3988_s9] sm:$0xff]  ;;  %2736 = vmatpush3.msra.mxu0 %v3257_v27  ;;  %v2508_v34 = vld [vmem:[%s3986_s8 + $0x8] sm:$0xff] }
   0xc   :  { %2737 = vmatprep.subr.mxu0 %v3123_v0  ;;  %2733 = vmatmul.mubr.msk.f32.vlgmr.msra.gmra.mxu1 %vm35_vm0, %v2508_v34 }
   0xd   :  { %2738 = vmatpush3.msra.mxu0 %v3268_v28  ;;  %2746 = vmatprep.subr.mxu1 %v3123_v0 }
   0xe   :  { %2739 = vmatprep.subr.mxu0 %v3123_v0  ;;  %2754 = vmatprep.mubr.msk.f32.mxu1 %vm3124_vm1, %v3123_v0 }
   0xf   :  { %2740 = vmatpush3.msra.mxu0 %v3280_v30  ;;  %2747 = vmatpush3.msra.mxu1 %v3182_v1  ;;  %v2512_v53 = vld [vmem:[%s3988_s9 + $0x8] sm:$0xff] }
  0x10   :  { %2741 = vmatprep.subr.mxu0 %v3123_v0  ;;  %2748 = vmatprep.subr.mxu1 %v3123_v0 }
  0x11   :  { %2742 = vmatpush3.msra.mxu0 %v3294_v32  ;;  %2749 = vmatpush3.msra.mxu1 %v3187_v2 }
  0x12   :  { %2757 = vmatprep.subr.mxu0 %v3123_v0  ;;  %2750 = vmatprep.subr.mxu1 %v3123_v0 }
  0x13   :  { %2751 = vmatpush3.msra.mxu1 %v3200_v4 }
  0x14   :  { %2752 = vmatprep.subr.mxu1 %v3123_v0 }
  0x15   :  { %2753 = vmatpush3.msra.mxu1 %v3213_v5 }
  0x16   :  { %2768 = vmatprep.subr.mxu1 %v3123_v0 }
  0xca   :  { %v127_v9 = vpop.f32.mrf.mxu0 }
  0xcb   :  { %v131_v10 = vadd.f32 %v127_v9, %v55_v8 }
  0xcc   :  { %v2723_v11 = vpop.f32.mrf.mxu0  ;;  %v242_v38 = vpop.f32.mrf.mxu1 }
  0xcd   :  { %2982 = vtanh.f32 %v131_v10  ;;  %v2507_v14 = vmul.f32 -1.442695, %v131_v10 }
  0xce   :  { %v2734_v39 = vpop.f32.mrf.mxu1 }
  0xcf   :  { %2984 = vpow2.f32 %v2507_v14 }
  0xda   :  { %v2983_v12 = vpop.eup %2982 }
  0xdb   :  { %146 = vrot.lane.b32.xlu0 %v2983_v12, %s3125_s29 }
  0xdc   :  { %v2985_v15 = vpop.eup %2984 }
  0xdd   :  { %v136_v16 = vadd.f32 1.0, %v2985_v15 }
  0xdf   :  { %141 = vrot.lane.b32.xlu0 %v132_v13, %s3126_s11  ;;  %2986 = vrcp.f32 %v136_v16 }
  0xec   :  { %v2987_v17 = vpop.eup %2986 }
 0x14d   :  { %v147_v18 = vpop.permute.xlu0 %146 }
 0x14e   :  { %v149_v19 = vmul.f32 %v2987_v17, %v147_v18 }
 0x150   :  { %151 = vrot.lane.b32.xlu1 %v149_v19, %s3126_s11 }
 0x151   :  { %v142_v20 = vpop.permute.xlu0 %141 }
 0x152   :  { %v144_v21 = vmul.f32 %v2987_v17, %v142_v20 }
 0x1c2   :  { %v152_v22 = vpop.permute.xlu1 %151 }
 0x1c3   :  { %v154_v23 = vadd.f32 %v152_v22, %v144_v21 }
 0x1c5   :  { %2988 = vtanh.f32 %v154_v23 }
 0x1d2   :  { %v2989_v33 = vpop.eup %2988 }
 0x1d3   :  { %157 = vrot.lane.b32.xlu1 %v2989_v33, %s3125_s29 }
 0x1d7   :  { %167 = vrot.lane.b32.xlu1 %v154_v23, %s3127_s14 }
 0x245   :  { %v158_v35 = vpop.permute.xlu1 %157 }
 0x246   :  { %v160_v36 = vmul.f32 %v2987_v17, %v158_v35 }
 0x248   :  { %162 = vrot.lane.b32.xlu0 %v160_v36, %s3126_s11 }
 0x249   :  { %v168_v37 = vpop.permute.xlu1 %167 }
 0x24a   :  { %170 = vst.msk [vmem:[%s3988_s9] sm:$0xff] %vm35_vm0, %v168_v37 }
 0x251   :  { %v443_v55 = vld [vmem:[%s3988_s9] sm:$0xff] }
 0x2ba   :  { %v163_v40 = vpop.permute.xlu0 %162 }
 0x2bb   :  { %165 = vst.msk [vmem:[%s3986_s8] sm:$0xff] %vm35_vm0, %v163_v40  ;;  %2744 = vmatmul.mubr.msk.f32.vlgmr.msra.gmra.mxu0 %vm35_vm0, %v163_v40 }
 0x2bc   :  { %2758 = vmatpush3.msra.mxu0 %v3247_v25  ;;  %2765 = vmatprep.mubr.msk.f32.mxu0 %vm3124_vm1, %v3123_v0 }
 0x2bd   :  { %2759 = vmatprep.subr.mxu0 %v3123_v0 }
 0x2be   :  { %2760 = vmatpush3.msra.mxu0 %v3252_v26 }
 0x2bf   :  { %2761 = vmatprep.subr.mxu0 %v3123_v0 }
 0x2c0   :  { %2762 = vmatpush3.msra.mxu0 %v3275_v29 }
 0x2c1   :  { %2763 = vmatprep.subr.mxu0 %v3123_v0 }
 0x2c2   :  { %v368_v41 = vld [vmem:[%s3986_s8] sm:$0xff]  ;;  %2764 = vmatpush3.msra.mxu0 %v3289_v31 }
 0x2c3   :  { %2755 = vmatmul.mubr.msk.f32.vlgmr.msra.gmra.mxu1 %vm35_vm0, %v368_v41  ;;  %2779 = vmatprep.subr.mxu0 %v3123_v0 }
 0x2c4   :  { %2769 = vmatpush3.msra.mxu1 %v3257_v27  ;;  %2776 = vmatprep.mubr.msk.f32.mxu1 %vm3124_vm1, %v3123_v0 }
 0x2c5   :  { %2770 = vmatprep.subr.mxu1 %v3123_v0 }
 0x2c6   :  { %2771 = vmatpush3.msra.mxu1 %v3268_v28 }
 0x2c7   :  { %2772 = vmatprep.subr.mxu1 %v3123_v0 }
 0x2c8   :  { %2773 = vmatpush3.msra.mxu1 %v3280_v30 }
 0x2c9   :  { %2774 = vmatprep.subr.mxu1 %v3123_v0 }
 0x2ca   :  { %2775 = vmatpush3.msra.mxu1 %v3294_v32 }
 0x2cb   :  { %2790 = vmatprep.subr.mxu1 %v3123_v0 }
 0x37b   :  { %v314_v44 = vpop.f32.mrf.mxu0 }
 0x37c   :  { %v315_v45 = vadd.f32 %v314_v44, %v242_v38  ;;  %v2527_v44 = vld [vmem:[%s3989_s0 + $0x10] sm:$0xff] }
 0x37d   :  { %v2745_v46 = vpop.f32.mrf.mxu0 }
 0x37e   :  { %v324_v47 = vadd.f32 %v3364_v43, %v315_v45 }
 0x380   :  { %2990 = vtanh.f32 %v324_v47  ;;  %v2513_v56 = vmul.f32 -1.442695, %v324_v47 }
 0x383   :  { %v438_v49 = vpop.f32.mrf.mxu1 }
 0x384   :  { %v442_v50 = vadd.f32 %v2516_v48, %v438_v49 }
 0x385   :  { %v2756_v51 = vpop.f32.mrf.mxu1 }
 0x386   :  { %2992 = vtanh.f32 %v442_v50  ;;  %v2518_v57 = vmul.f32 -1.442695, %v442_v50 }
 0x387   :  { %2994 = vpow2.f32 %v2513_v56 }
 0x388   :  { %2996 = vpow2.f32 %v2518_v57 }
 0x38d   :  { %v2991_v52 = vpop.eup %2990 }
 0x38e   :  { %340 = vrot.lane.b32.xlu0 %v2991_v52, %s3125_s29 }
 0x392   :  { %335 = vrot.lane.b32.xlu0 %v2512_v53, %s3126_s11 }
 0x393   :  { %v2993_v54 = vpop.eup %2992 }
 0x394   :  { %457 = vrot.lane.b32.xlu1 %v2993_v54, %s3125_s29  ;;  %v2995_v58 = vpop.eup %2994 }
 0x395   :  { %v330_v59 = vadd.f32 1.0, %v2995_v58  ;;  %v2997_v60 = vpop.eup %2996 }
 0x396   :  { %452 = vrot.lane.b32.xlu0 %v443_v55, %s3126_s11  ;;  %v447_v61 = vadd.f32 1.0, %v2997_v60 }
 0x397   :  { %2998 = vrcp.f32 %v330_v59 }
 0x398   :  { %3000 = vrcp.f32 %v447_v61 }
 0x3a4   :  { %v2999_v62 = vpop.eup %2998 }
 0x3a5   :  { %v3001_v6 = vpop.eup %3000 }
 0x400   :  { %v341_v63 = vpop.permute.xlu0 %340 }
 0x401   :  { %v343_v3 = vmul.f32 %v2999_v62, %v341_v63 }
 0x403   :  { %345 = vrot.lane.b32.xlu1 %v343_v3, %s3126_s11 }
 0x404   :  { %v336_v9 = vpop.permute.xlu0 %335 }
 0x405   :  { %v338_v10 = vmul.f32 %v2999_v62, %v336_v9 }
 0x406   :  { %v458_v7 = vpop.permute.xlu1 %457 }
 0x407   :  { %v460_v8 = vmul.f32 %v3001_v6, %v458_v7 }
 0x408   :  { %v453_v13 = vpop.permute.xlu0 %452 }
 0x409   :  { %462 = vrot.lane.b32.xlu1 %v460_v8, %s3126_s11  ;;  %v455_v14 = vmul.f32 %v3001_v6, %v453_v13 }
 0x475   :  { %v346_v11 = vpop.permute.xlu1 %345 }
 0x476   :  { %v348_v12 = vadd.f32 %v346_v11, %v338_v10 }
 0x478   :  { %3002 = vtanh.f32 %v348_v12 }
 0x47b   :  { %v463_v15 = vpop.permute.xlu1 %462 }
 0x47c   :  { %v465_v16 = vadd.f32 %v463_v15, %v455_v14 }
 0x47e   :  { %3004 = vtanh.f32 %v465_v16 }
 0x485   :  { %v3003_v17 = vpop.eup %3002 }
 0x486   :  { %351 = vrot.lane.b32.xlu0 %v3003_v17, %s3125_s29 }
 0x48b   :  { %v3005_v18 = vpop.eup %3004 }
 0x48c   :  { %468 = vrot.lane.b32.xlu1 %v3005_v18, %s3125_s29 }
 0x4f8   :  { %v352_v19 = vpop.permute.xlu0 %351 }
 0x4f9   :  { %v354_v20 = vmul.f32 %v2999_v62, %v352_v19 }
 0x4fb   :  { %356 = vrot.lane.b32.xlu0 %v354_v20, %s3126_s11 }
 0x4fe   :  { %v469_v21 = vpop.permute.xlu1 %468 }
 0x4ff   :  { %v471_v22 = vmul.f32 %v3001_v6, %v469_v21  ;;  %361 = vrot.lane.b32.xlu0 %v348_v12, %s3127_s14 }
 0x501   :  { %473 = vrot.lane.b32.xlu1 %v471_v22, %s3126_s11 }
 0x505   :  { %478 = vrot.lane.b32.xlu1 %v465_v16, %s3127_s14 }
 0x56d   :  { %v357_v23 = vpop.permute.xlu0 %356 }
 0x56e   :  { %2514 = vst.msk [vmem:[%s3986_s8 + $0x8] sm:$0xff] %vm35_vm0, %v357_v23  ;;  %365 = vst.msk [vmem:[%s3993_s7] sm:$0xff] %vm35_vm0, %v357_v23 }
 0x571   :  { %v362_v24 = vpop.permute.xlu0 %361 }
 0x572   :  { %2515 = vst.msk [vmem:[%s3988_s9 + $0x8] sm:$0xff] %vm35_vm0, %v362_v24 }
 0x573   :  { %v474_v33 = vpop.permute.xlu1 %473 }
 0x574   :  { %476 = vst.msk [vmem:[%s3986_s8] sm:$0xff] %vm35_vm0, %v474_v33  ;;  %2777 = vmatmul.mubr.msk.f32.vlgmr.msra.gmra.mxu1 %vm35_vm0, %v474_v33 }
 0x575   :  { %v2519_v34 = vld [vmem:[%s3986_s8 + $0x8] sm:$0xff]  ;;  %2791 = vmatpush3.msra.mxu1 %v3247_v25  ;;  %2798 = vmatprep.mubr.msk.f32.mxu1 %vm3124_vm1, %v3123_v0 }
 0x576   :  { %2766 = vmatmul.mubr.msk.f32.vlgmr.msra.gmra.mxu0 %vm35_vm0, %v2519_v34  ;;  %2792 = vmatprep.subr.mxu1 %v3123_v0 }
 0x577   :  { %2780 = vmatpush3.msra.mxu0 %v3182_v1  ;;  %v479_v35 = vpop.permute.xlu1 %478  ;;  %2787 = vmatprep.mubr.msk.f32.mxu0 %vm3124_vm1, %v3123_v0 }
 0x578   :  { %2781 = vmatprep.subr.mxu0 %v3123_v0  ;;  %481 = vst.msk [vmem:[%s3988_s9] sm:$0xff] %vm35_vm0, %v479_v35  ;;  %2793 = vmatpush3.msra.mxu1 %v3252_v26 }
 0x579   :  { %2782 = vmatpush3.msra.mxu0 %v3187_v2  ;;  %2794 = vmatprep.subr.mxu1 %v3123_v0  ;;  %v2522_v49 = vld [vmem:[%s3988_s9 + $0x8] sm:$0xff] }
 0x57a   :  { %2783 = vmatprep.subr.mxu0 %v3123_v0  ;;  %2795 = vmatpush3.msra.mxu1 %v3275_v29 }
 0x57b   :  { %2784 = vmatpush3.msra.mxu0 %v3200_v4  ;;  %v672_v36 = vld [vmem:[%s3986_s8] sm:$0xff]  ;;  %2796 = vmatprep.subr.mxu1 %v3123_v0 }
 0x57c   :  { %2785 = vmatprep.subr.mxu0 %v3123_v0  ;;  %2797 = vmatpush3.msra.mxu1 %v3289_v31 }
 0x57d   :  { %2786 = vmatpush3.msra.mxu0 %v3213_v5  ;;  %2812 = vmatprep.subr.mxu1 %v3123_v0 }
 0x57e   :  { %2788 = vmatmul.mubr.msk.f32.vlgmr.msra.gmra.mxu0 %vm35_vm0, %v672_v36  ;;  %2801 = vmatprep.subr.mxu0 %v3123_v0 }
 0x57f   :  { %2802 = vmatpush3.msra.mxu0 %v3257_v27  ;;  %2809 = vmatprep.mubr.msk.f32.mxu0 %vm3124_vm1, %v3123_v0  ;;  %v747_v51 = vld [vmem:[%s3988_s9] sm:$0xff] }
 0x580   :  { %2803 = vmatprep.subr.mxu0 %v3123_v0 }
 0x581   :  { %2804 = vmatpush3.msra.mxu0 %v3268_v28 }
 0x582   :  { %2805 = vmatprep.subr.mxu0 %v3123_v0 }
 0x583   :  { %2806 = vmatpush3.msra.mxu0 %v3280_v30 }
 0x584   :  { %2807 = vmatprep.subr.mxu0 %v3123_v0 }
 0x585   :  { %2808 = vmatpush3.msra.mxu0 %v3294_v32 }
 0x586   :  { %2823 = vmatprep.subr.mxu0 %v3123_v0 }
 0x634   :  { %v624_v37 = vpop.f32.mrf.mxu1 }
 0x636   :  { %v552_v38 = vpop.f32.mrf.mxu0  ;;  %v2778_v39 = vpop.f32.mrf.mxu1 }
 0x637   :  { %v625_v40 = vadd.f32 %v624_v37, %v552_v38  ;;  %v2538_v39 = vld [vmem:[%s3989_s0 + $0x18] sm:$0xff] }
 0x638   :  { %v2767_v41 = vpop.f32.mrf.mxu0 }
 0x639   :  { %v628_v42 = vadd.f32 %v3364_v43, %v625_v40 }
 0x63b   :  { %3006 = vtanh.f32 %v628_v42  ;;  %v2523_v52 = vmul.f32 -1.442695, %v628_v42 }
 0x63e   :  { %v742_v45 = vpop.f32.mrf.mxu0 }
 0x63f   :  { %v746_v46 = vadd.f32 %v2527_v44, %v742_v45 }
 0x640   :  { %v2789_v47 = vpop.f32.mrf.mxu0 }
 0x641   :  { %3008 = vtanh.f32 %v746_v46  ;;  %v2529_v53 = vmul.f32 -1.442695, %v746_v46 }
 0x642   :  { %3010 = vpow2.f32 %v2523_v52 }
 0x643   :  { %3012 = vpow2.f32 %v2529_v53 }
 0x648   :  { %v3007_v48 = vpop.eup %3006 }
 0x649   :  { %643 = vrot.lane.b32.xlu0 %v3007_v48, %s3125_s29 }
 0x64d   :  { %638 = vrot.lane.b32.xlu0 %v2522_v49, %s3126_s11 }
 0x64e   :  { %v3009_v50 = vpop.eup %3008 }
 0x64f   :  { %761 = vrot.lane.b32.xlu1 %v3009_v50, %s3125_s29  ;;  %v3011_v54 = vpop.eup %3010 }
 0x650   :  { %v633_v55 = vadd.f32 1.0, %v3011_v54  ;;  %v3013_v56 = vpop.eup %3012 }
 0x651   :  { %756 = vrot.lane.b32.xlu0 %v747_v51, %s3126_s11  ;;  %v751_v57 = vadd.f32 1.0, %v3013_v56 }
 0x652   :  { %3014 = vrcp.f32 %v633_v55 }
 0x653   :  { %3016 = vrcp.f32 %v751_v57 }
 0x65f   :  { %v3015_v58 = vpop.eup %3014 }
 0x660   :  { %v3017_v61 = vpop.eup %3016 }
 0x6bb   :  { %v644_v59 = vpop.permute.xlu0 %643 }
 0x6bc   :  { %v646_v60 = vmul.f32 %v3015_v58, %v644_v59 }
 0x6be   :  { %648 = vrot.lane.b32.xlu1 %v646_v60, %s3126_s11 }
 0x6bf   :  { %v639_v3 = vpop.permute.xlu0 %638 }
 0x6c0   :  { %v641_v6 = vmul.f32 %v3015_v58, %v639_v3 }
 0x6c1   :  { %v762_v62 = vpop.permute.xlu1 %761 }
 0x6c2   :  { %v764_v63 = vmul.f32 %v3017_v61, %v762_v62 }
 0x6c3   :  { %v757_v9 = vpop.permute.xlu0 %756 }
 0x6c4   :  { %766 = vrot.lane.b32.xlu1 %v764_v63, %s3126_s11  ;;  %v759_v10 = vmul.f32 %v3017_v61, %v757_v9 }
 0x730   :  { %v649_v7 = vpop.permute.xlu1 %648 }
 0x731   :  { %v651_v8 = vadd.f32 %v649_v7, %v641_v6 }
 0x733   :  { %3018 = vtanh.f32 %v651_v8 }
 0x736   :  { %v767_v11 = vpop.permute.xlu1 %766 }
 0x737   :  { %v769_v12 = vadd.f32 %v767_v11, %v759_v10 }
 0x739   :  { %3020 = vtanh.f32 %v769_v12 }
 0x740   :  { %v3019_v13 = vpop.eup %3018 }
 0x741   :  { %654 = vrot.lane.b32.xlu0 %v3019_v13, %s3125_s29 }
 0x746   :  { %v3021_v14 = vpop.eup %3020 }
 0x747   :  { %772 = vrot.lane.b32.xlu1 %v3021_v14, %s3125_s29 }
 0x7b3   :  { %v655_v15 = vpop.permute.xlu0 %654 }
 0x7b4   :  { %v657_v16 = vmul.f32 %v3015_v58, %v655_v15 }
 0x7b6   :  { %659 = vrot.lane.b32.xlu0 %v657_v16, %s3126_s11 }
 0x7b9   :  { %v773_v17 = vpop.permute.xlu1 %772 }
 0x7ba   :  { %v775_v18 = vmul.f32 %v3017_v61, %v773_v17  ;;  %664 = vrot.lane.b32.xlu0 %v651_v8, %s3127_s14 }
 0x7bc   :  { %777 = vrot.lane.b32.xlu1 %v775_v18, %s3126_s11 }
 0x7c0   :  { %782 = vrot.lane.b32.xlu1 %v769_v12, %s3127_s14 }
 0x828   :  { %v660_v19 = vpop.permute.xlu0 %659 }
 0x829   :  { %2524 = vst.msk [vmem:[%s3986_s8 + $0x8] sm:$0xff] %vm35_vm0, %v660_v19  ;;  %2526 = vst.msk [vmem:[%s3993_s7 + $0x8] sm:$0xff] %vm35_vm0, %v660_v19 }
 0x82c   :  { %v665_v20 = vpop.permute.xlu0 %664 }
 0x82d   :  { %2525 = vst.msk [vmem:[%s3988_s9 + $0x8] sm:$0xff] %vm35_vm0, %v665_v20 }
 0x82e   :  { %v778_v21 = vpop.permute.xlu1 %777 }
 0x82f   :  { %780 = vst.msk [vmem:[%s3986_s8] sm:$0xff] %vm35_vm0, %v778_v21  ;;  %2810 = vmatmul.mubr.msk.f32.vlgmr.msra.gmra.mxu0 %vm35_vm0, %v778_v21 }
 0x830   :  { %v2530_v22 = vld [vmem:[%s3986_s8 + $0x8] sm:$0xff]  ;;  %2824 = vmatpush3.msra.mxu0 %v3247_v25  ;;  %2831 = vmatprep.mubr.msk.f32.mxu0 %vm3124_vm1, %v3123_v0 }
 0x831   :  { %2799 = vmatmul.mubr.msk.f32.vlgmr.msra.gmra.mxu1 %vm35_vm0, %v2530_v22  ;;  %2825 = vmatprep.subr.mxu0 %v3123_v0 }
 0x832   :  { %2813 = vmatpush3.msra.mxu1 %v3182_v1  ;;  %v783_v23 = vpop.permute.xlu1 %782  ;;  %2820 = vmatprep.mubr.msk.f32.mxu1 %vm3124_vm1, %v3123_v0 }
 0x833   :  { %785 = vst.msk [vmem:[%s3988_s9] sm:$0xff] %vm35_vm0, %v783_v23  ;;  %2814 = vmatprep.subr.mxu1 %v3123_v0  ;;  %2826 = vmatpush3.msra.mxu0 %v3252_v26 }
 0x834   :  { %2815 = vmatpush3.msra.mxu1 %v3187_v2  ;;  %2827 = vmatprep.subr.mxu0 %v3123_v0  ;;  %v2533_v45 = vld [vmem:[%s3988_s9 + $0x8] sm:$0xff] }
 0x835   :  { %2816 = vmatprep.subr.mxu1 %v3123_v0  ;;  %2828 = vmatpush3.msra.mxu0 %v3275_v29 }
 0x836   :  { %2817 = vmatpush3.msra.mxu1 %v3200_v4  ;;  %2829 = vmatprep.subr.mxu0 %v3123_v0  ;;  %v976_v24 = vld [vmem:[%s3986_s8] sm:$0xff] }
 0x837   :  { %2818 = vmatprep.subr.mxu1 %v3123_v0  ;;  %2830 = vmatpush3.msra.mxu0 %v3289_v31 }
 0x838   :  { %2819 = vmatpush3.msra.mxu1 %v3213_v5  ;;  %2845 = vmatprep.subr.mxu0 %v3123_v0 }
 0x839   :  { %2821 = vmatmul.mubr.msk.f32.vlgmr.msra.gmra.mxu1 %vm35_vm0, %v976_v24  ;;  %2834 = vmatprep.subr.mxu1 %v3123_v0 }
 0x83a   :  { %2835 = vmatpush3.msra.mxu1 %v3257_v27  ;;  %2842 = vmatprep.mubr.msk.f32.mxu1 %vm3124_vm1, %v3123_v0  ;;  %v1051_v47 = vld [vmem:[%s3988_s9] sm:$0xff] }
 0x83b   :  { %2836 = vmatprep.subr.mxu1 %v3123_v0 }
 0x83c   :  { %2837 = vmatpush3.msra.mxu1 %v3268_v28 }
 0x83d   :  { %2838 = vmatprep.subr.mxu1 %v3123_v0 }
 0x83e   :  { %2839 = vmatpush3.msra.mxu1 %v3280_v30 }
 0x83f   :  { %2840 = vmatprep.subr.mxu1 %v3123_v0 }
 0x840   :  { %2841 = vmatpush3.msra.mxu1 %v3294_v32 }
 0x841   :  { %2856 = vmatprep.subr.mxu1 %v3123_v0 }
 0x8ef   :  { %v928_v33 = vpop.f32.mrf.mxu0 }
 0x8f1   :  { %v2811_v34 = vpop.f32.mrf.mxu0  ;;  %v856_v35 = vpop.f32.mrf.mxu1 }
 0x8f2   :  { %v929_v36 = vadd.f32 %v928_v33, %v856_v35  ;;  %v2549_v35 = vld [vmem:[%s3989_s0 + $0x20] sm:$0xff] }
 0x8f3   :  { %v2800_v37 = vpop.f32.mrf.mxu1 }
 0x8f4   :  { %v932_v38 = vadd.f32 %v3364_v43, %v929_v36 }
 0x8f6   :  { %3022 = vtanh.f32 %v932_v38  ;;  %v2534_v48 = vmul.f32 -1.442695, %v932_v38 }
 0x8f9   :  { %v1046_v40 = vpop.f32.mrf.mxu1 }
 0x8fa   :  { %v1050_v41 = vadd.f32 %v2538_v39, %v1046_v40 }
 0x8fb   :  { %v2822_v42 = vpop.f32.mrf.mxu1 }
 0x8fc   :  { %3024 = vtanh.f32 %v1050_v41  ;;  %v2540_v49 = vmul.f32 -1.442695, %v1050_v41 }
 0x8fd   :  { %3026 = vpow2.f32 %v2534_v48 }
 0x8fe   :  { %3028 = vpow2.f32 %v2540_v49 }
 0x903   :  { %v3023_v44 = vpop.eup %3022 }
 0x904   :  { %947 = vrot.lane.b32.xlu0 %v3023_v44, %s3125_s29 }
 0x908   :  { %942 = vrot.lane.b32.xlu0 %v2533_v45, %s3126_s11 }
 0x909   :  { %v3025_v46 = vpop.eup %3024 }
 0x90a   :  { %1065 = vrot.lane.b32.xlu1 %v3025_v46, %s3125_s29  ;;  %v3027_v50 = vpop.eup %3026 }
 0x90b   :  { %v937_v51 = vadd.f32 1.0, %v3027_v50  ;;  %v3029_v52 = vpop.eup %3028 }
 0x90c   :  { %1060 = vrot.lane.b32.xlu0 %v1051_v47, %s3126_s11  ;;  %v1055_v53 = vadd.f32 1.0, %v3029_v52 }
 0x90d   :  { %3030 = vrcp.f32 %v937_v51 }
 0x90e   :  { %3032 = vrcp.f32 %v1055_v53 }
 0x91a   :  { %v3031_v54 = vpop.eup %3030 }
 0x91b   :  { %v3033_v57 = vpop.eup %3032 }
 0x976   :  { %v948_v55 = vpop.permute.xlu0 %947 }
 0x977   :  { %v950_v56 = vmul.f32 %v3031_v54, %v948_v55 }
 0x979   :  { %952 = vrot.lane.b32.xlu1 %v950_v56, %s3126_s11 }
 0x97a   :  { %v943_v60 = vpop.permute.xlu0 %942 }
 0x97b   :  { %v945_v61 = vmul.f32 %v3031_v54, %v943_v60 }
 0x97c   :  { %v1066_v58 = vpop.permute.xlu1 %1065 }
 0x97d   :  { %v1068_v59 = vmul.f32 %v3033_v57, %v1066_v58 }
 0x97e   :  { %v1061_v3 = vpop.permute.xlu0 %1060 }
 0x97f   :  { %1070 = vrot.lane.b32.xlu1 %v1068_v59, %s3126_s11  ;;  %v1063_v6 = vmul.f32 %v3033_v57, %v1061_v3 }
 0x9eb   :  { %v953_v62 = vpop.permute.xlu1 %952 }
 0x9ec   :  { %v955_v63 = vadd.f32 %v953_v62, %v945_v61 }
 0x9ee   :  { %3034 = vtanh.f32 %v955_v63 }
 0x9f1   :  { %v1071_v7 = vpop.permute.xlu1 %1070 }
 0x9f2   :  { %v1073_v8 = vadd.f32 %v1071_v7, %v1063_v6 }
 0x9f4   :  { %3036 = vtanh.f32 %v1073_v8 }
 0x9fb   :  { %v3035_v9 = vpop.eup %3034 }
 0x9fc   :  { %958 = vrot.lane.b32.xlu0 %v3035_v9, %s3125_s29 }
 0xa01   :  { %v3037_v10 = vpop.eup %3036 }
 0xa02   :  { %1076 = vrot.lane.b32.xlu1 %v3037_v10, %s3125_s29 }
 0xa6e   :  { %v959_v11 = vpop.permute.xlu0 %958 }
 0xa6f   :  { %v961_v12 = vmul.f32 %v3031_v54, %v959_v11 }
 0xa71   :  { %963 = vrot.lane.b32.xlu0 %v961_v12, %s3126_s11 }
 0xa74   :  { %v1077_v13 = vpop.permute.xlu1 %1076 }
 0xa75   :  { %v1079_v14 = vmul.f32 %v3033_v57, %v1077_v13  ;;  %968 = vrot.lane.b32.xlu0 %v955_v63, %s3127_s14 }
 0xa77   :  { %1081 = vrot.lane.b32.xlu1 %v1079_v14, %s3126_s11 }
 0xa7b   :  { %1086 = vrot.lane.b32.xlu1 %v1073_v8, %s3127_s14 }
 0xae3   :  { %v964_v15 = vpop.permute.xlu0 %963 }
 0xae4   :  { %2535 = vst.msk [vmem:[%s3986_s8 + $0x8] sm:$0xff] %vm35_vm0, %v964_v15  ;;  %2537 = vst.msk [vmem:[%s3993_s7 + $0x10] sm:$0xff] %vm35_vm0, %v964_v15 }
 0xae7   :  { %v969_v16 = vpop.permute.xlu0 %968 }
 0xae8   :  { %2536 = vst.msk [vmem:[%s3988_s9 + $0x8] sm:$0xff] %vm35_vm0, %v969_v16 }
 0xae9   :  { %v1082_v17 = vpop.permute.xlu1 %1081 }
 0xaea   :  { %1084 = vst.msk [vmem:[%s3986_s8] sm:$0xff] %vm35_vm0, %v1082_v17  ;;  %2843 = vmatmul.mubr.msk.f32.vlgmr.msra.gmra.mxu1 %vm35_vm0, %v1082_v17 }
 0xaeb   :  { %v2541_v18 = vld [vmem:[%s3986_s8 + $0x8] sm:$0xff]  ;;  %2857 = vmatpush3.msra.mxu1 %v3247_v25  ;;  %2864 = vmatprep.mubr.msk.f32.mxu1 %vm3124_vm1, %v3123_v0 }
 0xaec   :  { %2832 = vmatmul.mubr.msk.f32.vlgmr.msra.gmra.mxu0 %vm35_vm0, %v2541_v18  ;;  %2858 = vmatprep.subr.mxu1 %v3123_v0 }
 0xaed   :  { %2846 = vmatpush3.msra.mxu0 %v3182_v1  ;;  %v1087_v19 = vpop.permute.xlu1 %1086  ;;  %2853 = vmatprep.mubr.msk.f32.mxu0 %vm3124_vm1, %v3123_v0 }
 0xaee   :  { %1089 = vst.msk [vmem:[%s3988_s9] sm:$0xff] %vm35_vm0, %v1087_v19  ;;  %2847 = vmatprep.subr.mxu0 %v3123_v0  ;;  %2859 = vmatpush3.msra.mxu1 %v3252_v26 }
 0xaef   :  { %2848 = vmatpush3.msra.mxu0 %v3187_v2  ;;  %2860 = vmatprep.subr.mxu1 %v3123_v0  ;;  %v2544_v40 = vld [vmem:[%s3988_s9 + $0x8] sm:$0xff] }
 0xaf0   :  { %2849 = vmatprep.subr.mxu0 %v3123_v0  ;;  %2861 = vmatpush3.msra.mxu1 %v3275_v29 }
 0xaf1   :  { %2850 = vmatpush3.msra.mxu0 %v3200_v4  ;;  %2862 = vmatprep.subr.mxu1 %v3123_v0  ;;  %v1280_v20 = vld [vmem:[%s3986_s8] sm:$0xff] }
 0xaf2   :  { %2851 = vmatprep.subr.mxu0 %v3123_v0  ;;  %2863 = vmatpush3.msra.mxu1 %v3289_v31 }
 0xaf3   :  { %2852 = vmatpush3.msra.mxu0 %v3213_v5  ;;  %2878 = vmatprep.subr.mxu1 %v3123_v0 }
 0xaf4   :  { %2854 = vmatmul.mubr.msk.f32.vlgmr.msra.gmra.mxu0 %vm35_vm0, %v1280_v20  ;;  %2867 = vmatprep.subr.mxu0 %v3123_v0 }
 0xaf5   :  { %2868 = vmatpush3.msra.mxu0 %v3257_v27  ;;  %2875 = vmatprep.mubr.msk.f32.mxu0 %vm3124_vm1, %v3123_v0  ;;  %v1355_v42 = vld [vmem:[%s3988_s9] sm:$0xff] }
 0xaf6   :  { %2869 = vmatprep.subr.mxu0 %v3123_v0 }
 0xaf7   :  { %2870 = vmatpush3.msra.mxu0 %v3268_v28 }
 0xaf8   :  { %2871 = vmatprep.subr.mxu0 %v3123_v0 }
 0xaf9   :  { %2872 = vmatpush3.msra.mxu0 %v3280_v30 }
 0xafa   :  { %2873 = vmatprep.subr.mxu0 %v3123_v0 }
 0xafb   :  { %2874 = vmatpush3.msra.mxu0 %v3294_v32 }
 0xafc   :  { %2889 = vmatprep.subr.mxu0 %v3123_v0 }
 0xbaa   :  { %v1232_v21 = vpop.f32.mrf.mxu1 }
 0xbac   :  { %v2844_v22 = vpop.f32.mrf.mxu1  ;;  %v1160_v23 = vpop.f32.mrf.mxu0 }
 0xbad   :  { %v1233_v24 = vadd.f32 %v1232_v21, %v1160_v23 }
 0xbae   :  { %v2833_v33 = vpop.f32.mrf.mxu0 }
 0xbaf   :  { %v1236_v34 = vadd.f32 %v3364_v43, %v1233_v24 }
 0xbb1   :  { %3038 = vtanh.f32 %v1236_v34  ;;  %v2545_v44 = vmul.f32 -1.442695, %v1236_v34 }
 0xbb4   :  { %v1350_v36 = vpop.f32.mrf.mxu0 }
 0xbb5   :  { %v1354_v37 = vadd.f32 %v2549_v35, %v1350_v36 }
 0xbb6   :  { %v2855_v38 = vpop.f32.mrf.mxu0 }
 0xbb7   :  { %3040 = vtanh.f32 %v1354_v37  ;;  %v2551_v45 = vmul.f32 -1.442695, %v1354_v37 }
 0xbb8   :  { %3042 = vpow2.f32 %v2545_v44 }
 0xbb9   :  { %3044 = vpow2.f32 %v2551_v45 }
 0xbbe   :  { %v3039_v39 = vpop.eup %3038 }
 0xbbf   :  { %1251 = vrot.lane.b32.xlu0 %v3039_v39, %s3125_s29 }
 0xbc3   :  { %1246 = vrot.lane.b32.xlu0 %v2544_v40, %s3126_s11 }
 0xbc4   :  { %v3041_v41 = vpop.eup %3040 }
 0xbc5   :  { %1369 = vrot.lane.b32.xlu1 %v3041_v41, %s3125_s29  ;;  %v3043_v46 = vpop.eup %3042 }
 0xbc6   :  { %v1241_v47 = vadd.f32 1.0, %v3043_v46  ;;  %v3045_v48 = vpop.eup %3044 }
 0xbc7   :  { %1364 = vrot.lane.b32.xlu0 %v1355_v42, %s3126_s11  ;;  %v1359_v49 = vadd.f32 1.0, %v3045_v48 }
 0xbc8   :  { %3046 = vrcp.f32 %v1241_v47 }
 0xbc9   :  { %3048 = vrcp.f32 %v1359_v49 }
 0xbd5   :  { %v3047_v50 = vpop.eup %3046 }
 0xbd6   :  { %v3049_v53 = vpop.eup %3048 }
 0xc31   :  { %v1252_v51 = vpop.permute.xlu0 %1251 }
 0xc32   :  { %v1254_v52 = vmul.f32 %v3047_v50, %v1252_v51 }
 0xc34   :  { %1256 = vrot.lane.b32.xlu1 %v1254_v52, %s3126_s11 }
 0xc35   :  { %v1247_v56 = vpop.permute.xlu0 %1246 }
 0xc36   :  { %v1249_v57 = vmul.f32 %v3047_v50, %v1247_v56 }
 0xc37   :  { %v1370_v54 = vpop.permute.xlu1 %1369 }
 0xc38   :  { %v1372_v55 = vmul.f32 %v3049_v53, %v1370_v54 }
 0xc39   :  { %v1365_v60 = vpop.permute.xlu0 %1364 }
 0xc3a   :  { %1374 = vrot.lane.b32.xlu1 %v1372_v55, %s3126_s11  ;;  %v1367_v61 = vmul.f32 %v3049_v53, %v1365_v60 }
 0xca6   :  { %v1257_v58 = vpop.permute.xlu1 %1256 }
 0xca7   :  { %v1259_v59 = vadd.f32 %v1257_v58, %v1249_v57  ;;  %v3735_v58 = vld [vmem:[%s3990_s5 + $0x18] sm:$0xff] }
 0xca9   :  { %3050 = vtanh.f32 %v1259_v59 }
 0xcac   :  { %v1375_v62 = vpop.permute.xlu1 %1374 }
 0xcad   :  { %v1377_v63 = vadd.f32 %v1375_v62, %v1367_v61  ;;  %v3758_v61 = vld [vmem:[%s3990_s5 + $0x10] sm:$0xff] }
 0xcae   :  { %v3764_v62 = vld [vmem:[%s3984_s3 + $0x10] sm:$0xff] }
 0xcaf   :  { %3052 = vtanh.f32 %v1377_v63 }
 0xcb6   :  { %v3051_v3 = vpop.eup %3050 }
 0xcb7   :  { %1262 = vrot.lane.b32.xlu0 %v3051_v3, %s3125_s29  ;;  %v3778_v3 = vld [vmem:[%s3984_s3 + $0x8] sm:$0xff] }
 0xcbc   :  { %v3053_v6 = vpop.eup %3052 }
 0xcbd   :  { %1380 = vrot.lane.b32.xlu1 %v3053_v6, %s3125_s29  ;;  %v3786_v6 = vld [vmem:[%s3990_s5] sm:$0xff] }
 0xd29   :  { %v1263_v7 = vpop.permute.xlu0 %1262 }
 0xd2a   :  { %v1265_v8 = vmul.f32 %v3047_v50, %v1263_v7  ;;  %v3792_v7 = vld [vmem:[%s3984_s3] sm:$0xff] }
 0xd2c   :  { %1267 = vrot.lane.b32.xlu0 %v1265_v8, %s3126_s11 }
 0xd2f   :  { %v1381_v9 = vpop.permute.xlu1 %1380 }
 0xd30   :  { %v1383_v10 = vmul.f32 %v3049_v53, %v1381_v9  ;;  %1272 = vrot.lane.b32.xlu0 %v1259_v59, %s3127_s14  ;;  %v3745_v59 = vld [vmem:[%s3984_s3 + $0x18] sm:$0xff] }
 0xd31   :  { %v3804_v9 = vld [vmem:[%s3991_s4 + $0x18] sm:$0xff] }
 0xd32   :  { %1385 = vrot.lane.b32.xlu1 %v1383_v10, %s3126_s11  ;;  %v3813_v10 = vld [vmem:[%s3991_s4 + $0x10] sm:$0xff] }
 0xd36   :  { %1390 = vrot.lane.b32.xlu1 %v1377_v63, %s3127_s14  ;;  %v3772_v63 = vld [vmem:[%s3990_s5 + $0x8] sm:$0xff] }
 0xd9e   :  { %v1268_v11 = vpop.permute.xlu0 %1267 }
 0xd9f   :  { %2546 = vst.msk [vmem:[%s3986_s8 + $0x8] sm:$0xff] %vm35_vm0, %v1268_v11  ;;  %2548 = vst.msk [vmem:[%s3993_s7 + $0x18] sm:$0xff] %vm35_vm0, %v1268_v11  ;;  %v3820_v11 = vld [vmem:[%s3991_s4 + $0x8] sm:$0xff] }
 0xda2   :  { %v1273_v12 = vpop.permute.xlu0 %1272 }
 0xda3   :  { %2547 = vst.msk [vmem:[%s3988_s9 + $0x8] sm:$0xff] %vm35_vm0, %v1273_v12  ;;  %v3827_v12 = vld [vmem:[%s3991_s4] sm:$0xff] }
 0xda4   :  { %v1386_v13 = vpop.permute.xlu1 %1385 }
 0xda5   :  { %1388 = vst.msk [vmem:[%s3986_s8] sm:$0xff] %vm35_vm0, %v1386_v13  ;;  %2876 = vmatmul.mubr.msk.f32.vlgmr.msra.gmra.mxu0 %vm35_vm0, %v1386_v13 }
 0xda6   :  { %v2552_v14 = vld [vmem:[%s3986_s8 + $0x8] sm:$0xff]  ;;  %2890 = vmatpush3.msra.mxu0 %v3247_v25  ;;  %2897 = vmatprep.mubr.msk.f32.mxu0 %vm3124_vm1, %v3123_v0 }
 0xda7   :  { %2865 = vmatmul.mubr.msk.f32.vlgmr.msra.gmra.mxu1 %vm35_vm0, %v2552_v14  ;;  %2891 = vmatprep.subr.mxu0 %v3123_v0 }
 0xda8   :  { %2879 = vmatpush3.msra.mxu1 %v3182_v1  ;;  %v1391_v15 = vpop.permute.xlu1 %1390  ;;  %2886 = vmatprep.mubr.msk.f32.mxu1 %vm3124_vm1, %v3123_v0 }
 0xda9   :  { %1393 = vst.msk [vmem:[%s3988_s9] sm:$0xff] %vm35_vm0, %v1391_v15  ;;  %2880 = vmatprep.subr.mxu1 %v3123_v0  ;;  %2892 = vmatpush3.msra.mxu0 %v3252_v26 }
 0xdaa   :  { %2881 = vmatpush3.msra.mxu1 %v3187_v2  ;;  %2893 = vmatprep.subr.mxu0 %v3123_v0 }
 0xdab   :  { %2882 = vmatprep.subr.mxu1 %v3123_v0  ;;  %2894 = vmatpush3.msra.mxu0 %v3275_v29 }
 0xdac   :  { %2883 = vmatpush3.msra.mxu1 %v3200_v4  ;;  %2895 = vmatprep.subr.mxu0 %v3123_v0  ;;  %v1584_v1 = vld [vmem:[%s3986_s8] sm:$0xff] }
 0xdad   :  { %2884 = vmatprep.subr.mxu1 %v3123_v0  ;;  %2896 = vmatpush3.msra.mxu0 %v3289_v31 }
 0xdae   :  { %2885 = vmatpush3.msra.mxu1 %v3213_v5  ;;  %2911 = vmatprep.subr.mxu0 %v3123_v0 }
 0xdaf   :  { %2887 = vmatmul.mubr.msk.f32.vlgmr.msra.gmra.mxu1 %vm35_vm0, %v1584_v1  ;;  %2900 = vmatprep.subr.mxu1 %v3123_v0 }
 0xdb0   :  { %2901 = vmatpush3.msra.mxu1 %v3257_v27  ;;  %2908 = vmatprep.mubr.msk.f32.mxu1 %vm3124_vm1, %v3123_v0  ;;  %v1659_v18 = vld [vmem:[%s3988_s9] sm:$0xff] }
 0xdb1   :  { %2902 = vmatprep.subr.mxu1 %v3123_v0 }
 0xdb2   :  { %2903 = vmatpush3.msra.mxu1 %v3268_v28  ;;  %v2560_v28 = vld [vmem:[%s3989_s0 + $0x28] sm:$0xff] }
 0xdb3   :  { %2904 = vmatprep.subr.mxu1 %v3123_v0 }
 0xdb4   :  { %2905 = vmatpush3.msra.mxu1 %v3280_v30 }
 0xdb5   :  { %2906 = vmatprep.subr.mxu1 %v3123_v0 }
 0xdb6   :  { %2907 = vmatpush3.msra.mxu1 %v3294_v32  ;;  %v2555_v32 = vld [vmem:[%s3988_s9 + $0x8] sm:$0xff] }
 0xdb7   :  { %2922 = vmatprep.subr.mxu1 %v3123_v0 }
 0xe65   :  { %v1536_v2 = vpop.f32.mrf.mxu0 }
 0xe67   :  { %v2877_v4 = vpop.f32.mrf.mxu0  ;;  %v1464_v5 = vpop.f32.mrf.mxu1 }
 0xe68   :  { %v1537_v25 = vadd.f32 %v1536_v2, %v1464_v5  ;;  %v2571_v5 = vld [vmem:[%s3989_s0 + $0x30] sm:$0xff] }
 0xe69   :  { %v2866_v26 = vpop.f32.mrf.mxu1 }
 0xe6a   :  { %v1540_v27 = vadd.f32 %v3364_v43, %v1537_v25 }
 0xe6c   :  { %3054 = vtanh.f32 %v1540_v27  ;;  %v2556_v19 = vmul.f32 -1.442695, %v1540_v27 }
 0xe6f   :  { %v1654_v29 = vpop.f32.mrf.mxu1 }
 0xe70   :  { %v1658_v30 = vadd.f32 %v2560_v28, %v1654_v29 }
 0xe71   :  { %v2888_v31 = vpop.f32.mrf.mxu1 }
 0xe72   :  { %3056 = vtanh.f32 %v1658_v30  ;;  %v2562_v20 = vmul.f32 -1.442695, %v1658_v30 }
 0xe73   :  { %3058 = vpow2.f32 %v2556_v19 }
 0xe74   :  { %3060 = vpow2.f32 %v2562_v20 }
 0xe79   :  { %v3055_v16 = vpop.eup %3054 }
 0xe7a   :  { %1555 = vrot.lane.b32.xlu0 %v3055_v16, %s3125_s29 }
 0xe7e   :  { %1550 = vrot.lane.b32.xlu0 %v2555_v32, %s3126_s11 }
 0xe7f   :  { %v3057_v17 = vpop.eup %3056 }
 0xe80   :  { %1673 = vrot.lane.b32.xlu1 %v3057_v17, %s3125_s29  ;;  %v3059_v21 = vpop.eup %3058 }
 0xe81   :  { %v1545_v22 = vadd.f32 1.0, %v3059_v21  ;;  %v3061_v23 = vpop.eup %3060 }
 0xe82   :  { %1668 = vrot.lane.b32.xlu0 %v1659_v18, %s3126_s11  ;;  %v1663_v24 = vadd.f32 1.0, %v3061_v23 }
 0xe83   :  { %3062 = vrcp.f32 %v1545_v22 }
 0xe84   :  { %3064 = vrcp.f32 %v1663_v24 }
 0xe90   :  { %v3063_v33 = vpop.eup %3062 }
 0xe91   :  { %v3065_v36 = vpop.eup %3064 }
 0xeec   :  { %v1556_v34 = vpop.permute.xlu0 %1555 }
 0xeed   :  { %v1558_v35 = vmul.f32 %v3063_v33, %v1556_v34 }
 0xeef   :  { %1560 = vrot.lane.b32.xlu1 %v1558_v35, %s3126_s11 }
 0xef0   :  { %v1551_v39 = vpop.permute.xlu0 %1550 }
 0xef1   :  { %v1553_v40 = vmul.f32 %v3063_v33, %v1551_v39 }
 0xef2   :  { %v1674_v37 = vpop.permute.xlu1 %1673 }
 0xef3   :  { %v1676_v38 = vmul.f32 %v3065_v36, %v1674_v37 }
 0xef4   :  { %v1669_v44 = vpop.permute.xlu0 %1668 }
 0xef5   :  { %1678 = vrot.lane.b32.xlu1 %v1676_v38, %s3126_s11  ;;  %v1671_v45 = vmul.f32 %v3065_v36, %v1669_v44 }
 0xf61   :  { %v1561_v41 = vpop.permute.xlu1 %1560 }
 0xf62   :  { %v1563_v42 = vadd.f32 %v1561_v41, %v1553_v40 }
 0xf64   :  { %3066 = vtanh.f32 %v1563_v42 }
 0xf67   :  { %v1679_v46 = vpop.permute.xlu1 %1678 }
 0xf68   :  { %v1681_v47 = vadd.f32 %v1679_v46, %v1671_v45 }
 0xf6a   :  { %3068 = vtanh.f32 %v1681_v47 }
 0xf71   :  { %v3067_v48 = vpop.eup %3066 }
 0xf72   :  { %1566 = vrot.lane.b32.xlu0 %v3067_v48, %s3125_s29 }
 0xf77   :  { %v3069_v49 = vpop.eup %3068 }
 0xf78   :  { %1684 = vrot.lane.b32.xlu1 %v3069_v49, %s3125_s29 }
 0xfe4   :  { %v1567_v50 = vpop.permute.xlu0 %1566 }
 0xfe5   :  { %v1569_v51 = vmul.f32 %v3063_v33, %v1567_v50 }
 0xfe7   :  { %1571 = vrot.lane.b32.xlu0 %v1569_v51, %s3126_s11 }
 0xfea   :  { %v1685_v52 = vpop.permute.xlu1 %1684 }
 0xfeb   :  { %v1687_v53 = vmul.f32 %v3065_v36, %v1685_v52  ;;  %1576 = vrot.lane.b32.xlu0 %v1563_v42, %s3127_s14 }
 0xfed   :  { %1689 = vrot.lane.b32.xlu1 %v1687_v53, %s3126_s11 }
 0xff1   :  { %1694 = vrot.lane.b32.xlu1 %v1681_v47, %s3127_s14 }
0x1059   :  { %v1572_v54 = vpop.permute.xlu0 %1571 }
0x105a   :  { %2557 = vst.msk [vmem:[%s3986_s8 + $0x8] sm:$0xff] %vm35_vm0, %v1572_v54  ;;  %2559 = vst.msk [vmem:[%s3993_s7 + $0x20] sm:$0xff] %vm35_vm0, %v1572_v54 }
0x105d   :  { %v1577_v55 = vpop.permute.xlu0 %1576 }
0x105e   :  { %2558 = vst.msk [vmem:[%s3988_s9 + $0x8] sm:$0xff] %vm35_vm0, %v1577_v55 }
0x105f   :  { %v1690_v56 = vpop.permute.xlu1 %1689 }
0x1060   :  { %1692 = vst.msk [vmem:[%s3986_s8] sm:$0xff] %vm35_vm0, %v1690_v56  ;;  %2909 = vmatmul.mubr.msk.f32.vlgmr.msra.gmra.mxu1 %vm35_vm0, %v1690_v56 }
0x1061   :  { %v2563_v57 = vld [vmem:[%s3986_s8 + $0x8] sm:$0xff]  ;;  %2923 = vmatpush3.msra.mxu1 %v3735_v58  ;;  %2930 = vmatprep.mubr.msk.f32.mxu1 %vm3124_vm1, %v3123_v0 }
0x1062   :  { %2898 = vmatmul.mubr.msk.f32.vlgmr.msra.gmra.mxu0 %vm35_vm0, %v2563_v57  ;;  %2924 = vmatprep.subr.mxu1 %v3123_v0 }
0x1063   :  { %2912 = vmatpush3.msra.mxu0 %v3745_v59  ;;  %v1695_v60 = vpop.permute.xlu1 %1694  ;;  %2919 = vmatprep.mubr.msk.f32.mxu0 %vm3124_vm1, %v3123_v0 }
0x1064   :  { %1697 = vst.msk [vmem:[%s3988_s9] sm:$0xff] %vm35_vm0, %v1695_v60  ;;  %2913 = vmatprep.subr.mxu0 %v3123_v0  ;;  %2925 = vmatpush3.msra.mxu1 %v3758_v61  ;;  %v3913_v60 = vld [vmem:[%s3992_s6] ss:$0 sm:$0xff] }
0x1065   :  { %2914 = vmatpush3.msra.mxu0 %v3764_v62  ;;  %2926 = vmatprep.subr.mxu1 %v3123_v0  ;;  %v2566_v29 = vld [vmem:[%s3988_s9 + $0x8] sm:$0xff] }
0x1066   :  { %2915 = vmatprep.subr.mxu0 %v3123_v0  ;;  %2927 = vmatpush3.msra.mxu1 %v3772_v63 }
0x1067   :  { %2916 = vmatpush3.msra.mxu0 %v3778_v3  ;;  %2928 = vmatprep.subr.mxu1 %v3123_v0  ;;  %v1888_v8 = vld [vmem:[%s3986_s8] sm:$0xff] }
0x1068   :  { %2917 = vmatprep.subr.mxu0 %v3123_v0  ;;  %2929 = vmatpush3.msra.mxu1 %v3786_v6 }
0x1069   :  { %2918 = vmatpush3.msra.mxu0 %v3792_v7  ;;  %2944 = vmatprep.subr.mxu1 %v3123_v0 }
0x106a   :  { %2920 = vmatmul.mubr.msk.f32.vlgmr.msra.gmra.mxu0 %vm35_vm0, %v1888_v8  ;;  %2933 = vmatprep.subr.mxu0 %v3123_v0 }
0x106b   :  { %2934 = vmatpush3.msra.mxu0 %v3804_v9  ;;  %2941 = vmatprep.mubr.msk.f32.mxu0 %vm3124_vm1, %v3123_v0 }
0x106c   :  { %2935 = vmatprep.subr.mxu0 %v3123_v0 }
0x106d   :  { %2936 = vmatpush3.msra.mxu0 %v3813_v10 }
0x106e   :  { %2937 = vmatprep.subr.mxu0 %v3123_v0 }
0x106f   :  { %2938 = vmatpush3.msra.mxu0 %v3820_v11 }
0x1070   :  { %2939 = vmatprep.subr.mxu0 %v3123_v0 }
0x1071   :  { %2940 = vmatpush3.msra.mxu0 %v3827_v12 }
0x1072   :  { %2955 = vmatprep.subr.mxu0 %v3123_v0 }
0x1120   :  { %v1840_v13 = vpop.f32.mrf.mxu1 }
0x1122   :  { %v2910_v14 = vpop.f32.mrf.mxu1  ;;  %v1768_v15 = vpop.f32.mrf.mxu0 }
0x1123   :  { %v1841_v1 = vadd.f32 %v1840_v13, %v1768_v15 }
0x1124   :  { %v2899_v2 = vpop.f32.mrf.mxu0 }
0x1125   :  { %v1844_v4 = vadd.f32 %v3364_v43, %v1841_v1  ;;  %v1963_v43 = vld [vmem:[%s3988_s9] sm:$0xff] }
0x1127   :  { %3070 = vtanh.f32 %v1844_v4  ;;  %v2567_v31 = vmul.f32 -1.442695, %v1844_v4 }
0x112a   :  { %v1958_v25 = vpop.f32.mrf.mxu0 }
0x112b   :  { %v1962_v26 = vadd.f32 %v2571_v5, %v1958_v25 }
0x112c   :  { %v2921_v27 = vpop.f32.mrf.mxu0 }
0x112d   :  { %3072 = vtanh.f32 %v1962_v26  ;;  %v2573_v16 = vmul.f32 -1.442695, %v1962_v26 }
0x112e   :  { %3074 = vpow2.f32 %v2567_v31 }
0x112f   :  { %3076 = vpow2.f32 %v2573_v16 }
0x1134   :  { %v3071_v28 = vpop.eup %3070 }
0x1135   :  { %1859 = vrot.lane.b32.xlu0 %v3071_v28, %s3125_s29 }
0x1139   :  { %1854 = vrot.lane.b32.xlu0 %v2566_v29, %s3126_s11 }
0x113a   :  { %v3073_v30 = vpop.eup %3072 }
0x113b   :  { %1977 = vrot.lane.b32.xlu1 %v3073_v30, %s3125_s29  ;;  %v3075_v32 = vpop.eup %3074 }
0x113c   :  { %v1849_v17 = vadd.f32 1.0, %v3075_v32  ;;  %v3077_v18 = vpop.eup %3076 }
0x113d   :  { %1972 = vrot.lane.b32.xlu0 %v1963_v43, %s3126_s11  ;;  %v1967_v19 = vadd.f32 1.0, %v3077_v18 }
0x113e   :  { %3078 = vrcp.f32 %v1849_v17 }
0x113f   :  { %3080 = vrcp.f32 %v1967_v19 }
0x114b   :  { %v3079_v20 = vpop.eup %3078 }
0x114c   :  { %v3081_v23 = vpop.eup %3080 }
0x11a7   :  { %v1860_v21 = vpop.permute.xlu0 %1859 }
0x11a8   :  { %v1862_v22 = vmul.f32 %v3079_v20, %v1860_v21 }
0x11aa   :  { %1864 = vrot.lane.b32.xlu1 %v1862_v22, %s3126_s11 }
0x11ab   :  { %v1855_v34 = vpop.permute.xlu0 %1854 }
0x11ac   :  { %v1857_v35 = vmul.f32 %v3079_v20, %v1855_v34 }
0x11ad   :  { %v1978_v24 = vpop.permute.xlu1 %1977 }
0x11ae   :  { %v1980_v33 = vmul.f32 %v3081_v23, %v1978_v24 }
0x11af   :  { %v1973_v38 = vpop.permute.xlu0 %1972 }
0x11b0   :  { %1982 = vrot.lane.b32.xlu1 %v1980_v33, %s3126_s11  ;;  %v1975_v39 = vmul.f32 %v3081_v23, %v1973_v38 }
0x121c   :  { %v1865_v36 = vpop.permute.xlu1 %1864 }
0x121d   :  { %v1867_v37 = vadd.f32 %v1865_v36, %v1857_v35 }
0x121f   :  { %3082 = vtanh.f32 %v1867_v37 }
0x1222   :  { %v1983_v40 = vpop.permute.xlu1 %1982 }
0x1223   :  { %v1985_v41 = vadd.f32 %v1983_v40, %v1975_v39 }
0x1225   :  { %3084 = vtanh.f32 %v1985_v41 }
0x122c   :  { %v3083_v42 = vpop.eup %3082 }
0x122d   :  { %1870 = vrot.lane.b32.xlu0 %v3083_v42, %s3125_s29 }
0x1232   :  { %v3085_v44 = vpop.eup %3084 }
0x1233   :  { %1988 = vrot.lane.b32.xlu1 %v3085_v44, %s3125_s29 }
0x129f   :  { %v1871_v45 = vpop.permute.xlu0 %1870 }
0x12a0   :  { %v1873_v46 = vmul.f32 %v3079_v20, %v1871_v45 }
0x12a2   :  { %1875 = vrot.lane.b32.xlu0 %v1873_v46, %s3126_s11 }
0x12a5   :  { %v1989_v47 = vpop.permute.xlu1 %1988 }
0x12a6   :  { %v1991_v48 = vmul.f32 %v3081_v23, %v1989_v47  ;;  %1880 = vrot.lane.b32.xlu0 %v1867_v37, %s3127_s14 }
0x12a8   :  { %1993 = vrot.lane.b32.xlu1 %v1991_v48, %s3126_s11 }
0x12ac   :  { %1998 = vrot.lane.b32.xlu1 %v1985_v41, %s3127_s14 }
0x1314   :  { %v1876_v49 = vpop.permute.xlu0 %1875 }
0x1315   :  { %2568 = vst.msk [vmem:[%s3986_s8 + $0x8] sm:$0xff] %vm35_vm0, %v1876_v49  ;;  %2570 = vst.msk [vmem:[%s3993_s7 + $0x28] sm:$0xff] %vm35_vm0, %v1876_v49 }
0x1318   :  { %v1881_v50 = vpop.permute.xlu0 %1880 }
0x1319   :  { %2569 = vst.msk [vmem:[%s3988_s9 + $0x8] sm:$0xff] %vm35_vm0, %v1881_v50 }
0x131a   :  { %v1994_v51 = vpop.permute.xlu1 %1993 }
0x131b   :  { %1996 = vst.msk [vmem:[%s3986_s8] sm:$0xff] %vm35_vm0, %v1994_v51  ;;  %2942 = vmatmul.mubr.msk.f32.vlgmr.msra.gmra.mxu0 %vm35_vm0, %v1994_v51 }
0x131c   :  { %v2574_v52 = vld [vmem:[%s3986_s8 + $0x8] sm:$0xff]  ;;  %2956 = vmatpush3.msra.mxu0 %v3735_v58  ;;  %2963 = vmatprep.mubr.msk.f32.mxu0 %vm3124_vm1, %v3123_v0 }
0x131d   :  { %2931 = vmatmul.mubr.msk.f32.vlgmr.msra.gmra.mxu1 %vm35_vm0, %v2574_v52  ;;  %2957 = vmatprep.subr.mxu0 %v3123_v0 }
0x131e   :  { %2945 = vmatpush3.msra.mxu1 %v3745_v59  ;;  %v1999_v53 = vpop.permute.xlu1 %1998  ;;  %2952 = vmatprep.mubr.msk.f32.mxu1 %vm3124_vm1, %v3123_v0 }
0x131f   :  { %2001 = vst.msk [vmem:[%s3988_s9] sm:$0xff] %vm35_vm0, %v1999_v53  ;;  %2946 = vmatprep.subr.mxu1 %v3123_v0  ;;  %2958 = vmatpush3.msra.mxu0 %v3758_v61 }
0x1320   :  { %2947 = vmatpush3.msra.mxu1 %v3764_v62  ;;  %2959 = vmatprep.subr.mxu0 %v3123_v0  ;;  %v2582_v62 = vld [vmem:[%s3989_s0 + $0x38] sm:$0xff] }
0x1321   :  { %2948 = vmatprep.subr.mxu1 %v3123_v0  ;;  %2960 = vmatpush3.msra.mxu0 %v3772_v63 }
0x1322   :  { %2949 = vmatpush3.msra.mxu1 %v3778_v3  ;;  %2961 = vmatprep.subr.mxu0 %v3123_v0  ;;  %v2192_v54 = vld [vmem:[%s3986_s8] sm:$0xff] }
0x1323   :  { %2950 = vmatprep.subr.mxu1 %v3123_v0  ;;  %2962 = vmatpush3.msra.mxu0 %v3786_v6 }
0x1324   :  { %2951 = vmatpush3.msra.mxu1 %v3792_v7  ;;  %v2577_v7 = vld [vmem:[%s3988_s9 + $0x8] sm:$0xff] }
0x1325   :  { %2953 = vmatmul.mubr.msk.f32.vlgmr.msra.gmra.mxu1 %vm35_vm0, %v2192_v54  ;;  %2966 = vmatprep.subr.mxu1 %v3123_v0 }
0x1326   :  { %2967 = vmatpush3.msra.mxu1 %v3804_v9  ;;  %2974 = vmatprep.mubr.msk.f32.mxu1 %vm3124_vm1, %v3123_v0  ;;  %v2267_v9 = vld [vmem:[%s3988_s9] sm:$0xff] }
0x1327   :  { %2968 = vmatprep.subr.mxu1 %v3123_v0 }
0x1328   :  { %2969 = vmatpush3.msra.mxu1 %v3813_v10 }
0x1329   :  { %2970 = vmatprep.subr.mxu1 %v3123_v0 }
0x132a   :  { %2971 = vmatpush3.msra.mxu1 %v3820_v11 }
0x132b   :  { %2972 = vmatprep.subr.mxu1 %v3123_v0 }
0x132c   :  { %2973 = vmatpush3.msra.mxu1 %v3827_v12 }
0x13db   :  { %v2144_v55 = vpop.f32.mrf.mxu0 }
0x13dd   :  { %v2943_v56 = vpop.f32.mrf.mxu0  ;;  %v2072_v57 = vpop.f32.mrf.mxu1 }
0x13de   :  { %v2145_v58 = vadd.f32 %v2144_v55, %v2072_v57 }
0x13df   :  { %v2932_v59 = vpop.f32.mrf.mxu1 }
0x13e0   :  { %v2148_v61 = vadd.f32 %v3913_v60, %v2145_v58 }
0x13e2   :  { %3086 = vtanh.f32 %v2148_v61  ;;  %v2578_v10 = vmul.f32 -1.442695, %v2148_v61 }
0x13e5   :  { %v2262_v0 = vpop.f32.mrf.mxu1 }
0x13e6   :  { %v2266_v63 = vadd.f32 %v2582_v62, %v2262_v0 }
0x13e7   :  { %v2954_v3 = vpop.f32.mrf.mxu1 }
0x13e8   :  { %3088 = vtanh.f32 %v2266_v63  ;;  %v2584_v11 = vmul.f32 -1.442695, %v2266_v63 }
0x13e9   :  { %3090 = vpow2.f32 %v2578_v10 }
0x13ea   :  { %3092 = vpow2.f32 %v2584_v11 }
0x13ef   :  { %v3087_v6 = vpop.eup %3086 }
0x13f0   :  { %2163 = vrot.lane.b32.xlu0 %v3087_v6, %s3125_s29 }
0x13f4   :  { %2158 = vrot.lane.b32.xlu0 %v2577_v7, %s3126_s11 }
0x13f5   :  { %v3089_v8 = vpop.eup %3088 }
0x13f6   :  { %2281 = vrot.lane.b32.xlu1 %v3089_v8, %s3125_s29  ;;  %v3091_v12 = vpop.eup %3090 }
0x13f7   :  { %v2153_v13 = vadd.f32 1.0, %v3091_v12  ;;  %v3093_v14 = vpop.eup %3092 }
0x13f8   :  { %2276 = vrot.lane.b32.xlu0 %v2267_v9, %s3126_s11  ;;  %v2271_v15 = vadd.f32 1.0, %v3093_v14 }
0x13f9   :  { %3094 = vrcp.f32 %v2153_v13 }
0x13fa   :  { %3096 = vrcp.f32 %v2271_v15 }
0x1406   :  { %v3095_v1 = vpop.eup %3094 }
0x1407   :  { %v3097_v5 = vpop.eup %3096 }
0x1462   :  { %v2164_v2 = vpop.permute.xlu0 %2163 }
0x1463   :  { %v2166_v4 = vmul.f32 %v3095_v1, %v2164_v2 }
0x1465   :  { %2168 = vrot.lane.b32.xlu1 %v2166_v4, %s3126_s11 }
0x1466   :  { %v2159_v27 = vpop.permute.xlu0 %2158 }
0x1467   :  { %v2161_v28 = vmul.f32 %v3095_v1, %v2159_v27 }
0x1468   :  { %v2282_v25 = vpop.permute.xlu1 %2281 }
0x1469   :  { %v2284_v26 = vmul.f32 %v3097_v5, %v2282_v25 }
0x146a   :  { %v2277_v43 = vpop.permute.xlu0 %2276 }
0x146b   :  { %2286 = vrot.lane.b32.xlu1 %v2284_v26, %s3126_s11  ;;  %v2279_v31 = vmul.f32 %v3097_v5, %v2277_v43 }
0x14d7   :  { %v2169_v29 = vpop.permute.xlu1 %2168 }
0x14d8   :  { %v2171_v30 = vadd.f32 %v2169_v29, %v2161_v28 }
0x14da   :  { %3098 = vtanh.f32 %v2171_v30 }
0x14dd   :  { %v2287_v16 = vpop.permute.xlu1 %2286 }
0x14de   :  { %v2289_v32 = vadd.f32 %v2287_v16, %v2279_v31 }
0x14e0   :  { %3100 = vtanh.f32 %v2289_v32 }
0x14e7   :  { %v3099_v17 = vpop.eup %3098 }
0x14e8   :  { %2174 = vrot.lane.b32.xlu0 %v3099_v17, %s3125_s29 }
0x14ed   :  { %v3101_v18 = vpop.eup %3100 }
0x14ee   :  { %2292 = vrot.lane.b32.xlu1 %v3101_v18, %s3125_s29 }
0x155a   :  { %v2175_v19 = vpop.permute.xlu0 %2174 }
0x155b   :  { %v2177_v20 = vmul.f32 %v3095_v1, %v2175_v19 }
0x155d   :  { %2179 = vrot.lane.b32.xlu0 %v2177_v20, %s3126_s11 }
0x1560   :  { %v2293_v21 = vpop.permute.xlu1 %2292 }
0x1561   :  { %v2295_v22 = vmul.f32 %v3097_v5, %v2293_v21  ;;  %2184 = vrot.lane.b32.xlu0 %v2171_v30, %s3127_s14 }
0x1563   :  { %2297 = vrot.lane.b32.xlu1 %v2295_v22, %s3126_s11 }
0x15cf   :  { %v2180_v23 = vpop.permute.xlu0 %2179 }
0x15d0   :  { %2579 = vst.msk [vmem:[%s3986_s8 + $0x8] sm:$0xff] %vm35_vm0, %v2180_v23  ;;  %2581 = vst.msk [vmem:[%s3993_s7 + $0x30] sm:$0xff] %vm35_vm0, %v2180_v23 }
0x15d3   :  { %v2185_v24 = vpop.permute.xlu0 %2184 }
0x15d4   :  { %2580 = vst.msk [vmem:[%s3988_s9 + $0x8] sm:$0xff] %vm35_vm0, %v2185_v24 }
0x15d5   :  { %v2298_v33 = vpop.permute.xlu1 %2297 }
0x15d6   :  { %2300 = vst.msk [vmem:[%s3986_s8] sm:$0xff] %vm35_vm0, %v2298_v33  ;;  %2975 = vmatmul.mubr.msk.f32.vlgmr.msra.gmra.mxu1 %vm35_vm0, %v2298_v33 }
0x15d7   :  { %v2585_v34 = vld [vmem:[%s3986_s8 + $0x8] sm:$0xff] }
0x15d8   :  { %2964 = vmatmul.mubr.msk.f32.vlgmr.msra.gmra.mxu0 %vm35_vm0, %v2585_v34 }
0x15db   :  { %v2588_v35 = vld [vmem:[%s3988_s9 + $0x8] sm:$0xff] }
0x15dc   :  { %2462 = vrot.lane.b32.xlu0 %v2588_v35, %s3126_s11 }
0x164e   :  { %v2463_v50 = vpop.permute.xlu0 %2462 }
0x1696   :  { %v2448_v36 = vpop.f32.mrf.mxu1 }
0x1698   :  { %v2976_v37 = vpop.f32.mrf.mxu1  ;;  %v2376_v38 = vpop.f32.mrf.mxu0 }
0x1699   :  { %v2449_v39 = vadd.f32 %v2448_v36, %v2376_v38 }
0x169a   :  { %v2965_v40 = vpop.f32.mrf.mxu0 }
0x169b   :  { %v2452_v41 = vadd.f32 %v3913_v60, %v2449_v39 }
0x169d   :  { %3102 = vtanh.f32 %v2452_v41  ;;  %v2589_v44 = vmul.f32 -1.442695, %v2452_v41 }
0x169f   :  { %3104 = vpow2.f32 %v2589_v44 }
0x16aa   :  { %v3103_v42 = vpop.eup %3102 }
0x16ab   :  { %2467 = vrot.lane.b32.xlu1 %v3103_v42, %s3125_s29 }
0x16ac   :  { %v3105_v45 = vpop.eup %3104 }
0x16ad   :  { %v2457_v46 = vadd.f32 1.0, %v3105_v45 }
0x16af   :  { %3106 = vrcp.f32 %v2457_v46 }
0x16bc   :  { %v3107_v47 = vpop.eup %3106 }
0x16bd   :  { %v2465_v51 = vmul.f32 %v3107_v47, %v2463_v50 }
0x171d   :  { %v2468_v48 = vpop.permute.xlu1 %2467 }
0x171e   :  { %v2470_v49 = vmul.f32 %v3107_v47, %v2468_v48 }
0x1720   :  { %2472 = vrot.lane.b32.xlu1 %v2470_v49, %s3126_s11 }
0x1724   :  { %2302 = vrot.lane.b32.xlu1 %v2289_v32, %s3127_s14 }
0x1792   :  { %v2473_v52 = vpop.permute.xlu1 %2472 }
0x1793   :  { %v2475_v53 = vadd.f32 %v2473_v52, %v2465_v51 }
0x1795   :  { %3108 = vtanh.f32 %v2475_v53  ;;  %2488 = vrot.lane.b32.xlu1 %v2475_v53, %s3127_s14 }
0x1796   :  { %v2303_v54 = vpop.permute.xlu1 %2302 }
0x1797   :  { %2305 = vst.msk [vmem:[%s3988_s9] sm:$0xff] %vm35_vm0, %v2303_v54 }
0x17a2   :  { %v3109_v55 = vpop.eup %3108 }
0x17a3   :  { %2478 = vrot.lane.b32.xlu0 %v3109_v55, %s3125_s29 }
0x1807   :  { %v2489_v56 = vpop.permute.xlu1 %2488 }
0x1808   :  { %2591 = vst.msk [vmem:[%s3988_s9 + $0x8] sm:$0xff] %vm35_vm0, %v2489_v56 }
0x1815   :  { %v2479_v57 = vpop.permute.xlu0 %2478 }
0x1816   :  { %v2481_v58 = vmul.f32 %v3107_v47, %v2479_v57 }
0x1818   :  { %2483 = vrot.lane.b32.xlu0 %v2481_v58, %s3126_s11 }
0x188a   :  { %v2484_v59 = vpop.permute.xlu0 %2483 }
0x188b   :  { %2590 = vst.msk [vmem:[%s3986_s8 + $0x8] sm:$0xff] %vm35_vm0, %v2484_v59  ;;  %2592 = vst.msk [vmem:[%s3993_s7 + $0x38] sm:$0xff] %vm35_vm0, %v2484_v59 }

</bundles_post_ra>
